<compile_context>
chip_gen: v5e
topology: v5e:2x2
jax: 0.10.0
libtpu: 0.0.40
codegen_flags: <defaults>
</compile_context>

<pallas_src>
import numpy as np
import jax
import jax.numpy as jnp
from jax import lax
from jax.experimental import pallas as pl
from jax.experimental.pallas import tpu as pltpu

LANE = 128                                   # channel slab width, kept end-to-end
_PAD = 16                                    # zero guard rows around the staged 3x3-conv input
_BN_EPS = 1e-5
_BN_SCALE = float((1.0 + _BN_EPS) ** -0.5)   # gamma=1, beta=0, mean=0, var=1 (eval mode)
# TODO(synk): BatchNorm uses eval-mode identity running statistics, pre-folded into the conv /
# linear weights; training-mode batch statistics are not implemented.


# ----------------------------- Pallas kernels ------------------------------

def _make_bottleneck_kernel(H, W):
    """Fused BottleNeck: relu(x) @ W1' -> relu -> 3x3 conv (9 tap dots) -> concat into slab."""
    HW = H * W
    assert _PAD >= W + 1, "guard rows must cover one spatial row of shift"

    def kernel(x_ref, w1_ref, w2_ref, o_ref, mid_ref):
        # x_ref:   (1, HW, 128) bf16    activation slab (lanes >= cin are exactly zero)
        # w1_ref:  (128, 128)   bf16    1x1 conv with BN1*BN2 eval scales folded in
        # w2_ref:  (9, 128, 128) bf16   3x3 taps, (kh, kw)-major; growth cols at lanes [cin,cin+g)
        # o_ref:   (1, HW, 128) bf16    aliased with x
        # mid_ref: (HW + 2*_PAD, 128) bf16 VMEM scratch (zero guard rows top/bottom)
        x = x_ref[0]                                             # (HW, 128) bf16
        a = jnp.maximum(x, 0)                                    # ReLU (BN1 folded into w1)
        mid = jnp.dot(a, w1_ref[...], preferred_element_type=jnp.float32)
        mid = jnp.maximum(mid, 0.0)                              # BN2 folded into w1; ReLU

        # Stage mid in a zero-guarded scratch so all 9 tap reads are plain (shifted) slices.
        mid_ref[pl.ds(0, _PAD), :] = jnp.zeros((_PAD, LANE), jnp.bfloat16)
        mid_ref[pl.ds(_PAD + HW, _PAD), :] = jnp.zeros((_PAD, LANE), jnp.bfloat16)
        mid_ref[pl.ds(_PAD, HW), :] = mid.astype(jnp.bfloat16)

        # Column-validity masks; row over/underflow reads land in the zero guard rows.
        w_of_r = lax.broadcasted_iota(jnp.int32, (HW, 1), 0) % W
        mask = {-1: w_of_r >= 1, 0: None, 1: w_of_r <= W - 2}

        acc = jnp.zeros((HW, LANE), jnp.float32)
        for di in (-1, 0, 1):
            for dj in (-1, 0, 1):
                tap = mid_ref[pl.ds(_PAD + di * W + dj, HW), :]  # (HW, 128) bf16
                if mask[dj] is not None:
                    tap = jnp.where(mask[dj], tap, jnp.zeros_like(tap))
                t = (di + 1) * 3 + (dj + 1)
                acc = acc + jnp.dot(tap, w2_ref[t], preferred_element_type=jnp.float32)

        # Dense concat: conv output already sits at lanes [cin, cin+g) (zero elsewhere) and x is
        # exactly zero there, so one add == torch.cat((x, out), 1). Single lane-dense store.
        o_ref[0, :, :] = x + acc.astype(jnp.bfloat16)

    return kernel


def _transition_kernel(x_ref, w_ref, pool_ref, o_ref):
    """Fused Transition: relu(x) @ W' (BN folded) -> 2x2/2 avg pool via pooling-matrix matmul."""
    a = jnp.maximum(x_ref[0], 0)                                 # (HW, 128) bf16
    y = jnp.dot(a, w_ref[...], preferred_element_type=jnp.float32)
    pooled = jnp.dot(pool_ref[...], y.astype(jnp.bfloat16),
                     preferred_element_type=jnp.float32)         # (HW/4, 128)
    o_ref[0, :, :] = pooled.astype(jnp.bfloat16)


def _stem_matmul_kernel(a_ref, w_ref, b_ref, o_ref):
    """Plain matmul + bias for the 7x7/2 stem conv (im2col'd A operand)."""
    acc = jnp.dot(a_ref[...], w_ref[...], preferred_element_type=jnp.float32)
    o_ref[...] = (acc + b_ref[...]).astype(o_ref.dtype)


def _head_kernel(x_ref, w_ref, b_ref, o_ref):
    """Final ReLU (BN folded into W) + global average pool + Linear + sigmoid, fused."""
    hw = x_ref.shape[1]
    a = jnp.maximum(x_ref[...], 0).astype(jnp.float32)           # (N, HW, 128)
    feat = jnp.sum(a, axis=1) * (1.0 / hw)                       # (N, 128) global avg pool
    logits = jnp.dot(feat.astype(jnp.bfloat16), w_ref[...],
                     preferred_element_type=jnp.float32) + b_ref[...]
    o_ref[...] = 1.0 / (1.0 + jnp.exp(-logits))                  # sigmoid in f32


# ------------------------------ wrappers ------------------------------------

def _choose_tm(M, cap=512):
    """Largest multiple-of-8 divisor of M <= cap, preferring >= 2 grid steps (v7x megacore)."""
    cands = [t for t in range(8, min(cap, M) + 1, 8) if M % t == 0]
    if not cands:
        return M
    multi = [t for t in cands if t < M]
    return max(multi) if multi else max(cands)


def stem_matmul(a2d, w, bias):
    M, Cp = a2d.shape
    Co = w.shape[1]
    tm = _choose_tm(M)
    return pl.pallas_call(
        _stem_matmul_kernel,
        out_shape=jax.ShapeDtypeStruct((M, Co), jnp.bfloat16),
        grid=(M // tm,),
        in_specs=[pl.BlockSpec((tm, Cp), lambda i: (i, 0)),
                  pl.BlockSpec((Cp, Co), lambda i: (0, 0)),
                  pl.BlockSpec((1, Co), lambda i: (0, 0))],
        out_specs=pl.BlockSpec((tm, Co), lambda i: (i, 0)),
        compiler_params=pltpu.CompilerParams(dimension_semantics=("parallel",)),
    )(a2d, w, bias)


def bottleneck_pallas(x, w1, w2, H, W):
    N, HW, Cp = x.shape
    return pl.pallas_call(
        _make_bottleneck_kernel(H, W),
        out_shape=jax.ShapeDtypeStruct((N, HW, Cp), jnp.bfloat16),
        grid=(N,),
        in_specs=[pl.BlockSpec((1, HW, Cp), lambda n: (n, 0, 0)),
                  pl.BlockSpec((Cp, Cp), lambda n: (0, 0)),
                  pl.BlockSpec((9, Cp, Cp), lambda n: (0, 0, 0))],
        out_specs=pl.BlockSpec((1, HW, Cp), lambda n: (n, 0, 0)),
        scratch_shapes=[pltpu.VMEM((HW + 2 * _PAD, Cp), jnp.bfloat16)],
        input_output_aliases={0: 0},          # x slab is updated in place (dense concat)
        compiler_params=pltpu.CompilerParams(dimension_semantics=("parallel",)),
    )(x, w1, w2)


def transition_pallas(x, w, pool_mat):
    N, HW, Cp = x.shape
    HWo = pool_mat.shape[0]
    return pl.pallas_call(
        _transition_kernel,
        out_shape=jax.ShapeDtypeStruct((N, HWo, Cp), jnp.bfloat16),
        grid=(N,),
        in_specs=[pl.BlockSpec((1, HW, Cp), lambda n: (n, 0, 0)),
                  pl.BlockSpec((Cp, Cp), lambda n: (0, 0)),
                  pl.BlockSpec((HWo, HW), lambda n: (0, 0))],
        out_specs=pl.BlockSpec((1, HWo, Cp), lambda n: (n, 0, 0)),
        compiler_params=pltpu.CompilerParams(dimension_semantics=("parallel",)),
    )(x, w, pool_mat)


def head_pallas(x, w, bias):
    N, HW, Cp = x.shape
    return pl.pallas_call(
        _head_kernel,
        out_shape=jax.ShapeDtypeStruct((N, Cp), jnp.float32),
        grid=(1,),
        in_specs=[pl.BlockSpec((N, HW, Cp), lambda i: (0, 0, 0)),
                  pl.BlockSpec((Cp, Cp), lambda i: (0, 0)),
                  pl.BlockSpec((1, Cp), lambda i: (0, 0))],
        out_specs=pl.BlockSpec((N, Cp), lambda i: (0, 0)),
    )(x, w, bias)


# ------------------------------ JAX glue -------------------------------------

def im2col_stem(x_nhwc, kh, kw, stride, pad):
    """im2col for the stem only (Cin=1 -> K=49 taps, padded to one 128-lane slab)."""
    # TODO(synk): for large inputs, move the stem im2col + 3x3/2 max-pool into Pallas
    # (stride-2 tap reads); at 32x32 / Cin=1 the one-off XLA path is negligible.
    N, H, W, C = x_nhwc.shape
    assert kh * kw * C <= LANE
    xp = jnp.pad(x_nhwc, ((0, 0), (pad, pad), (pad, pad), (0, 0)))
    Ho = (H + 2 * pad - kh) // stride + 1
    Wo = (W + 2 * pad - kw) // stride + 1
    cols = [xp[:, i:i + stride * Ho:stride, j:j + stride * Wo:stride, :]
            for i in range(kh) for j in range(kw)]
    k = kh * kw * C
    if k < LANE:
        cols.append(jnp.zeros((N, Ho, Wo, LANE - k), x_nhwc.dtype))
    patches = jnp.concatenate(cols, axis=-1)
    return patches.reshape(N * Ho * Wo, LANE).astype(jnp.bfloat16), N, Ho, Wo


def max_pool_3x3_s2_p1(x):
    return lax.reduce_window(x, jnp.array(-jnp.inf, x.dtype), lax.max,
                             window_dimensions=(1, 3, 3, 1), window_strides=(1, 2, 2, 1),
                             padding=[(0, 0), (1, 1), (1, 1), (0, 0)])


def _pool_matrix(H, W):
    """(H/2*W/2, H*W) matrix A so that A @ flat(y) == 2x2 stride-2 average pool of y."""
    A = np.zeros(((H // 2) * (W // 2), H * W), np.float32)
    for ho in range(H // 2):
        for wo in range(W // 2):
            r = ho * (W // 2) + wo
            for dh in range(2):
                for dw in range(2):
                    A[r, (2 * ho + dh) * W + (2 * wo + dw)] = 0.25
    return jnp.asarray(A, jnp.bfloat16)


# --------------------------- parameter creation ------------------------------
# NOTE: conv weights are laid out (kh, kw, Cin)-major -> Cout; real PyTorch weights
# (Cout, Cin, kh, kw) need a permute before loading. Eval-mode BN scales are pre-folded
# into the weights; padded rows/cols are zero so padded activation lanes stay exactly zero.

def _conv1x1_w(key, cin, cout, scale):
    std = (2.0 / cout) ** 0.5                       # kaiming_normal_, fan_out, k=1
    w = jax.random.normal(key, (cin, cout), jnp.float32) * std * scale
    return jnp.zeros((LANE, LANE), jnp.float32).at[:cin, :cout].set(w).astype(jnp.bfloat16)


def _conv3x3_w(key, cin, cout, lane_offset):
    std = (2.0 / (cout * 9)) ** 0.5                 # kaiming_normal_, fan_out, k=3
    w = jax.random.normal(key, (9, cin, cout), jnp.float32) * std
    return (jnp.zeros((9, LANE, LANE), jnp.float32)
            .at[:, :cin, lane_offset:lane_offset + cout].set(w).astype(jnp.bfloat16))


def _stem_w(key, cin, cout, kh, kw):
    std = (2.0 / (cout * kh * kw)) ** 0.5
    w = jax.random.normal(key, (kh * kw * cin, cout), jnp.float32) * std
    return (jnp.zeros((LANE, LANE), jnp.float32)
            .at[:kh * kw * cin, :cout].set(w).astype(jnp.bfloat16))


def init_densenet_params(key, growth_rate, nblocks, reduction, num_classes):
    keys = iter(jax.random.split(key, 256))
    inner = 2 * growth_rate
    params = {"stem": {"w": _stem_w(next(keys), 1, inner, 7, 7),
                       "b": jnp.zeros((1, LANE), jnp.float32)}}   # conv1 bias (zero init)
    features = []

    def add_bottleneck(cin):
        g = growth_rate
        features.append(("bottleneck", {
            # BN1 and BN2 eval scales folded into the 1x1 weight; 3x3 output cols placed
            # directly at the concat lanes [cin, cin+g).
            "w1": _conv1x1_w(next(keys), cin, 4 * g, scale=_BN_SCALE * _BN_SCALE),
            "w2": _conv3x3_w(next(keys), 4 * g, g, lane_offset=cin),
        }))
        return cin + g

    for i in range(len(nblocks) - 1):
        for _ in range(nblocks[i]):
            inner = add_bottleneck(inner)
        out_ch = int(reduction * inner)
        features.append(("transition", {
            "w": _conv1x1_w(next(keys), inner, out_ch, scale=_BN_SCALE)}))
        inner = out_ch
    for _ in range(nblocks[-1]):
        inner = add_bottleneck(inner)
    assert inner <= LANE, "channel width must fit one 128-lane slab for this config"
    params["features"] = features

    lw = jax.random.normal(next(keys), (inner, num_classes), jnp.float32) * 0.01 * _BN_SCALE
    params["head"] = {
        "w": jnp.zeros((LANE, LANE), jnp.float32)
                .at[:inner, :num_classes].set(lw).astype(jnp.bfloat16),
        "b": jnp.zeros((1, LANE), jnp.float32),
        "nc": num_classes,
    }
    return params


# -------------------------------- forward ------------------------------------

def densenet_forward(params, x_nchw):
    x = jnp.transpose(x_nchw, (0, 2, 3, 1)).astype(jnp.float32)        # NCHW -> NHWC
    # Stem: 7x7/2 conv (with bias) via im2col + Pallas matmul, then 3x3/2 max-pool (XLA, bf16).
    cols, N, Ho, Wo = im2col_stem(x, 7, 7, 2, 3)
    x = stem_matmul(cols, params["stem"]["w"], params["stem"]["b"]).reshape(N, Ho, Wo, LANE)
    x = max_pool_3x3_s2_p1(x)                                          # (N, H, W, 128) bf16

    N, H, W, _ = x.shape
    x = x.reshape(N, H * W, LANE)                                      # fixed 128-lane slab
    for kind, p in params["features"]:
        if kind == "bottleneck":
            x = bottleneck_pallas(x, p["w1"], p["w2"], H, W)           # one fused call / block
        else:
            x = transition_pallas(x, p["w"], _pool_matrix(H, W))       # conv + avg-pool fused
            H, W = H // 2, W // 2

    # Head: final BN+ReLU (folded) + global-average-pool + Linear + sigmoid, one fused kernel.
    out = head_pallas(x, params["head"]["w"], params["head"]["b"])
    return out[:, :params["head"]["nc"]]                               # only slice at the end


# ---------------------------------- main --------------------------------------

if __name__ == "__main__":
    key = jax.random.PRNGKey(0)
    k_params, k_x = jax.random.split(key)

    growth_rate = 4
    nblocks = [2, 2]
    reduction = 0.5
    num_classes = 10

    params = init_densenet_params(k_params, growth_rate, nblocks, reduction, num_classes)
    forward = jax.jit(lambda inp: densenet_forward(params, inp))

    # Input: batch=2, 1 channel (the model's first conv takes 1 input channel), 32x32.
    x = jax.random.normal(k_x, (2, 1, 32, 32), jnp.float32)

    out = jax.block_until_ready(forward(x))

    assert out.shape == (2, num_classes), out.shape
    assert bool(jnp.all(jnp.isfinite(out)))
    assert bool(jnp.all((out >= 0.0) & (out <= 1.0)))        # sigmoid range
    print("KERNEL_OK")
</pallas_src>

<mosaic_0001>
module attributes {stable_mosaic.version = 11 : i64} {
  func.func @_stem_matmul_kernel(%arg0: i32, %arg1: memref<256x128xbf16, #tpu.memory_space<vmem>>, %arg2: memref<128x128xbf16, #tpu.memory_space<vmem>>, %arg3: memref<1x128xf32, #tpu.memory_space<vmem>>, %arg4: memref<256x128xbf16, #tpu.memory_space<vmem>>) attributes {dimension_semantics = [#tpu.dimension_semantics<parallel>], iteration_bounds = array<i64: 2>, scalar_prefetch = 0 : i64, scratch_operands = 0 : i64, tpu.core_type = #tpu.core_type<tc>, window_params = [{transform_indices = @transform_0, window_bounds = array<i64: 256, 128>}, {pipeline_mode = #tpu.pipeline_mode<synchronous>, transform_indices = @transform_1, window_bounds = array<i64: 128, 128>}, {pipeline_mode = #tpu.pipeline_mode<synchronous>, transform_indices = @transform_2, window_bounds = array<i64: 1, 128>}, {transform_indices = @transform_3, window_bounds = array<i64: 256, 128>}]} {
    %c0 = arith.constant 0 : index
    %c0_0 = arith.constant 0 : index
    %0 = vector.load %arg1[%c0, %c0_0] : memref<256x128xbf16, #tpu.memory_space<vmem>>, vector<256x128xbf16>
    %c0_1 = arith.constant 0 : index
    %c0_2 = arith.constant 0 : index
    %1 = vector.load %arg2[%c0_1, %c0_2] : memref<128x128xbf16, #tpu.memory_space<vmem>>, vector<128x128xbf16>
    %cst = arith.constant dense<0.000000e+00> : vector<256x128xf32>
    %2 = tpu.matmul %0, %1, %cst {dimension_numbers = #tpu.dot_dimension_numbers<[1], [0], [0], [1], [0, 0, 1, 1], [], []>} : vector<256x128xbf16>, vector<128x128xbf16>, vector<256x128xf32> -> vector<256x128xf32>
    %c0_3 = arith.constant 0 : index
    %c0_4 = arith.constant 0 : index
    %3 = vector.load %arg3[%c0_3, %c0_4] : memref<1x128xf32, #tpu.memory_space<vmem>>, vector<1x128xf32>
    %4 = vector.broadcast %3 : vector<1x128xf32> to vector<256x128xf32>
    %5 = arith.addf %2, %4 : vector<256x128xf32>
    %6 = arith.truncf %5 : vector<256x128xf32> to vector<256x128xbf16>
    %c0_5 = arith.constant 0 : index
    %c0_6 = arith.constant 0 : index
    %7 = vector.load %arg4[%c0_5, %c0_6] : memref<256x128xbf16, #tpu.memory_space<vmem>>, vector<256x128xbf16>
    tpu.vector_store %arg4[%c0_5, %c0_6], %6 {strides = array<i32>} : memref<256x128xbf16, #tpu.memory_space<vmem>>, vector<256x128xbf16>,
    return
  }
  func.func @transform_0(%arg0: i32) -> (i32, i32) {
    %c0_i32 = arith.constant 0 : i32
    %c0_i32_0 = arith.constant 0 : i32
    return %arg0, %c0_i32 : i32, i32
  }
  func.func @transform_1(%arg0: i32) -> (i32, i32) {
    %c0_i32 = arith.constant 0 : i32
    %c0_i32_0 = arith.constant 0 : i32
    %c0_i32_1 = arith.constant 0 : i32
    return %c0_i32, %c0_i32_0 : i32, i32
  }
  func.func @transform_2(%arg0: i32) -> (i32, i32) {
    %c0_i32 = arith.constant 0 : i32
    %c0_i32_0 = arith.constant 0 : i32
    %c0_i32_1 = arith.constant 0 : i32
    return %c0_i32, %c0_i32_0 : i32, i32
  }
  func.func @transform_3(%arg0: i32) -> (i32, i32) {
    %c0_i32 = arith.constant 0 : i32
    %c0_i32_0 = arith.constant 0 : i32
    return %arg0, %c0_i32 : i32, i32
  }
}

module attributes {stable_mosaic.version = 11 : i64} {
  func.func @kernel(%arg0: i32, %arg1: memref<1x64x128xbf16, #tpu.memory_space<vmem>>, %arg2: memref<128x128xbf16, #tpu.memory_space<vmem>>, %arg3: memref<9x128x128xbf16, #tpu.memory_space<vmem>>, %arg4: memref<1x64x128xbf16, #tpu.memory_space<vmem>>, %arg5: memref<96x128xbf16, #tpu.memory_space<vmem>>) attributes {dimension_semantics = [#tpu.dimension_semantics<parallel>], iteration_bounds = array<i64: 2>, scalar_prefetch = 0 : i64, scratch_operands = 1 : i64, tpu.core_type = #tpu.core_type<tc>, window_params = [{transform_indices = @transform_0, window_bounds = array<i64: 1, 64, 128>}, {pipeline_mode = #tpu.pipeline_mode<synchronous>, transform_indices = @transform_1, window_bounds = array<i64: 128, 128>}, {pipeline_mode = #tpu.pipeline_mode<synchronous>, transform_indices = @transform_2, window_bounds = array<i64: 9, 128, 128>}, {transform_indices = @transform_3, window_bounds = array<i64: 1, 64, 128>}]} {
    %c0 = arith.constant 0 : index
    %c0_0 = arith.constant 0 : index
    %c0_1 = arith.constant 0 : index
    %0 = vector.load %arg1[%c0, %c0_0, %c0_1] : memref<1x64x128xbf16, #tpu.memory_space<vmem>>, vector<1x64x128xbf16>
    %1 = vector.shape_cast %0 : vector<1x64x128xbf16> to vector<64x128xbf16>
    %cst = arith.constant 0.000000e+00 : bf16
    %2 = vector.broadcast %cst : bf16 to vector<64x128xbf16>
    %3 = arith.maximumf %1, %2 : vector<64x128xbf16>
    %c0_2 = arith.constant 0 : index
    %c0_3 = arith.constant 0 : index
    %4 = vector.load %arg2[%c0_2, %c0_3] : memref<128x128xbf16, #tpu.memory_space<vmem>>, vector<128x128xbf16>
    %cst_4 = arith.constant dense<0.000000e+00> : vector<64x128xf32>
    %5 = tpu.matmul %3, %4, %cst_4 {dimension_numbers = #tpu.dot_dimension_numbers<[1], [0], [0], [1], [0, 0, 1, 1], [], []>} : vector<64x128xbf16>, vector<128x128xbf16>, vector<64x128xf32> -> vector<64x128xf32>
    %cst_5 = arith.constant 0.000000e+00 : f32
    %6 = vector.broadcast %cst_5 : f32 to vector<64x128xf32>
    %7 = arith.maximumf %5, %6 : vector<64x128xf32>
    %cst_6 = arith.constant 0.000000e+00 : bf16
    %8 = vector.broadcast %cst_6 : bf16 to vector<16x128xbf16>
    %c0_7 = arith.constant 0 : index
    %c0_8 = arith.constant 0 : index
    %9 = vector.load %arg5[%c0_7, %c0_8] : memref<96x128xbf16, #tpu.memory_space<vmem>>, vector<16x128xbf16>
    tpu.vector_store %arg5[%c0_7, %c0_8], %8 {strides = array<i32>} : memref<96x128xbf16, #tpu.memory_space<vmem>>, vector<16x128xbf16>,
    %cst_9 = arith.constant 0.000000e+00 : bf16
    %10 = vector.broadcast %cst_9 : bf16 to vector<16x128xbf16>
    %c80 = arith.constant 80 : index
    %c0_10 = arith.constant 0 : index
    %11 = vector.load %arg5[%c80, %c0_10] : memref<96x128xbf16, #tpu.memory_space<vmem>>, vector<16x128xbf16>
    tpu.vector_store %arg5[%c80, %c0_10], %10 {strides = array<i32>} : memref<96x128xbf16, #tpu.memory_space<vmem>>, vector<16x128xbf16>,
    %12 = arith.truncf %7 : vector<64x128xf32> to vector<64x128xbf16>
    %c16 = arith.constant 16 : index
    %c0_11 = arith.constant 0 : index
    %13 = vector.load %arg5[%c16, %c0_11] : memref<96x128xbf16, #tpu.memory_space<vmem>>, vector<64x128xbf16>
    tpu.vector_store %arg5[%c16, %c0_11], %12 {strides = array<i32>} : memref<96x128xbf16, #tpu.memory_space<vmem>>, vector<64x128xbf16>,
    %14 = tpu.iota {dimensions = array<i32: 0>} : vector<64x1xi32>
    %c8_i32 = arith.constant 8 : i32
    %c0_i32 = arith.constant 0 : i32
    %15 = arith.cmpi eq, %c8_i32, %c0_i32 : i32
    %c1_i32 = arith.constant 1 : i32
    %16 = arith.select %15, %c1_i32, %c8_i32 : i32
    %17 = vector.broadcast %16 : i32 to vector<64x1xi32>
    %18 = arith.remsi %14, %17 : vector<64x1xi32>
    %c0_i32_12 = arith.constant 0 : i32
    %19 = vector.broadcast %c0_i32_12 : i32 to vector<64x1xi32>
    %20 = arith.cmpi ne, %18, %19 : vector<64x1xi32>
    %c0_i32_13 = arith.constant 0 : i32
    %21 = vector.broadcast %c0_i32_13 : i32 to vector<64x1xi32>
    %22 = arith.cmpi slt, %18, %21 : vector<64x1xi32>
    %c0_i32_14 = arith.constant 0 : i32
    %23 = arith.cmpi slt, %16, %c0_i32_14 : i32
    %24 = vector.broadcast %23 : i1 to vector<64x1xi1>
    %25 = vector.broadcast %24 : vector<64x1xi1> to vector<64x1xi1>
    %26 = arith.xori %22, %25 : vector<64x1xi1>
    %27 = arith.andi %26, %20 : vector<64x1xi1>
    %28 = vector.broadcast %16 : i32 to vector<64x1xi32>
    %29 = arith.addi %18, %28 : vector<64x1xi32>
    %30 = arith.select %27, %29, %18 : vector<64x1xi1>, vector<64x1xi32>
    %c1_i32_15 = arith.constant 1 : i32
    %31 = vector.broadcast %c1_i32_15 : i32 to vector<64x1xi32>
    %32 = arith.cmpi sge, %30, %31 : vector<64x1xi32>
    %c6_i32 = arith.constant 6 : i32
    %33 = vector.broadcast %c6_i32 : i32 to vector<64x1xi32>
    %34 = arith.cmpi sle, %30, %33 : vector<64x1xi32>
    %cst_16 = arith.constant 0.000000e+00 : f32
    %35 = vector.broadcast %cst_16 : f32 to vector<64x128xf32>
    %c7 = arith.constant 7 : index
    %c0_17 = arith.constant 0 : index
    %36 = vector.load %arg5[%c7, %c0_17] : memref<96x128xbf16, #tpu.memory_space<vmem>>, vector<64x128xbf16>
    %cst_18 = arith.constant 0.000000e+00 : bf16
    %37 = vector.broadcast %cst_18 : bf16 to vector<64x128xbf16>
    %38 = vector.shape_cast %32 : vector<64x1xi1> to vector<64x1xi1>
    %39 = vector.broadcast %38 : vector<64x1xi1> to vector<64x128xi1>
    %40 = arith.select %39, %36, %37 : vector<64x128xi1>, vector<64x128xbf16>
    %c0_19 = arith.constant 0 : index
    %c0_20 = arith.constant 0 : index
    %c0_21 = arith.constant 0 : index
    %41 = vector.load %arg3[%c0_19, %c0_20, %c0_21] : memref<9x128x128xbf16, #tpu.memory_space<vmem>>, vector<1x128x128xbf16>
    %42 = vector.shape_cast %41 : vector<1x128x128xbf16> to vector<128x128xbf16>
    %cst_22 = arith.constant dense<0.000000e+00> : vector<64x128xf32>
    %43 = tpu.matmul %40, %42, %cst_22 {dimension_numbers = #tpu.dot_dimension_numbers<[1], [0], [0], [1], [0, 0, 1, 1], [], []>} : vector<64x128xbf16>, vector<128x128xbf16>, vector<64x128xf32> -> vector<64x128xf32>
    %44 = arith.addf %35, %43 : vector<64x128xf32>
    %c8 = arith.constant 8 : index
    %c0_23 = arith.constant 0 : index
    %45 = vector.load %arg5[%c8, %c0_23] : memref<96x128xbf16, #tpu.memory_space<vmem>>, vector<64x128xbf16>
    %c1 = arith.constant 1 : index
    %c0_24 = arith.constant 0 : index
    %c0_25 = arith.constant 0 : index
    %46 = vector.load %arg3[%c1, %c0_24, %c0_25] : memref<9x128x128xbf16, #tpu.memory_space<vmem>>, vector<1x128x128xbf16>
    %47 = vector.shape_cast %46 : vector<1x128x128xbf16> to vector<128x128xbf16>
    %cst_26 = arith.constant dense<0.000000e+00> : vector<64x128xf32>
    %48 = tpu.matmul %45, %47, %cst_26 {dimension_numbers = #tpu.dot_dimension_numbers<[1], [0], [0], [1], [0, 0, 1, 1], [], []>} : vector<64x128xbf16>, vector<128x128xbf16>, vector<64x128xf32> -> vector<64x128xf32>
    %49 = arith.addf %44, %48 : vector<64x128xf32>
    %c9 = arith.constant 9 : index
    %c0_27 = arith.constant 0 : index
    %50 = vector.load %arg5[%c9, %c0_27] : memref<96x128xbf16, #tpu.memory_space<vmem>>, vector<64x128xbf16>
    %cst_28 = arith.constant 0.000000e+00 : bf16
    %51 = vector.broadcast %cst_28 : bf16 to vector<64x128xbf16>
    %52 = vector.shape_cast %34 : vector<64x1xi1> to vector<64x1xi1>
    %53 = vector.broadcast %52 : vector<64x1xi1> to vector<64x128xi1>
    %54 = arith.select %53, %50, %51 : vector<64x128xi1>, vector<64x128xbf16>
    %c2 = arith.constant 2 : index
    %c0_29 = arith.constant 0 : index
    %c0_30 = arith.constant 0 : index
    %55 = vector.load %arg3[%c2, %c0_29, %c0_30] : memref<9x128x128xbf16, #tpu.memory_space<vmem>>, vector<1x128x128xbf16>
    %56 = vector.shape_cast %55 : vector<1x128x128xbf16> to vector<128x128xbf16>
    %cst_31 = arith.constant dense<0.000000e+00> : vector<64x128xf32>
    %57 = tpu.matmul %54, %56, %cst_31 {dimension_numbers = #tpu.dot_dimension_numbers<[1], [0], [0], [1], [0, 0, 1, 1], [], []>} : vector<64x128xbf16>, vector<128x128xbf16>, vector<64x128xf32> -> vector<64x128xf32>
    %58 = arith.addf %49, %57 : vector<64x128xf32>
    %c15 = arith.constant 15 : index
    %c0_32 = arith.constant 0 : index
    %59 = vector.load %arg5[%c15, %c0_32] : memref<96x128xbf16, #tpu.memory_space<vmem>>, vector<64x128xbf16>
    %cst_33 = arith.constant 0.000000e+00 : bf16
    %60 = vector.broadcast %cst_33 : bf16 to vector<64x128xbf16>
    %61 = vector.shape_cast %32 : vector<64x1xi1> to vector<64x1xi1>
    %62 = vector.broadcast %61 : vector<64x1xi1> to vector<64x128xi1>
    %63 = arith.select %62, %59, %60 : vector<64x128xi1>, vector<64x128xbf16>
    %c3 = arith.constant 3 : index
    %c0_34 = arith.constant 0 : index
    %c0_35 = arith.constant 0 : index
    %64 = vector.load %arg3[%c3, %c0_34, %c0_35] : memref<9x128x128xbf16, #tpu.memory_space<vmem>>, vector<1x128x128xbf16>
    %65 = vector.shape_cast %64 : vector<1x128x128xbf16> to vector<128x128xbf16>
    %cst_36 = arith.constant dense<0.000000e+00> : vector<64x128xf32>
    %66 = tpu.matmul %63, %65, %cst_36 {dimension_numbers = #tpu.dot_dimension_numbers<[1], [0], [0], [1], [0, 0, 1, 1], [], []>} : vector<64x128xbf16>, vector<128x128xbf16>, vector<64x128xf32> -> vector<64x128xf32>
    %67 = arith.addf %58, %66 : vector<64x128xf32>
    %c16_37 = arith.constant 16 : index
    %c0_38 = arith.constant 0 : index
    %68 = vector.load %arg5[%c16_37, %c0_38] : memref<96x128xbf16, #tpu.memory_space<vmem>>, vector<64x128xbf16>
    %c4 = arith.constant 4 : index
    %c0_39 = arith.constant 0 : index
    %c0_40 = arith.constant 0 : index
    %69 = vector.load %arg3[%c4, %c0_39, %c0_40] : memref<9x128x128xbf16, #tpu.memory_space<vmem>>, vector<1x128x128xbf16>
    %70 = vector.shape_cast %69 : vector<1x128x128xbf16> to vector<128x128xbf16>
    %cst_41 = arith.constant dense<0.000000e+00> : vector<64x128xf32>
    %71 = tpu.matmul %68, %70, %cst_41 {dimension_numbers = #tpu.dot_dimension_numbers<[1], [0], [0], [1], [0, 0, 1, 1], [], []>} : vector<64x128xbf16>, vector<128x128xbf16>, vector<64x128xf32> -> vector<64x128xf32>
    %72 = arith.addf %67, %71 : vector<64x128xf32>
    %c17 = arith.constant 17 : index
    %c0_42 = arith.constant 0 : index
    %73 = vector.load %arg5[%c17, %c0_42] : memref<96x128xbf16, #tpu.memory_space<vmem>>, vector<64x128xbf16>
    %cst_43 = arith.constant 0.000000e+00 : bf16
    %74 = vector.broadcast %cst_43 : bf16 to vector<64x128xbf16>
    %75 = vector.shape_cast %34 : vector<64x1xi1> to vector<64x1xi1>
    %76 = vector.broadcast %75 : vector<64x1xi1> to vector<64x128xi1>
    %77 = arith.select %76, %73, %74 : vector<64x128xi1>, vector<64x128xbf16>
    %c5 = arith.constant 5 : index
    %c0_44 = arith.constant 0 : index
    %c0_45 = arith.constant 0 : index
    %78 = vector.load %arg3[%c5, %c0_44, %c0_45] : memref<9x128x128xbf16, #tpu.memory_space<vmem>>, vector<1x128x128xbf16>
    %79 = vector.shape_cast %78 : vector<1x128x128xbf16> to vector<128x128xbf16>
    %cst_46 = arith.constant dense<0.000000e+00> : vector<64x128xf32>
    %80 = tpu.matmul %77, %79, %cst_46 {dimension_numbers = #tpu.dot_dimension_numbers<[1], [0], [0], [1], [0, 0, 1, 1], [], []>} : vector<64x128xbf16>, vector<128x128xbf16>, vector<64x128xf32> -> vector<64x128xf32>
    %81 = arith.addf %72, %80 : vector<64x128xf32>
    %c23 = arith.constant 23 : index
    %c0_47 = arith.constant 0 : index
    %82 = vector.load %arg5[%c23, %c0_47] : memref<96x128xbf16, #tpu.memory_space<vmem>>, vector<64x128xbf16>
    %cst_48 = arith.constant 0.000000e+00 : bf16
    %83 = vector.broadcast %cst_48 : bf16 to vector<64x128xbf16>
    %84 = vector.shape_cast %32 : vector<64x1xi1> to vector<64x1xi1>
    %85 = vector.broadcast %84 : vector<64x1xi1> to vector<64x128xi1>
    %86 = arith.select %85, %82, %83 : vector<64x128xi1>, vector<64x128xbf16>
    %c6 = arith.constant 6 : index
    %c0_49 = arith.constant 0 : index
    %c0_50 = arith.constant 0 : index
    %87 = vector.load %arg3[%c6, %c0_49, %c0_50] : memref<9x128x128xbf16, #tpu.memory_space<vmem>>, vector<1x128x128xbf16>
    %88 = vector.shape_cast %87 : vector<1x128x128xbf16> to vector<128x128xbf16>
    %cst_51 = arith.constant dense<0.000000e+00> : vector<64x128xf32>
    %89 = tpu.matmul %86, %88, %cst_51 {dimension_numbers = #tpu.dot_dimension_numbers<[1], [0], [0], [1], [0, 0, 1, 1], [], []>} : vector<64x128xbf16>, vector<128x128xbf16>, vector<64x128xf32> -> vector<64x128xf32>
    %90 = arith.addf %81, %89 : vector<64x128xf32>
    %c24 = arith.constant 24 : index
    %c0_52 = arith.constant 0 : index
    %91 = vector.load %arg5[%c24, %c0_52] : memref<96x128xbf16, #tpu.memory_space<vmem>>, vector<64x128xbf16>
    %c7_53 = arith.constant 7 : index
    %c0_54 = arith.constant 0 : index
    %c0_55 = arith.constant 0 : index
    %92 = vector.load %arg3[%c7_53, %c0_54, %c0_55] : memref<9x128x128xbf16, #tpu.memory_space<vmem>>, vector<1x128x128xbf16>
    %93 = vector.shape_cast %92 : vector<1x128x128xbf16> to vector<128x128xbf16>
    %cst_56 = arith.constant dense<0.000000e+00> : vector<64x128xf32>
    %94 = tpu.matmul %91, %93, %cst_56 {dimension_numbers = #tpu.dot_dimension_numbers<[1], [0], [0], [1], [0, 0, 1, 1], [], []>} : vector<64x128xbf16>, vector<128x128xbf16>, vector<64x128xf32> -> vector<64x128xf32>
    %95 = arith.addf %90, %94 : vector<64x128xf32>
    %c25 = arith.constant 25 : index
    %c0_57 = arith.constant 0 : index
    %96 = vector.load %arg5[%c25, %c0_57] : memref<96x128xbf16, #tpu.memory_space<vmem>>, vector<64x128xbf16>
    %cst_58 = arith.constant 0.000000e+00 : bf16
    %97 = vector.broadcast %cst_58 : bf16 to vector<64x128xbf16>
    %98 = vector.shape_cast %34 : vector<64x1xi1> to vector<64x1xi1>
    %99 = vector.broadcast %98 : vector<64x1xi1> to vector<64x128xi1>
    %100 = arith.select %99, %96, %97 : vector<64x128xi1>, vector<64x128xbf16>
    %c8_59 = arith.constant 8 : index
    %c0_60 = arith.constant 0 : index
    %c0_61 = arith.constant 0 : index
    %101 = vector.load %arg3[%c8_59, %c0_60, %c0_61] : memref<9x128x128xbf16, #tpu.memory_space<vmem>>, vector<1x128x128xbf16>
    %102 = vector.shape_cast %101 : vector<1x128x128xbf16> to vector<128x128xbf16>
    %cst_62 = arith.constant dense<0.000000e+00> : vector<64x128xf32>
    %103 = tpu.matmul %100, %102, %cst_62 {dimension_numbers = #tpu.dot_dimension_numbers<[1], [0], [0], [1], [0, 0, 1, 1], [], []>} : vector<64x128xbf16>, vector<128x128xbf16>, vector<64x128xf32> -> vector<64x128xf32>
    %104 = arith.addf %95, %103 : vector<64x128xf32>
    %105 = arith.truncf %104 : vector<64x128xf32> to vector<64x128xbf16>
    %106 = arith.addf %1, %105 : vector<64x128xbf16>
    %c0_63 = arith.constant 0 : index
    %c0_64 = arith.constant 0 : index
    %c0_65 = arith.constant 0 : index
    %107 = vector.load %arg4[%c0_63, %c0_64, %c0_65] : memref<1x64x128xbf16, #tpu.memory_space<vmem>>, vector<1x64x128xbf16>
    %108 = vector.shape_cast %107 : vector<1x64x128xbf16> to vector<64x128xbf16>
    %109 = vector.shape_cast %106 : vector<64x128xbf16> to vector<1x64x128xbf16>
    tpu.vector_store %arg4[%c0_63, %c0_64, %c0_65], %109 {strides = array<i32>} : memref<1x64x128xbf16, #tpu.memory_space<vmem>>, vector<1x64x128xbf16>,
    return
  }
  func.func @transform_0(%arg0: i32) -> (i32, i32, i32) {
    %c0_i32 = arith.constant 0 : i32
    %c0_i32_0 = arith.constant 0 : i32
    %c0_i32_1 = arith.constant 0 : i32
    return %arg0, %c0_i32, %c0_i32_0 : i32, i32, i32
  }
  func.func @transform_1(%arg0: i32) -> (i32, i32) {
    %c0_i32 = arith.constant 0 : i32
    %c0_i32_0 = arith.constant 0 : i32
    %c0_i32_1 = arith.constant 0 : i32
    return %c0_i32, %c0_i32_0 : i32, i32
  }
  func.func @transform_2(%arg0: i32) -> (i32, i32, i32) {
    %c0_i32 = arith.constant 0 : i32
    %c0_i32_0 = arith.constant 0 : i32
    %c0_i32_1 = arith.constant 0 : i32
    %c0_i32_2 = arith.constant 0 : i32
    return %c0_i32, %c0_i32_0, %c0_i32_1 : i32, i32, i32
  }
  func.func @transform_3(%arg0: i32) -> (i32, i32, i32) {
    %c0_i32 = arith.constant 0 : i32
    %c0_i32_0 = arith.constant 0 : i32
    %c0_i32_1 = arith.constant 0 : i32
    return %arg0, %c0_i32, %c0_i32_0 : i32, i32, i32
  }
}

module attributes {stable_mosaic.version = 11 : i64} {
  func.func @_transition_kernel(%arg0: i32, %arg1: memref<1x64x128xbf16, #tpu.memory_space<vmem>>, %arg2: memref<128x128xbf16, #tpu.memory_space<vmem>>, %arg3: memref<16x64xbf16, #tpu.memory_space<vmem>>, %arg4: memref<1x16x128xbf16, #tpu.memory_space<vmem>>) attributes {dimension_semantics = [#tpu.dimension_semantics<parallel>], iteration_bounds = array<i64: 2>, scalar_prefetch = 0 : i64, scratch_operands = 0 : i64, tpu.core_type = #tpu.core_type<tc>, window_params = [{transform_indices = @transform_0, window_bounds = array<i64: 1, 64, 128>}, {pipeline_mode = #tpu.pipeline_mode<synchronous>, transform_indices = @transform_1, window_bounds = array<i64: 128, 128>}, {pipeline_mode = #tpu.pipeline_mode<synchronous>, transform_indices = @transform_2, window_bounds = array<i64: 16, 64>}, {transform_indices = @transform_3, window_bounds = array<i64: 1, 16, 128>}]} {
    %c0 = arith.constant 0 : index
    %c0_0 = arith.constant 0 : index
    %c0_1 = arith.constant 0 : index
    %0 = vector.load %arg1[%c0, %c0_0, %c0_1] : memref<1x64x128xbf16, #tpu.memory_space<vmem>>, vector<1x64x128xbf16>
    %1 = vector.shape_cast %0 : vector<1x64x128xbf16> to vector<64x128xbf16>
    %cst = arith.constant 0.000000e+00 : bf16
    %2 = vector.broadcast %cst : bf16 to vector<64x128xbf16>
    %3 = arith.maximumf %1, %2 : vector<64x128xbf16>
    %c0_2 = arith.constant 0 : index
    %c0_3 = arith.constant 0 : index
    %4 = vector.load %arg2[%c0_2, %c0_3] : memref<128x128xbf16, #tpu.memory_space<vmem>>, vector<128x128xbf16>
    %cst_4 = arith.constant dense<0.000000e+00> : vector<64x128xf32>
    %5 = tpu.matmul %3, %4, %cst_4 {dimension_numbers = #tpu.dot_dimension_numbers<[1], [0], [0], [1], [0, 0, 1, 1], [], []>} : vector<64x128xbf16>, vector<128x128xbf16>, vector<64x128xf32> -> vector<64x128xf32>
    %c0_5 = arith.constant 0 : index
    %c0_6 = arith.constant 0 : index
    %6 = vector.load %arg3[%c0_5, %c0_6] : memref<16x64xbf16, #tpu.memory_space<vmem>>, vector<16x64xbf16>
    %7 = arith.truncf %5 : vector<64x128xf32> to vector<64x128xbf16>
    %cst_7 = arith.constant dense<0.000000e+00> : vector<16x128xf32>
    %8 = tpu.matmul %6, %7, %cst_7 {dimension_numbers = #tpu.dot_dimension_numbers<[1], [0], [0], [1], [0, 0, 1, 1], [], []>} : vector<16x64xbf16>, vector<64x128xbf16>, vector<16x128xf32> -> vector<16x128xf32>
    %9 = arith.truncf %8 : vector<16x128xf32> to vector<16x128xbf16>
    %c0_8 = arith.constant 0 : index
    %c0_9 = arith.constant 0 : index
    %c0_10 = arith.constant 0 : index
    %10 = vector.load %arg4[%c0_8, %c0_9, %c0_10] : memref<1x16x128xbf16, #tpu.memory_space<vmem>>, vector<1x16x128xbf16>
    %11 = vector.shape_cast %10 : vector<1x16x128xbf16> to vector<16x128xbf16>
    %12 = vector.shape_cast %9 : vector<16x128xbf16> to vector<1x16x128xbf16>
    tpu.vector_store %arg4[%c0_8, %c0_9, %c0_10], %12 {strides = array<i32>} : memref<1x16x128xbf16, #tpu.memory_space<vmem>>, vector<1x16x128xbf16>,
    return
  }
  func.func @transform_0(%arg0: i32) -> (i32, i32, i32) {
    %c0_i32 = arith.constant 0 : i32
    %c0_i32_0 = arith.constant 0 : i32
    %c0_i32_1 = arith.constant 0 : i32
    return %arg0, %c0_i32, %c0_i32_0 : i32, i32, i32
  }
  func.func @transform_1(%arg0: i32) -> (i32, i32) {
    %c0_i32 = arith.constant 0 : i32
    %c0_i32_0 = arith.constant 0 : i32
    %c0_i32_1 = arith.constant 0 : i32
    return %c0_i32, %c0_i32_0 : i32, i32
  }
  func.func @transform_2(%arg0: i32) -> (i32, i32) {
    %c0_i32 = arith.constant 0 : i32
    %c0_i32_0 = arith.constant 0 : i32
    %c0_i32_1 = arith.constant 0 : i32
    return %c0_i32, %c0_i32_0 : i32, i32
  }
  func.func @transform_3(%arg0: i32) -> (i32, i32, i32) {
    %c0_i32 = arith.constant 0 : i32
    %c0_i32_0 = arith.constant 0 : i32
    %c0_i32_1 = arith.constant 0 : i32
    return %arg0, %c0_i32, %c0_i32_0 : i32, i32, i32
  }
}

module attributes {stable_mosaic.version = 11 : i64} {
  func.func @_head_kernel(%arg0: i32, %arg1: memref<2x16x128xbf16, #tpu.memory_space<vmem>>, %arg2: memref<128x128xbf16, #tpu.memory_space<vmem>>, %arg3: memref<1x128xf32, #tpu.memory_space<vmem>>, %arg4: memref<2x128xf32, #tpu.memory_space<vmem>>) attributes {dimension_semantics = [#tpu.dimension_semantics<arbitrary>], iteration_bounds = array<i64: 1>, scalar_prefetch = 0 : i64, scratch_operands = 0 : i64, tpu.core_type = #tpu.core_type<tc>, window_params = [{pipeline_mode = #tpu.pipeline_mode<synchronous>, transform_indices = @transform_0, window_bounds = array<i64: 2, 16, 128>}, {pipeline_mode = #tpu.pipeline_mode<synchronous>, transform_indices = @transform_1, window_bounds = array<i64: 128, 128>}, {pipeline_mode = #tpu.pipeline_mode<synchronous>, transform_indices = @transform_2, window_bounds = array<i64: 1, 128>}, {pipeline_mode = #tpu.pipeline_mode<synchronous>, transform_indices = @transform_3, window_bounds = array<i64: 2, 128>}]} {
    %c0 = arith.constant 0 : index
    %c0_0 = arith.constant 0 : index
    %c0_1 = arith.constant 0 : index
    %0 = vector.load %arg1[%c0, %c0_0, %c0_1] : memref<2x16x128xbf16, #tpu.memory_space<vmem>>, vector<2x16x128xbf16>
    %cst = arith.constant 0.000000e+00 : bf16
    %1 = vector.broadcast %cst : bf16 to vector<2x16x128xbf16>
    %2 = arith.maximumf %0, %1 : vector<2x16x128xbf16>
    %3 = arith.extf %2 : vector<2x16x128xbf16> to vector<2x16x128xf32>
    %cst_2 = arith.constant dense<0.000000e+00> : vector<2x128xf32>
    %4 = vector.multi_reduction <add>, %3, %cst_2 [1] : vector<2x16x128xf32> to vector<2x128xf32>
    %cst_3 = arith.constant 6.250000e-02 : f32
    %5 = vector.broadcast %cst_3 : f32 to vector<2x128xf32>
    %6 = arith.mulf %4, %5 : vector<2x128xf32>
    %7 = arith.truncf %6 : vector<2x128xf32> to vector<2x128xbf16>
    %c0_4 = arith.constant 0 : index
    %c0_5 = arith.constant 0 : index
    %8 = vector.load %arg2[%c0_4, %c0_5] : memref<128x128xbf16, #tpu.memory_space<vmem>>, vector<128x128xbf16>
    %cst_6 = arith.constant dense<0.000000e+00> : vector<2x128xf32>
    %9 = tpu.matmul %7, %8, %cst_6 {dimension_numbers = #tpu.dot_dimension_numbers<[1], [0], [0], [1], [0, 0, 1, 1], [], []>} : vector<2x128xbf16>, vector<128x128xbf16>, vector<2x128xf32> -> vector<2x128xf32>
    %c0_7 = arith.constant 0 : index
    %c0_8 = arith.constant 0 : index
    %10 = vector.load %arg3[%c0_7, %c0_8] : memref<1x128xf32, #tpu.memory_space<vmem>>, vector<1x128xf32>
    %11 = vector.broadcast %10 : vector<1x128xf32> to vector<2x128xf32>
    %12 = arith.addf %9, %11 : vector<2x128xf32>
    %cst_9 = arith.constant 0.000000e+00 : f32
    %13 = vector.broadcast %cst_9 : f32 to vector<2x128xf32>
    %14 = arith.subf %13, %12 : vector<2x128xf32>
    %15 = math.exp %14 : vector<2x128xf32>
    %cst_10 = arith.constant 1.000000e+00 : f32
    %16 = vector.broadcast %cst_10 : f32 to vector<2x128xf32>
    %17 = arith.addf %16, %15 : vector<2x128xf32>
    %cst_11 = arith.constant 1.000000e+00 : f32
    %18 = vector.broadcast %cst_11 : f32 to vector<2x128xf32>
    %19 = arith.divf %18, %17 : vector<2x128xf32>
    %c0_12 = arith.constant 0 : index
    %c0_13 = arith.constant 0 : index
    %20 = vector.load %arg4[%c0_12, %c0_13] : memref<2x128xf32, #tpu.memory_space<vmem>>, vector<2x128xf32>
    tpu.vector_store %arg4[%c0_12, %c0_13], %19 {strides = array<i32>} : memref<2x128xf32, #tpu.memory_space<vmem>>, vector<2x128xf32>,
    return
  }
  func.func @transform_0(%arg0: i32) -> (i32, i32, i32) {
    %c0_i32 = arith.constant 0 : i32
    %c0_i32_0 = arith.constant 0 : i32
    %c0_i32_1 = arith.constant 0 : i32
    %c0_i32_2 = arith.constant 0 : i32
    return %c0_i32, %c0_i32_0, %c0_i32_1 : i32, i32, i32
  }
  func.func @transform_1(%arg0: i32) -> (i32, i32) {
    %c0_i32 = arith.constant 0 : i32
    %c0_i32_0 = arith.constant 0 : i32
    %c0_i32_1 = arith.constant 0 : i32
    return %c0_i32, %c0_i32_0 : i32, i32
  }
  func.func @transform_2(%arg0: i32) -> (i32, i32) {
    %c0_i32 = arith.constant 0 : i32
    %c0_i32_0 = arith.constant 0 : i32
    %c0_i32_1 = arith.constant 0 : i32
    return %c0_i32, %c0_i32_0 : i32, i32
  }
  func.func @transform_3(%arg0: i32) -> (i32, i32) {
    %c0_i32 = arith.constant 0 : i32
    %c0_i32_0 = arith.constant 0 : i32
    %c0_i32_1 = arith.constant 0 : i32
    return %c0_i32, %c0_i32_0 : i32, i32
  }
}

module attributes {stable_mosaic.version = 11 : i64} {
  func.func @kernel(%arg0: i32, %arg1: memref<1x16x128xbf16, #tpu.memory_space<vmem>>, %arg2: memref<128x128xbf16, #tpu.memory_space<vmem>>, %arg3: memref<9x128x128xbf16, #tpu.memory_space<vmem>>, %arg4: memref<1x16x128xbf16, #tpu.memory_space<vmem>>, %arg5: memref<48x128xbf16, #tpu.memory_space<vmem>>) attributes {dimension_semantics = [#tpu.dimension_semantics<parallel>], iteration_bounds = array<i64: 2>, scalar_prefetch = 0 : i64, scratch_operands = 1 : i64, tpu.core_type = #tpu.core_type<tc>, window_params = [{transform_indices = @transform_0, window_bounds = array<i64: 1, 16, 128>}, {pipeline_mode = #tpu.pipeline_mode<synchronous>, transform_indices = @transform_1, window_bounds = array<i64: 128, 128>}, {pipeline_mode = #tpu.pipeline_mode<synchronous>, transform_indices = @transform_2, window_bounds = array<i64: 9, 128, 128>}, {transform_indices = @transform_3, window_bounds = array<i64: 1, 16, 128>}]} {
    %c0 = arith.constant 0 : index
    %c0_0 = arith.constant 0 : index
    %c0_1 = arith.constant 0 : index
    %0 = vector.load %arg1[%c0, %c0_0, %c0_1] : memref<1x16x128xbf16, #tpu.memory_space<vmem>>, vector<1x16x128xbf16>
    %1 = vector.shape_cast %0 : vector<1x16x128xbf16> to vector<16x128xbf16>
    %cst = arith.constant 0.000000e+00 : bf16
    %2 = vector.broadcast %cst : bf16 to vector<16x128xbf16>
    %3 = arith.maximumf %1, %2 : vector<16x128xbf16>
    %c0_2 = arith.constant 0 : index
    %c0_3 = arith.constant 0 : index
    %4 = vector.load %arg2[%c0_2, %c0_3] : memref<128x128xbf16, #tpu.memory_space<vmem>>, vector<128x128xbf16>
    %cst_4 = arith.constant dense<0.000000e+00> : vector<16x128xf32>
    %5 = tpu.matmul %3, %4, %cst_4 {dimension_numbers = #tpu.dot_dimension_numbers<[1], [0], [0], [1], [0, 0, 1, 1], [], []>} : vector<16x128xbf16>, vector<128x128xbf16>, vector<16x128xf32> -> vector<16x128xf32>
    %cst_5 = arith.constant 0.000000e+00 : f32
    %6 = vector.broadcast %cst_5 : f32 to vector<16x128xf32>
    %7 = arith.maximumf %5, %6 : vector<16x128xf32>
    %cst_6 = arith.constant 0.000000e+00 : bf16
    %8 = vector.broadcast %cst_6 : bf16 to vector<16x128xbf16>
    %c0_7 = arith.constant 0 : index
    %c0_8 = arith.constant 0 : index
    %9 = vector.load %arg5[%c0_7, %c0_8] : memref<48x128xbf16, #tpu.memory_space<vmem>>, vector<16x128xbf16>
    tpu.vector_store %arg5[%c0_7, %c0_8], %8 {strides = array<i32>} : memref<48x128xbf16, #tpu.memory_space<vmem>>, vector<16x128xbf16>,
    %cst_9 = arith.constant 0.000000e+00 : bf16
    %10 = vector.broadcast %cst_9 : bf16 to vector<16x128xbf16>
    %c32 = arith.constant 32 : index
    %c0_10 = arith.constant 0 : index
    %11 = vector.load %arg5[%c32, %c0_10] : memref<48x128xbf16, #tpu.memory_space<vmem>>, vector<16x128xbf16>
    tpu.vector_store %arg5[%c32, %c0_10], %10 {strides = array<i32>} : memref<48x128xbf16, #tpu.memory_space<vmem>>, vector<16x128xbf16>,
    %12 = arith.truncf %7 : vector<16x128xf32> to vector<16x128xbf16>
    %c16 = arith.constant 16 : index
    %c0_11 = arith.constant 0 : index
    %13 = vector.load %arg5[%c16, %c0_11] : memref<48x128xbf16, #tpu.memory_space<vmem>>, vector<16x128xbf16>
    tpu.vector_store %arg5[%c16, %c0_11], %12 {strides = array<i32>} : memref<48x128xbf16, #tpu.memory_space<vmem>>, vector<16x128xbf16>,
    %14 = tpu.iota {dimensions = array<i32: 0>} : vector<16x1xi32>
    %c4_i32 = arith.constant 4 : i32
    %c0_i32 = arith.constant 0 : i32
    %15 = arith.cmpi eq, %c4_i32, %c0_i32 : i32
    %c1_i32 = arith.constant 1 : i32
    %16 = arith.select %15, %c1_i32, %c4_i32 : i32
    %17 = vector.broadcast %16 : i32 to vector<16x1xi32>
    %18 = arith.remsi %14, %17 : vector<16x1xi32>
    %c0_i32_12 = arith.constant 0 : i32
    %19 = vector.broadcast %c0_i32_12 : i32 to vector<16x1xi32>
    %20 = arith.cmpi ne, %18, %19 : vector<16x1xi32>
    %c0_i32_13 = arith.constant 0 : i32
    %21 = vector.broadcast %c0_i32_13 : i32 to vector<16x1xi32>
    %22 = arith.cmpi slt, %18, %21 : vector<16x1xi32>
    %c0_i32_14 = arith.constant 0 : i32
    %23 = arith.cmpi slt, %16, %c0_i32_14 : i32
    %24 = vector.broadcast %23 : i1 to vector<16x1xi1>
    %25 = vector.broadcast %24 : vector<16x1xi1> to vector<16x1xi1>
    %26 = arith.xori %22, %25 : vector<16x1xi1>
    %27 = arith.andi %26, %20 : vector<16x1xi1>
    %28 = vector.broadcast %16 : i32 to vector<16x1xi32>
    %29 = arith.addi %18, %28 : vector<16x1xi32>
    %30 = arith.select %27, %29, %18 : vector<16x1xi1>, vector<16x1xi32>
    %c1_i32_15 = arith.constant 1 : i32
    %31 = vector.broadcast %c1_i32_15 : i32 to vector<16x1xi32>
    %32 = arith.cmpi sge, %30, %31 : vector<16x1xi32>
    %c2_i32 = arith.constant 2 : i32
    %33 = vector.broadcast %c2_i32 : i32 to vector<16x1xi32>
    %34 = arith.cmpi sle, %30, %33 : vector<16x1xi32>
    %cst_16 = arith.constant 0.000000e+00 : f32
    %35 = vector.broadcast %cst_16 : f32 to vector<16x128xf32>
    %c11 = arith.constant 11 : index
    %c0_17 = arith.constant 0 : index
    %36 = vector.load %arg5[%c11, %c0_17] : memref<48x128xbf16, #tpu.memory_space<vmem>>, vector<16x128xbf16>
    %cst_18 = arith.constant 0.000000e+00 : bf16
    %37 = vector.broadcast %cst_18 : bf16 to vector<16x128xbf16>
    %38 = vector.shape_cast %32 : vector<16x1xi1> to vector<16x1xi1>
    %39 = vector.broadcast %38 : vector<16x1xi1> to vector<16x128xi1>
    %40 = arith.select %39, %36, %37 : vector<16x128xi1>, vector<16x128xbf16>
    %c0_19 = arith.constant 0 : index
    %c0_20 = arith.constant 0 : index
    %c0_21 = arith.constant 0 : index
    %41 = vector.load %arg3[%c0_19, %c0_20, %c0_21] : memref<9x128x128xbf16, #tpu.memory_space<vmem>>, vector<1x128x128xbf16>
    %42 = vector.shape_cast %41 : vector<1x128x128xbf16> to vector<128x128xbf16>
    %cst_22 = arith.constant dense<0.000000e+00> : vector<16x128xf32>
    %43 = tpu.matmul %40, %42, %cst_22 {dimension_numbers = #tpu.dot_dimension_numbers<[1], [0], [0], [1], [0, 0, 1, 1], [], []>} : vector<16x128xbf16>, vector<128x128xbf16>, vector<16x128xf32> -> vector<16x128xf32>
    %44 = arith.addf %35, %43 : vector<16x128xf32>
    %c12 = arith.constant 12 : index
    %c0_23 = arith.constant 0 : index
    %45 = vector.load %arg5[%c12, %c0_23] : memref<48x128xbf16, #tpu.memory_space<vmem>>, vector<16x128xbf16>
    %c1 = arith.constant 1 : index
    %c0_24 = arith.constant 0 : index
    %c0_25 = arith.constant 0 : index
    %46 = vector.load %arg3[%c1, %c0_24, %c0_25] : memref<9x128x128xbf16, #tpu.memory_space<vmem>>, vector<1x128x128xbf16>
    %47 = vector.shape_cast %46 : vector<1x128x128xbf16> to vector<128x128xbf16>
    %cst_26 = arith.constant dense<0.000000e+00> : vector<16x128xf32>
    %48 = tpu.matmul %45, %47, %cst_26 {dimension_numbers = #tpu.dot_dimension_numbers<[1], [0], [0], [1], [0, 0, 1, 1], [], []>} : vector<16x128xbf16>, vector<128x128xbf16>, vector<16x128xf32> -> vector<16x128xf32>
    %49 = arith.addf %44, %48 : vector<16x128xf32>
    %c13 = arith.constant 13 : index
    %c0_27 = arith.constant 0 : index
    %50 = vector.load %arg5[%c13, %c0_27] : memref<48x128xbf16, #tpu.memory_space<vmem>>, vector<16x128xbf16>
    %cst_28 = arith.constant 0.000000e+00 : bf16
    %51 = vector.broadcast %cst_28 : bf16 to vector<16x128xbf16>
    %52 = vector.shape_cast %34 : vector<16x1xi1> to vector<16x1xi1>
    %53 = vector.broadcast %52 : vector<16x1xi1> to vector<16x128xi1>
    %54 = arith.select %53, %50, %51 : vector<16x128xi1>, vector<16x128xbf16>
    %c2 = arith.constant 2 : index
    %c0_29 = arith.constant 0 : index
    %c0_30 = arith.constant 0 : index
    %55 = vector.load %arg3[%c2, %c0_29, %c0_30] : memref<9x128x128xbf16, #tpu.memory_space<vmem>>, vector<1x128x128xbf16>
    %56 = vector.shape_cast %55 : vector<1x128x128xbf16> to vector<128x128xbf16>
    %cst_31 = arith.constant dense<0.000000e+00> : vector<16x128xf32>
    %57 = tpu.matmul %54, %56, %cst_31 {dimension_numbers = #tpu.dot_dimension_numbers<[1], [0], [0], [1], [0, 0, 1, 1], [], []>} : vector<16x128xbf16>, vector<128x128xbf16>, vector<16x128xf32> -> vector<16x128xf32>
    %58 = arith.addf %49, %57 : vector<16x128xf32>
    %c15 = arith.constant 15 : index
    %c0_32 = arith.constant 0 : index
    %59 = vector.load %arg5[%c15, %c0_32] : memref<48x128xbf16, #tpu.memory_space<vmem>>, vector<16x128xbf16>
    %cst_33 = arith.constant 0.000000e+00 : bf16
    %60 = vector.broadcast %cst_33 : bf16 to vector<16x128xbf16>
    %61 = vector.shape_cast %32 : vector<16x1xi1> to vector<16x1xi1>
    %62 = vector.broadcast %61 : vector<16x1xi1> to vector<16x128xi1>
    %63 = arith.select %62, %59, %60 : vector<16x128xi1>, vector<16x128xbf16>
    %c3 = arith.constant 3 : index
    %c0_34 = arith.constant 0 : index
    %c0_35 = arith.constant 0 : index
    %64 = vector.load %arg3[%c3, %c0_34, %c0_35] : memref<9x128x128xbf16, #tpu.memory_space<vmem>>, vector<1x128x128xbf16>
    %65 = vector.shape_cast %64 : vector<1x128x128xbf16> to vector<128x128xbf16>
    %cst_36 = arith.constant dense<0.000000e+00> : vector<16x128xf32>
    %66 = tpu.matmul %63, %65, %cst_36 {dimension_numbers = #tpu.dot_dimension_numbers<[1], [0], [0], [1], [0, 0, 1, 1], [], []>} : vector<16x128xbf16>, vector<128x128xbf16>, vector<16x128xf32> -> vector<16x128xf32>
    %67 = arith.addf %58, %66 : vector<16x128xf32>
    %c16_37 = arith.constant 16 : index
    %c0_38 = arith.constant 0 : index
    %68 = vector.load %arg5[%c16_37, %c0_38] : memref<48x128xbf16, #tpu.memory_space<vmem>>, vector<16x128xbf16>
    %c4 = arith.constant 4 : index
    %c0_39 = arith.constant 0 : index
    %c0_40 = arith.constant 0 : index
    %69 = vector.load %arg3[%c4, %c0_39, %c0_40] : memref<9x128x128xbf16, #tpu.memory_space<vmem>>, vector<1x128x128xbf16>
    %70 = vector.shape_cast %69 : vector<1x128x128xbf16> to vector<128x128xbf16>
    %cst_41 = arith.constant dense<0.000000e+00> : vector<16x128xf32>
    %71 = tpu.matmul %68, %70, %cst_41 {dimension_numbers = #tpu.dot_dimension_numbers<[1], [0], [0], [1], [0, 0, 1, 1], [], []>} : vector<16x128xbf16>, vector<128x128xbf16>, vector<16x128xf32> -> vector<16x128xf32>
    %72 = arith.addf %67, %71 : vector<16x128xf32>
    %c17 = arith.constant 17 : index
    %c0_42 = arith.constant 0 : index
    %73 = vector.load %arg5[%c17, %c0_42] : memref<48x128xbf16, #tpu.memory_space<vmem>>, vector<16x128xbf16>
    %cst_43 = arith.constant 0.000000e+00 : bf16
    %74 = vector.broadcast %cst_43 : bf16 to vector<16x128xbf16>
    %75 = vector.shape_cast %34 : vector<16x1xi1> to vector<16x1xi1>
    %76 = vector.broadcast %75 : vector<16x1xi1> to vector<16x128xi1>
    %77 = arith.select %76, %73, %74 : vector<16x128xi1>, vector<16x128xbf16>
    %c5 = arith.constant 5 : index
    %c0_44 = arith.constant 0 : index
    %c0_45 = arith.constant 0 : index
    %78 = vector.load %arg3[%c5, %c0_44, %c0_45] : memref<9x128x128xbf16, #tpu.memory_space<vmem>>, vector<1x128x128xbf16>
    %79 = vector.shape_cast %78 : vector<1x128x128xbf16> to vector<128x128xbf16>
    %cst_46 = arith.constant dense<0.000000e+00> : vector<16x128xf32>
    %80 = tpu.matmul %77, %79, %cst_46 {dimension_numbers = #tpu.dot_dimension_numbers<[1], [0], [0], [1], [0, 0, 1, 1], [], []>} : vector<16x128xbf16>, vector<128x128xbf16>, vector<16x128xf32> -> vector<16x128xf32>
    %81 = arith.addf %72, %80 : vector<16x128xf32>
    %c19 = arith.constant 19 : index
    %c0_47 = arith.constant 0 : index
    %82 = vector.load %arg5[%c19, %c0_47] : memref<48x128xbf16, #tpu.memory_space<vmem>>, vector<16x128xbf16>
    %cst_48 = arith.constant 0.000000e+00 : bf16
    %83 = vector.broadcast %cst_48 : bf16 to vector<16x128xbf16>
    %84 = vector.shape_cast %32 : vector<16x1xi1> to vector<16x1xi1>
    %85 = vector.broadcast %84 : vector<16x1xi1> to vector<16x128xi1>
    %86 = arith.select %85, %82, %83 : vector<16x128xi1>, vector<16x128xbf16>
    %c6 = arith.constant 6 : index
    %c0_49 = arith.constant 0 : index
    %c0_50 = arith.constant 0 : index
    %87 = vector.load %arg3[%c6, %c0_49, %c0_50] : memref<9x128x128xbf16, #tpu.memory_space<vmem>>, vector<1x128x128xbf16>
    %88 = vector.shape_cast %87 : vector<1x128x128xbf16> to vector<128x128xbf16>
    %cst_51 = arith.constant dense<0.000000e+00> : vector<16x128xf32>
    %89 = tpu.matmul %86, %88, %cst_51 {dimension_numbers = #tpu.dot_dimension_numbers<[1], [0], [0], [1], [0, 0, 1, 1], [], []>} : vector<16x128xbf16>, vector<128x128xbf16>, vector<16x128xf32> -> vector<16x128xf32>
    %90 = arith.addf %81, %89 : vector<16x128xf32>
    %c20 = arith.constant 20 : index
    %c0_52 = arith.constant 0 : index
    %91 = vector.load %arg5[%c20, %c0_52] : memref<48x128xbf16, #tpu.memory_space<vmem>>, vector<16x128xbf16>
    %c7 = arith.constant 7 : index
    %c0_53 = arith.constant 0 : index
    %c0_54 = arith.constant 0 : index
    %92 = vector.load %arg3[%c7, %c0_53, %c0_54] : memref<9x128x128xbf16, #tpu.memory_space<vmem>>, vector<1x128x128xbf16>
    %93 = vector.shape_cast %92 : vector<1x128x128xbf16> to vector<128x128xbf16>
    %cst_55 = arith.constant dense<0.000000e+00> : vector<16x128xf32>
    %94 = tpu.matmul %91, %93, %cst_55 {dimension_numbers = #tpu.dot_dimension_numbers<[1], [0], [0], [1], [0, 0, 1, 1], [], []>} : vector<16x128xbf16>, vector<128x128xbf16>, vector<16x128xf32> -> vector<16x128xf32>
    %95 = arith.addf %90, %94 : vector<16x128xf32>
    %c21 = arith.constant 21 : index
    %c0_56 = arith.constant 0 : index
    %96 = vector.load %arg5[%c21, %c0_56] : memref<48x128xbf16, #tpu.memory_space<vmem>>, vector<16x128xbf16>
    %cst_57 = arith.constant 0.000000e+00 : bf16
    %97 = vector.broadcast %cst_57 : bf16 to vector<16x128xbf16>
    %98 = vector.shape_cast %34 : vector<16x1xi1> to vector<16x1xi1>
    %99 = vector.broadcast %98 : vector<16x1xi1> to vector<16x128xi1>
    %100 = arith.select %99, %96, %97 : vector<16x128xi1>, vector<16x128xbf16>
    %c8 = arith.constant 8 : index
    %c0_58 = arith.constant 0 : index
    %c0_59 = arith.constant 0 : index
    %101 = vector.load %arg3[%c8, %c0_58, %c0_59] : memref<9x128x128xbf16, #tpu.memory_space<vmem>>, vector<1x128x128xbf16>
    %102 = vector.shape_cast %101 : vector<1x128x128xbf16> to vector<128x128xbf16>
    %cst_60 = arith.constant dense<0.000000e+00> : vector<16x128xf32>
    %103 = tpu.matmul %100, %102, %cst_60 {dimension_numbers = #tpu.dot_dimension_numbers<[1], [0], [0], [1], [0, 0, 1, 1], [], []>} : vector<16x128xbf16>, vector<128x128xbf16>, vector<16x128xf32> -> vector<16x128xf32>
    %104 = arith.addf %95, %103 : vector<16x128xf32>
    %105 = arith.truncf %104 : vector<16x128xf32> to vector<16x128xbf16>
    %106 = arith.addf %1, %105 : vector<16x128xbf16>
    %c0_61 = arith.constant 0 : index
    %c0_62 = arith.constant 0 : index
    %c0_63 = arith.constant 0 : index
    %107 = vector.load %arg4[%c0_61, %c0_62, %c0_63] : memref<1x16x128xbf16, #tpu.memory_space<vmem>>, vector<1x16x128xbf16>
    %108 = vector.shape_cast %107 : vector<1x16x128xbf16> to vector<16x128xbf16>
    %109 = vector.shape_cast %106 : vector<16x128xbf16> to vector<1x16x128xbf16>
    tpu.vector_store %arg4[%c0_61, %c0_62, %c0_63], %109 {strides = array<i32>} : memref<1x16x128xbf16, #tpu.memory_space<vmem>>, vector<1x16x128xbf16>,
    return
  }
  func.func @transform_0(%arg0: i32) -> (i32, i32, i32) {
    %c0_i32 = arith.constant 0 : i32
    %c0_i32_0 = arith.constant 0 : i32
    %c0_i32_1 = arith.constant 0 : i32
    return %arg0, %c0_i32, %c0_i32_0 : i32, i32, i32
  }
  func.func @transform_1(%arg0: i32) -> (i32, i32) {
    %c0_i32 = arith.constant 0 : i32
    %c0_i32_0 = arith.constant 0 : i32
    %c0_i32_1 = arith.constant 0 : i32
    return %c0_i32, %c0_i32_0 : i32, i32
  }
  func.func @transform_2(%arg0: i32) -> (i32, i32, i32) {
    %c0_i32 = arith.constant 0 : i32
    %c0_i32_0 = arith.constant 0 : i32
    %c0_i32_1 = arith.constant 0 : i32
    %c0_i32_2 = arith.constant 0 : i32
    return %c0_i32, %c0_i32_0, %c0_i32_1 : i32, i32, i32
  }
  func.func @transform_3(%arg0: i32) -> (i32, i32, i32) {
    %c0_i32 = arith.constant 0 : i32
    %c0_i32_0 = arith.constant 0 : i32
    %c0_i32_1 = arith.constant 0 : i32
    return %arg0, %c0_i32, %c0_i32_0 : i32, i32, i32
  }
}

</mosaic_0001>

<bundles_post_ra>
// kernel: _lambda_.10
= control target key start
LH: loop header
LB: loop body
LE: loop exit
PB: predicated region body
PF: predicated region fallthrough
CT: control target
= control target key end

     0   :  { %s516_s12 = smov 0   ;;  %s570_s0 = inlined_call_operand.vmem [shape: bf16[2,64,128], index: 0, kind: input, shape index: {}]   ;;  %s571_s1 = inlined_call_operand.vmem [shape: bf16[128,128], index: 1, kind: input, shape index: {}]   ;;  %s572_s2 = inlined_call_operand.vmem [shape: bf16[16,64], index: 2, kind: input, shape index: {}]   ;;  %s573_s3 = inlined_call_operand.vmem [shape: bf16[2,16,128], index: 3, kind: output, shape index: {}]  }
   0x1 LB: > { %s381_s13 = sadd.s32 4294967295, %s494_s12   ;;  %p385_p0 = scmp.ge.s32.totalorder %s494_s12, 1  ;;  %s494_s12 = sphi %s516_s12, %s13_s12  }
   0x2   : > { %p137_p1 = scmp.lt.s32.totalorder %s494_s12, 3 }
   0x4   : > { %p138_p2 = pnand %p385_p0, %p137_p1 }
   0x5   : > { %p161_p3 = scmp.lt.s32.totalorder (!%p138_p2), %s381_s13, 1 }
   0x6   : > { %141 = sbr.rel (%p138_p2) target bundleno = 353 (0x161), region = 32 }
   0xb   : > { %v438_v0 = vld [vmem:[%s571_s1 + $0x38] sm:$0xff]  ;;  %v437_v1 = vld [vmem:[%s571_s1 + $0x30] sm:$0xff]  ;;  %v436_v2 = vld [vmem:[%s571_s1 + $0x28] sm:$0xff]  ;;  %s575_s13 = smov (!%p161_p3, %s381_s13), 1  ;;  %vm304_vm0 = vcmask 523264  }
   0xc   : > { %465 = vmatpush.bf16.msra.mxu3 %v438_v0  ;;  %464 = vmatpush.bf16.msra.mxu2 %v438_v0  ;;  %v435_v3 = vld [vmem:[%s571_s1 + $0x20] sm:$0xff]  ;;  %s429_s22 = sshll.u32 %s575_s13, 5  ;;  %v434_v4 = vld [vmem:[%s571_s1 + $0x18] sm:$0xff]  ;;  %v433_v5 = vld [vmem:[%s571_s1 + $0x10] sm:$0xff]  ;;  %s430_s9 = sshll.u32 %s575_s13, 3 }
   0xd   : > { %264 = vmatpush.bf16.msra.mxu0 %v438_v0  ;;  %s545_s27 = scalar_lea.vmem %s570_s0, %s429_s22  ;;  %v432_v13 = vld [vmem:[%s571_s1 + $0x8] sm:$0xff]  ;;  %v431_v20 = vld [vmem:[%s571_s1] sm:$0xff]  ;;  %s170_s14 = scalar_lea.vmem %s573_s3, %s430_s9 }
   0xe   : > { %v462_v6 = vld [vmem:[%s545_s27 + $0x10] sm:$0xff]   ;;  %v461_v7 = vld [vmem:[%s545_s27 + $0x8] sm:$0xff]   ;;  %v441_v8 = vld [vmem:[%s545_s27] sm:$0xff]  }
   0xf   : > { %v450_v9 = vunpack.c.l.bf16 %v462_v6  ;;  %v451_v10 = vunpack.c.h.bf16 %v462_v6  ;;  %v446_v11 = vunpack.c.l.bf16 %v461_v7  ;;  %v447_v12 = vunpack.c.h.bf16 %v461_v7  ;;  %v463_v26 = vld [vmem:[%s545_s27 + $0x18] sm:$0xff]   ;;  %v439_v44 = vld [vmem:[%s572_s2] sm:$0xff] }
  0x10   : > { %467 = vmatpush.bf16.msra.mxu3 %v437_v1  ;;  %466 = vmatpush.bf16.msra.mxu2 %v437_v1  ;;  %v442_v14 = vunpack.c.l.bf16 %v441_v8  ;;  %v443_v15 = vunpack.c.h.bf16 %v441_v8  ;;  %v454_v27 = vunpack.c.l.bf16 %v463_v26  ;;  %v455_v28 = vunpack.c.h.bf16 %v463_v26 }
  0x11   : > { %265 = vmatpush.bf16.msra.mxu0 %v437_v1  ;;  %v192_v16 = vmax.f32 %v450_v9, 0.0  ;;  %v193_v17 = vmax.f32 %v451_v10, 0.0  ;;  %v190_v18 = vmax.f32 %v446_v11, 0.0  ;;  %v191_v19 = vmax.f32 %v447_v12, 0.0 }
  0x12   : > { %v188_v21 = vmax.f32 %v442_v14, 0.0  ;;  %v189_v22 = vmax.f32 %v443_v15, 0.0  ;;  %v194_v29 = vmax.f32 %v454_v27, 0.0  ;;  %v195_v30 = vmax.f32 %v455_v28, 0.0 }
  0x13   : > { %v198_v23 = vpack.c.bf16 %v193_v17, %v192_v16  ;;  %v197_v24 = vpack.c.bf16 %v191_v19, %v190_v18 }
  0x14   : > { %469 = vmatpush.bf16.msra.mxu3 %v436_v2  ;;  %468 = vmatpush.bf16.msra.mxu2 %v436_v2  ;;  %v196_v25 = vpack.c.bf16 %v189_v22, %v188_v21  ;;  %v199_v31 = vpack.c.bf16 %v195_v30, %v194_v29 }
  0x15   : > { %266 = vmatpush.bf16.msra.mxu0 %v436_v2 }
  0x18   : > { %471 = vmatpush.bf16.msra.mxu3 %v435_v3  ;;  %470 = vmatpush.bf16.msra.mxu2 %v435_v3 }
  0x19   : > { %267 = vmatpush.bf16.msra.mxu0 %v435_v3 }
  0x1c   : > { %473 = vmatpush.bf16.msra.mxu3 %v434_v4  ;;  %472 = vmatpush.bf16.msra.mxu2 %v434_v4 }
  0x1d   : > { %268 = vmatpush.bf16.msra.mxu0 %v434_v4 }
  0x20   : > { %475 = vmatpush.bf16.msra.mxu3 %v433_v5  ;;  %474 = vmatpush.bf16.msra.mxu2 %v433_v5 }
  0x21   : > { %269 = vmatpush.bf16.msra.mxu0 %v433_v5 }
  0x24   : > { %477 = vmatpush.bf16.msra.mxu3 %v432_v13  ;;  %476 = vmatpush.bf16.msra.mxu2 %v432_v13 }
  0x25   : > { %270 = vmatpush.bf16.msra.mxu0 %v432_v13 }
  0x28   : > { %479 = vmatpush.bf16.msra.mxu3 %v431_v20  ;;  %478 = vmatpush.bf16.msra.mxu2 %v431_v20 }
  0x29   : > { %271 = vmatpush.bf16.msra.mxu0 %v431_v20 }
  0x2b   : > { %282 = vmatmul.bf16.vlgmr.msra.gmra.mxu3 %v198_v23  ;;  %277 = vmatmul.bf16.vlgmr.msra.gmra.mxu2 %v197_v24 }
  0x2c   : > { %272 = vmatmul.bf16.vlgmr.msra.gmra.mxu0 %v196_v25 }
  0x3b   : > { %287 = vmatmul.bf16.gmra.mxu3 %v199_v31 }
  0xa9   : > { %v273_v36 = vpop.f32.mrf.mxu0 }
  0xae   : > { %v283_v32 = vpop.f32.mrf.mxu3  ;;  %v278_v35 = vpop.f32.mrf.mxu2 }
  0xb1   : > { %v275_v42 = vpop.f32.mrf.mxu0 }
  0xb2   : > { %v295_v43 = vpack.c.bf16 %v275_v42, %v273_v36 }
  0xb6   : > { %v285_v33 = vpop.f32.mrf.mxu3  ;;  %v280_v40 = vpop.f32.mrf.mxu2 }
  0xb7   : > { %v297_v39 = vpack.c.bf16 %v285_v33, %v283_v32  ;;  %v296_v41 = vpack.c.bf16 %v280_v40, %v278_v35 }
  0xbe   : > { %v288_v34 = vpop.f32.mrf.mxu3 }
  0xc6   : > { %v290_v37 = vpop.f32.mrf.mxu3 }
  0xc7   : > { %v298_v38 = vpack.c.bf16 %v290_v37, %v288_v34 }
  0xc9   : > { %312 = vmatpush.bf16.msra.mxu1 %v298_v38 }
  0xcd   : > { %313 = vmatpush.bf16.msra.mxu1 %v297_v39 }
  0xd1   : > { %314 = vmatpush.bf16.msra.mxu1 %v296_v41 }
  0xd5   : > { %315 = vmatpush.bf16.msra.mxu1 %v295_v43 }
  0xd8   : > { %426 = vmatmul.msk.bf16.vlgmr.msra.gmra.mxu1 %vm304_vm0, %v439_v44 }
 0x155   : > { %v317_v45 = vpop.f32.mrf.mxu1 }
 0x15d   : > { %v319_v46 = vpop.f32.mrf.mxu1 }
 0x15e   : > { %v459_v47 = vpack.c.bf16 %v319_v46, %v317_v45 }
 0x160   : > { %460 = vst [vmem:[%s170_s14] sm:$0xff] %v459_v47  }
 0x161 PF: > { %s13_s12 = sadd.s32 1, %s494_s12  }
 0x162   : > { %p10_p4 = scmp.ge.s32.totalorder %s13_s12, 4  }
 0x164   :  { %12 = sbr.rel (!%p10_p4) target bundleno = 1 (0x1), region = 62 }

// kernel: _lambda_.7
= control target key start
LH: loop header
LB: loop body
LE: loop exit
PB: predicated region body
PF: predicated region fallthrough
CT: control target
= control target key end

     0   :  { %s866_s12 = smov 0   ;;  %s987_s0 = inlined_call_operand.vmem [shape: bf16[512,128], index: 0, kind: input, shape index: {}]   ;;  %s988_s1 = inlined_call_operand.vmem [shape: bf16[128,128], index: 1, kind: input, shape index: {}]   ;;  %s989_s2 = inlined_call_operand.vmem [shape: f32[1,128], index: 2, kind: input, shape index: {}]   ;;  %s990_s3 = inlined_call_operand.vmem [shape: bf16[512,128], index: 3, kind: output, shape index: {}]  }
   0x1 LB: > { %s579_s13 = sadd.s32 4294967295, %s844_s12   ;;  %p583_p0 = scmp.ge.s32.totalorder %s844_s12, 1  ;;  %s844_s12 = sphi %s866_s12, %s13_s12  }
   0x2   : > { %p138_p1 = scmp.lt.s32.totalorder %s844_s12, 3 }
   0x4   : > { %p139_p2 = pnand %p583_p0, %p138_p1 }
   0x5   : > { %s584_s22 = sshll.u32 (!%p139_p2), %s579_s13, 5 }
   0x6   : > { %142 = sbr.rel (%p139_p2) target bundleno = 238 (0xee), region = 32  ;;  %p163_p3 = scmp.lt.s32.totalorder (!%p139_p2), %s584_s22, 63 }
   0xb   : > { %v709_v0 = vld [vmem:[%s988_s1 + $0x38] sm:$0xff]  ;;  %v708_v1 = vld [vmem:[%s988_s1 + $0x30] sm:$0xff]  ;;  %v707_v2 = vld [vmem:[%s988_s1 + $0x28] sm:$0xff]  ;;  %s992_s22 = smov (!%p163_p3, %s584_s22), 63 }
   0xc   : > { %370 = vmatpush.bf16.msra.mxu0 %v709_v0  ;;  %805 = vmatpush.bf16.msra.mxu1 %v709_v0  ;;  %v706_v3 = vld [vmem:[%s988_s1 + $0x20] sm:$0xff]  ;;  %v705_v4 = vld [vmem:[%s988_s1 + $0x18] sm:$0xff]  ;;  %v704_v5 = vld [vmem:[%s988_s1 + $0x10] sm:$0xff]  ;;  %s585_s29 = sshll.u32 %s992_s22, 2 }
   0xd   : > { %806 = vmatpush.bf16.msra.mxu2 %v709_v0  ;;  %807 = vmatpush.bf16.msra.mxu3 %v709_v0  ;;  %v703_v6 = vld [vmem:[%s988_s1 + $0x8] sm:$0xff]  ;;  %v702_v7 = vld [vmem:[%s988_s1] sm:$0xff]  ;;  %s906_s7 = scalar_lea.vmem %s987_s0, %s585_s29  ;;  %s938_s13 = scalar_lea.vmem %s990_s3, %s585_s29 }
   0xe   : > { %v686_v8 = vld [vmem:[%s906_s7] sm:$0xff]  ;;  %v687_v12 = vld [vmem:[%s906_s7 + $0x8] sm:$0xff]  ;;  %v688_v16 = vld [vmem:[%s906_s7 + $0x10] sm:$0xff] }
   0xf   : > { %v690_v9 = vld [vmem:[%s906_s7 + $0x20] sm:$0xff]  ;;  %v691_v13 = vld [vmem:[%s906_s7 + $0x28] sm:$0xff]  ;;  %v692_v17 = vld [vmem:[%s906_s7 + $0x30] sm:$0xff] }
  0x10   : > { %371 = vmatpush.bf16.msra.mxu0 %v708_v1  ;;  %808 = vmatpush.bf16.msra.mxu1 %v708_v1  ;;  %v694_v10 = vld [vmem:[%s906_s7 + $0x40] sm:$0xff]  ;;  %v695_v14 = vld [vmem:[%s906_s7 + $0x48] sm:$0xff]  ;;  %v696_v18 = vld [vmem:[%s906_s7 + $0x50] sm:$0xff] }
  0x11   : > { %809 = vmatpush.bf16.msra.mxu2 %v708_v1  ;;  %810 = vmatpush.bf16.msra.mxu3 %v708_v1  ;;  %v698_v11 = vld [vmem:[%s906_s7 + $0x60] sm:$0xff]  ;;  %v699_v15 = vld [vmem:[%s906_s7 + $0x68] sm:$0xff]  ;;  %v700_v19 = vld [vmem:[%s906_s7 + $0x70] sm:$0xff] }
  0x12   : > { %v689_v20 = vld [vmem:[%s906_s7 + $0x18] sm:$0xff]  ;;  %v927_v26 = vld [vmem:[%s989_s2] ss:$0 sm:$0xff] }
  0x13   : > { %v693_v21 = vld [vmem:[%s906_s7 + $0x38] sm:$0xff] }
  0x14   : > { %372 = vmatpush.bf16.msra.mxu0 %v707_v2  ;;  %811 = vmatpush.bf16.msra.mxu1 %v707_v2  ;;  %v697_v22 = vld [vmem:[%s906_s7 + $0x58] sm:$0xff] }
  0x15   : > { %812 = vmatpush.bf16.msra.mxu2 %v707_v2  ;;  %813 = vmatpush.bf16.msra.mxu3 %v707_v2  ;;  %v701_v23 = vld [vmem:[%s906_s7 + $0x78] sm:$0xff] }
  0x18   : > { %373 = vmatpush.bf16.msra.mxu0 %v706_v3  ;;  %814 = vmatpush.bf16.msra.mxu1 %v706_v3 }
  0x19   : > { %815 = vmatpush.bf16.msra.mxu2 %v706_v3  ;;  %816 = vmatpush.bf16.msra.mxu3 %v706_v3 }
  0x1c   : > { %374 = vmatpush.bf16.msra.mxu0 %v705_v4  ;;  %817 = vmatpush.bf16.msra.mxu1 %v705_v4 }
  0x1d   : > { %818 = vmatpush.bf16.msra.mxu2 %v705_v4  ;;  %819 = vmatpush.bf16.msra.mxu3 %v705_v4 }
  0x20   : > { %375 = vmatpush.bf16.msra.mxu0 %v704_v5  ;;  %820 = vmatpush.bf16.msra.mxu1 %v704_v5 }
  0x21   : > { %821 = vmatpush.bf16.msra.mxu2 %v704_v5  ;;  %822 = vmatpush.bf16.msra.mxu3 %v704_v5 }
  0x24   : > { %376 = vmatpush.bf16.msra.mxu0 %v703_v6  ;;  %823 = vmatpush.bf16.msra.mxu1 %v703_v6 }
  0x25   : > { %824 = vmatpush.bf16.msra.mxu2 %v703_v6  ;;  %825 = vmatpush.bf16.msra.mxu3 %v703_v6 }
  0x28   : > { %377 = vmatpush.bf16.msra.mxu0 %v702_v7  ;;  %826 = vmatpush.bf16.msra.mxu1 %v702_v7 }
  0x29   : > { %827 = vmatpush.bf16.msra.mxu2 %v702_v7  ;;  %828 = vmatpush.bf16.msra.mxu3 %v702_v7 }
  0x2b   : > { %378 = vmatmul.bf16.vlgmr.msra.gmra.mxu0 %v686_v8  ;;  %398 = vmatmul.bf16.vlgmr.msra.gmra.mxu1 %v690_v9 }
  0x2c   : > { %418 = vmatmul.bf16.vlgmr.msra.gmra.mxu2 %v694_v10  ;;  %438 = vmatmul.bf16.vlgmr.msra.gmra.mxu3 %v698_v11 }
  0x3b   : > { %383 = vmatmul.bf16.gmra.mxu0 %v687_v12  ;;  %403 = vmatmul.bf16.gmra.mxu1 %v691_v13 }
  0x3c   : > { %423 = vmatmul.bf16.gmra.mxu2 %v695_v14  ;;  %443 = vmatmul.bf16.gmra.mxu3 %v699_v15 }
  0x4b   : > { %388 = vmatmul.bf16.gmra.mxu0 %v688_v16  ;;  %408 = vmatmul.bf16.gmra.mxu1 %v692_v17 }
  0x4c   : > { %428 = vmatmul.bf16.gmra.mxu2 %v696_v18  ;;  %448 = vmatmul.bf16.gmra.mxu3 %v700_v19 }
  0x5b   : > { %393 = vmatmul.bf16.gmra.mxu0 %v689_v20  ;;  %413 = vmatmul.bf16.gmra.mxu1 %v693_v21 }
  0x5c   : > { %433 = vmatmul.bf16.gmra.mxu2 %v697_v22  ;;  %453 = vmatmul.bf16.gmra.mxu3 %v701_v23 }
  0xa8   : > { %v379_v24 = vpop.f32.mrf.mxu0  ;;  %v399_v25 = vpop.f32.mrf.mxu1 }
  0xa9   : > { %v380_v31 = vadd.f32 %v927_v26, %v379_v24  ;;  %v400_v32 = vadd.f32 %v927_v26, %v399_v25 }
  0xaf   : > { %v419_v27 = vpop.f32.mrf.mxu2  ;;  %v439_v28 = vpop.f32.mrf.mxu3 }
  0xb0   : > { %v381_v29 = vpop.f32.mrf.mxu0  ;;  %v401_v30 = vpop.f32.mrf.mxu1  ;;  %v420_v39 = vadd.f32 %v927_v26, %v419_v27  ;;  %v440_v40 = vadd.f32 %v927_v26, %v439_v28 }
  0xb1   : > { %v382_v33 = vadd.f32 %v927_v26, %v381_v29  ;;  %v402_v34 = vadd.f32 %v927_v26, %v401_v30 }
  0xb3   : > { %v713_v35 = vpack.c.bf16 %v382_v33, %v380_v31  ;;  %v733_v36 = vpack.c.bf16 %v402_v34, %v400_v32 }
  0xb5   : > { %714 = vst [vmem:[%s938_s13] sm:$0xff] %v713_v35  }
  0xb6   : > { %793 = vst [vmem:[%s938_s13 + $0x20] sm:$0xff] %v733_v36  }
  0xb7   : > { %v421_v37 = vpop.f32.mrf.mxu2  ;;  %v441_v38 = vpop.f32.mrf.mxu3 }
  0xb8   : > { %v422_v41 = vadd.f32 %v927_v26, %v421_v37  ;;  %v442_v42 = vadd.f32 %v927_v26, %v441_v38  ;;  %v384_v43 = vpop.f32.mrf.mxu0  ;;  %v404_v44 = vpop.f32.mrf.mxu1 }
  0xb9   : > { %v385_v51 = vadd.f32 %v927_v26, %v384_v43  ;;  %v405_v52 = vadd.f32 %v927_v26, %v404_v44 }
  0xba   : > { %v753_v45 = vpack.c.bf16 %v422_v41, %v420_v39  ;;  %v773_v46 = vpack.c.bf16 %v442_v42, %v440_v40 }
  0xbc   : > { %797 = vst [vmem:[%s938_s13 + $0x40] sm:$0xff] %v753_v45  }
  0xbd   : > { %801 = vst [vmem:[%s938_s13 + $0x60] sm:$0xff] %v773_v46  }
  0xbf   : > { %v424_v47 = vpop.f32.mrf.mxu2  ;;  %v444_v48 = vpop.f32.mrf.mxu3 }
  0xc0   : > { %v386_v49 = vpop.f32.mrf.mxu0  ;;  %v406_v50 = vpop.f32.mrf.mxu1  ;;  %v425_v59 = vadd.f32 %v927_v26, %v424_v47  ;;  %v445_v60 = vadd.f32 %v927_v26, %v444_v48 }
  0xc1   : > { %v387_v53 = vadd.f32 %v927_v26, %v386_v49  ;;  %v407_v54 = vadd.f32 %v927_v26, %v406_v50 }
  0xc3   : > { %v718_v55 = vpack.c.bf16 %v387_v53, %v385_v51  ;;  %v738_v56 = vpack.c.bf16 %v407_v54, %v405_v52 }
  0xc5   : > { %790 = vst [vmem:[%s938_s13 + $0x8] sm:$0xff] %v718_v55  }
  0xc6   : > { %794 = vst [vmem:[%s938_s13 + $0x28] sm:$0xff] %v738_v56  }
  0xc7   : > { %v426_v57 = vpop.f32.mrf.mxu2  ;;  %v446_v58 = vpop.f32.mrf.mxu3 }
  0xc8   : > { %v427_v61 = vadd.f32 %v927_v26, %v426_v57  ;;  %v447_v62 = vadd.f32 %v927_v26, %v446_v58  ;;  %v389_v63 = vpop.f32.mrf.mxu0  ;;  %v409_v0 = vpop.f32.mrf.mxu1 }
  0xc9   : > { %v390_v7 = vadd.f32 %v927_v26, %v389_v63  ;;  %v410_v8 = vadd.f32 %v927_v26, %v409_v0 }
  0xca   : > { %v758_v1 = vpack.c.bf16 %v427_v61, %v425_v59  ;;  %v778_v2 = vpack.c.bf16 %v447_v62, %v445_v60 }
  0xcc   : > { %798 = vst [vmem:[%s938_s13 + $0x48] sm:$0xff] %v758_v1  }
  0xcd   : > { %802 = vst [vmem:[%s938_s13 + $0x68] sm:$0xff] %v778_v2  }
  0xcf   : > { %v429_v3 = vpop.f32.mrf.mxu2  ;;  %v449_v4 = vpop.f32.mrf.mxu3 }
  0xd0   : > { %v391_v5 = vpop.f32.mrf.mxu0  ;;  %v411_v6 = vpop.f32.mrf.mxu1  ;;  %v430_v15 = vadd.f32 %v927_v26, %v429_v3  ;;  %v450_v16 = vadd.f32 %v927_v26, %v449_v4 }
  0xd1   : > { %v392_v9 = vadd.f32 %v927_v26, %v391_v5  ;;  %v412_v10 = vadd.f32 %v927_v26, %v411_v6 }
  0xd3   : > { %v723_v11 = vpack.c.bf16 %v392_v9, %v390_v7  ;;  %v743_v12 = vpack.c.bf16 %v412_v10, %v410_v8 }
  0xd5   : > { %791 = vst [vmem:[%s938_s13 + $0x10] sm:$0xff] %v723_v11  }
  0xd6   : > { %795 = vst [vmem:[%s938_s13 + $0x30] sm:$0xff] %v743_v12  }
  0xd7   : > { %v431_v13 = vpop.f32.mrf.mxu2  ;;  %v451_v14 = vpop.f32.mrf.mxu3 }
  0xd8   : > { %v432_v17 = vadd.f32 %v927_v26, %v431_v13  ;;  %v452_v18 = vadd.f32 %v927_v26, %v451_v14  ;;  %v394_v19 = vpop.f32.mrf.mxu0  ;;  %v414_v20 = vpop.f32.mrf.mxu1 }
  0xd9   : > { %v395_v28 = vadd.f32 %v927_v26, %v394_v19  ;;  %v415_v29 = vadd.f32 %v927_v26, %v414_v20 }
  0xda   : > { %v763_v21 = vpack.c.bf16 %v432_v17, %v430_v15  ;;  %v783_v22 = vpack.c.bf16 %v452_v18, %v450_v16 }
  0xdc   : > { %799 = vst [vmem:[%s938_s13 + $0x50] sm:$0xff] %v763_v21  }
  0xdd   : > { %803 = vst [vmem:[%s938_s13 + $0x70] sm:$0xff] %v783_v22  }
  0xdf   : > { %v434_v23 = vpop.f32.mrf.mxu2  ;;  %v454_v24 = vpop.f32.mrf.mxu3 }
  0xe0   : > { %v396_v25 = vpop.f32.mrf.mxu0  ;;  %v416_v27 = vpop.f32.mrf.mxu1  ;;  %v435_v36 = vadd.f32 %v927_v26, %v434_v23  ;;  %v455_v37 = vadd.f32 %v927_v26, %v454_v24 }
  0xe1   : > { %v397_v30 = vadd.f32 %v927_v26, %v396_v25  ;;  %v417_v31 = vadd.f32 %v927_v26, %v416_v27 }
  0xe3   : > { %v728_v32 = vpack.c.bf16 %v397_v30, %v395_v28  ;;  %v748_v33 = vpack.c.bf16 %v417_v31, %v415_v29 }
  0xe5   : > { %792 = vst [vmem:[%s938_s13 + $0x18] sm:$0xff] %v728_v32  }
  0xe6   : > { %796 = vst [vmem:[%s938_s13 + $0x38] sm:$0xff] %v748_v33  }
  0xe7   : > { %v436_v34 = vpop.f32.mrf.mxu2  ;;  %v456_v35 = vpop.f32.mrf.mxu3 }
  0xe8   : > { %v437_v38 = vadd.f32 %v927_v26, %v436_v34  ;;  %v457_v39 = vadd.f32 %v927_v26, %v456_v35 }
  0xea   : > { %v768_v40 = vpack.c.bf16 %v437_v38, %v435_v36  ;;  %v788_v41 = vpack.c.bf16 %v457_v39, %v455_v37 }
  0xec   : > { %800 = vst [vmem:[%s938_s13 + $0x58] sm:$0xff] %v768_v40  }
  0xed   : > { %804 = vst [vmem:[%s938_s13 + $0x78] sm:$0xff] %v788_v41  }
  0xee PF: > { %s13_s12 = sadd.s32 1, %s844_s12  }
  0xef   : > { %p10_p4 = scmp.ge.s32.totalorder %s13_s12, 4  }
  0xf1   :  { %12 = sbr.rel (!%p10_p4) target bundleno = 1 (0x1), region = 62 }

// kernel: _lambda_.13
= control target key start
LH: loop header
LB: loop body
LE: loop exit
PB: predicated region body
PF: predicated region fallthrough
CT: control target
= control target key end

     0   :  { %s314_s0 = inlined_call_operand.vmem [shape: bf16[2,16,128], index: 0, kind: input, shape index: {}]   ;;  %s315_s1 = inlined_call_operand.vmem [shape: bf16[128,128], index: 1, kind: input, shape index: {}]   ;;  %s316_s2 = inlined_call_operand.vmem [shape: f32[1,128], index: 2, kind: input, shape index: {}]   ;;  %s317_s3 = inlined_call_operand.hbm [shape: f32[2,128], index: 3, kind: output, shape index: {}]  }
   0x1   :  { %v215_v0 = vld [vmem:[%s315_s1 + $0x38] sm:$0xff]  ;;  %v214_v1 = vld [vmem:[%s315_s1 + $0x30] sm:$0xff]  ;;  %v217_v2 = vld [vmem:[%s314_s0] sm:$0xff]  }
   0x2   :  { %127 = vmatpush.bf16.msra.mxu0 %v215_v0  ;;  %v218_v3 = vunpack.c.l.bf16 %v217_v2  ;;  %v219_v4 = vunpack.c.h.bf16 %v217_v2  ;;  %v224_v5 = vld [vmem:[%s314_s0 + $0x8] sm:$0xff]  }
   0x3   :  { %v222_v6 = vunpack.c.l.bf16 %v224_v5  ;;  %v223_v7 = vunpack.c.h.bf16 %v224_v5 }
   0x4   :  { %8 = vsyncpa [#allocation3], 0  ;;  %v23_v8 = vmax.f32 %v218_v3, 0.0  ;;  %v24_v9 = vmax.f32 %v219_v4, 0.0  ;;  %v213_v10 = vld [vmem:[%s315_s1 + $0x28] sm:$0xff]  ;;  %v212_v17 = vld [vmem:[%s315_s1 + $0x20] sm:$0xff] }
   0x5   :  { %v25_v11 = vmax.f32 %v222_v6, 0.0  ;;  %v26_v12 = vmax.f32 %v223_v7, 0.0  ;;  %v211_v23 = vld [vmem:[%s315_s1 + $0x18] sm:$0xff]  ;;  %v210_v28 = vld [vmem:[%s315_s1 + $0x10] sm:$0xff]  ;;  %v209_v33 = vld [vmem:[%s315_s1 + $0x8] sm:$0xff]  ;;  %vm75_vm0 = vcmask 1041409  }
   0x6   :  { %128 = vmatpush.bf16.msra.mxu0 %v214_v1  ;;  %v27_v13 = vpack.c.bf16 %v24_v9, %v23_v8  ;;  %v208_v38 = vld [vmem:[%s315_s1] sm:$0xff]  ;;  %s257_s1 = smov [#allocation2]   ;;  %s167_s8 = sshll.u32 %s317_s3, 4  ;;  %s168_s8 = int_to_ptr.hbm [resolvable:$true] %s167_s8 }
   0x7   :  { %v28_v14 = vpack.c.bf16 %v26_v12, %v25_v11  ;;  %v226_v46 = vld [vmem:[%s316_s2] ss:$0 sm:$0xff]  ;;  %s165_s6 = sshll.u32 %s257_s1, 4  ;;  %s166_s6 = int_to_ptr.vmem [resolvable:$true] %s165_s6 }
   0x8   :  { %v29_v15 = vunpack.c.l.bf16 %v27_v13  ;;  %v30_v16 = vunpack.c.h.bf16 %v27_v13 }
   0x9   :  { %v31_v18 = vunpack.c.l.bf16 %v28_v14  ;;  %v32_v19 = vunpack.c.h.bf16 %v28_v14 }
   0xa   :  { %129 = vmatpush.bf16.msra.mxu0 %v213_v10  ;;  %v33_v20 = vadd.f32 %v30_v16, %v29_v15 }
   0xb   :  { %v40_v21 = vadd.f32 %v32_v19, %v31_v18 }
   0xc   :  { %v34_v22 = vrot.slane %v33_v20, 4 }
   0xd   :  { %v41_v24 = vrot.slane %v40_v21, 4 }
   0xe   :  { %130 = vmatpush.bf16.msra.mxu0 %v212_v17  ;;  %v35_v25 = vadd.f32 %v34_v22, %v33_v20 }
   0xf   :  { %v42_v26 = vadd.f32 %v41_v24, %v40_v21 }
  0x10   :  { %v36_v27 = vrot.slane %v35_v25, 2 }
  0x11   :  { %v43_v29 = vrot.slane %v42_v26, 2 }
  0x12   :  { %131 = vmatpush.bf16.msra.mxu0 %v211_v23  ;;  %v37_v30 = vadd.f32 %v36_v27, %v35_v25 }
  0x13   :  { %v44_v31 = vadd.f32 %v43_v29, %v42_v26 }
  0x14   :  { %v38_v32 = vrot.slane %v37_v30, 1 }
  0x15   :  { %v45_v34 = vrot.slane %v44_v31, 1 }
  0x16   :  { %132 = vmatpush.bf16.msra.mxu0 %v210_v28  ;;  %v39_v35 = vadd.f32 %v38_v32, %v37_v30 }
  0x17   :  { %v46_v36 = vadd.f32 %v45_v34, %v44_v31 }
  0x18   :  { %v47_v37 = vmul.f32 0.0625, %v39_v35 }
  0x19   :  { %v48_v39 = vmul.f32 0.0625, %v46_v36 }
  0x1a   :  { %133 = vmatpush.bf16.msra.mxu0 %v209_v33  ;;  %v49_v40 = vpack.c.bf16 %v47_v37, %v47_v37 }
  0x1b   :  { %v50_v41 = vpack.c.bf16 %v48_v39, %v48_v39 }
  0x1c   :  { %v73_v42 = vunpack.c.l.b16 %v49_v40 }
  0x1d   :  { %v74_v43 = vunpack.c.l.b16 %v50_v41 }
  0x1e   :  { %134 = vmatpush.bf16.msra.mxu0 %v208_v38 }
  0x1f   :  { %v76_v44 = vsel %vm75_vm0, %v74_v43, %v73_v42 }
  0x20   :  { %v77_v45 = vpack.c.b16 %v76_v44, %v76_v44 }
  0x22   :  { %135 = vmatmul.bf16.vlgmr.msra.gmra.mxu0 %v77_v45 }
  0x9f   :  { %v136_v47 = vpop.f32.mrf.mxu0 }
  0xa0   :  { %v137_v48 = vadd.f32 %v226_v46, %v136_v47 }
  0xa2   :  { %v140_v49 = vsub.f32 0.0, %v137_v48 }
  0xa4   :  { %v141_v50 = vmul.f32 1.442695, %v140_v49 }
  0xa6   :  { %227 = vpow2.f32 %v141_v50 }
  0xa7   :  { %v138_v51 = vpop.f32.mrf.mxu0 }
  0xac   :  { %v228_v52 = vpop.eup %227 }
  0xad   :  { %v143_v53 = vadd.f32 1.0, %v228_v52 }
  0xaf   :  { %229 = vrcp.f32 %v143_v53  ;;  %v155_v57 = vand.u32 2147483648, %v143_v53  ;;  %v153_v59 = vand.u32 2147483647, %v143_v53  ;;  %vm149_vm2 = vweird.f32 %v143_v53 }
  0xb1   :  { %v156_v61 = vor.u32 1.1754944e-38, %v155_v57  ;;  %vm154_vm4 = vcmp.eq.f32.partialorder %v153_v59, 8.507059e+37 }
  0xb5   :  { %v230_v54 = vpop.eup %229 }
  0xb6   :  { %v145_v55 = vmul.f32 %v230_v54, %v143_v53  ;;  %vm150_vm1 = vweird.f32 %v230_v54 }
  0xb7   :  { %vm151_vm3 = vmor %vm149_vm2, %vm150_vm1 }
  0xb8   :  { %v146_v56 = vsub.f32 1.0, %v145_v55 }
  0xba   :  { %v147_v58 = vmul.f32 %v230_v54, %v146_v56 }
  0xbc   :  { %v148_v60 = vadd.f32 %v230_v54, %v147_v58 }
  0xbe   :  { %v152_v62 = vsel %vm151_vm3, %v230_v54, %v148_v60 }
  0xbf   :  { %v157_v63 = vsel %vm154_vm4, %v156_v61, %v152_v62 }
  0xc0   :  { %159 = vst [vmem:[#allocation2] sm:$0x3] %v157_v63 }
  0xc1   :  { %170 = dma.vmem_to_hbm [thread:$0]  %s166_s6, 32, %s168_s8, [#allocation3]  }
  0xc2   :  { %255 = dma.done.wait [#allocation3], 32  }
  0xc3   :  { %256 = vsyncadd [#allocation3], 4294967264 }
  0xc4   :  { %175 = vsyncpa [#allocation3], 1 }

// kernel: _lambda_.8
= control target key start
LH: loop header
LB: loop body
LE: loop exit
PB: predicated region body
PF: predicated region fallthrough
CT: control target
= control target key end

     0   :  { %s3077_s12 = smov 0   ;;  %s4310_s0 = inlined_call_operand.vmem [shape: bf16[2,64,128], index: 0, kind: input, shape index: {}, may-alias: {0,3}]   ;;  %s4311_s1 = inlined_call_operand.vmem [shape: bf16[128,128], index: 1, kind: input, shape index: {}]   ;;  %s4312_s2 = inlined_call_operand.vmem [shape: bf16[9,128,128], index: 2, kind: input, shape index: {}]   ;;  %s4313_s3 = inlined_call_operand.vmem [shape: bf16[2,64,128], index: 3, kind: output, shape index: {}, may-alias: {0,3}]  }
   0x1 LB: > { %s2356_s13 = sadd.s32 4294967295, %s3054_s12   ;;  %p2360_p0 = scmp.ge.s32.totalorder %s3054_s12, 1  ;;  %s3054_s12 = sphi %s3077_s12, %s13_s12  }
   0x2   : > { %p137_p1 = scmp.lt.s32.totalorder %s3054_s12, 3 }
   0x4   : > { %p138_p2 = pnand %p2360_p0, %p137_p1 }
   0x5   : > { %p161_p3 = scmp.lt.s32.totalorder (!%p138_p2), %s2356_s13, 1 }
   0x6   : > { %141 = sbr.rel (%p138_p2) target bundleno = 504 (0x1f8), region = 32 }
   0xb   : > { %v2872_v0 = vld [vmem:[%s4311_s1 + $0x38] sm:$0xff]  ;;  %v2871_v1 = vld [vmem:[%s4311_s1 + $0x30] sm:$0xff]  ;;  %v2870_v2 = vld [vmem:[%s4311_s1 + $0x28] sm:$0xff]  ;;  %s4486_s13 = smov (!%p161_p3, %s2356_s13), 1  ;;  %v323_v35 = vlaneseq  ;;  %v3056_v46 = vmov 0  }
   0xc   : > { %266 = vmatpush.bf16.msra.mxu0 %v2872_v0  ;;  %3023 = vmatpush.bf16.msra.mxu2 %v2872_v0  ;;  %v2869_v3 = vld [vmem:[%s4311_s1 + $0x20] sm:$0xff]  ;;  %s2863_s22 = sshll.u32 %s4486_s13, 5  ;;  %v2868_v4 = vld [vmem:[%s4311_s1 + $0x18] sm:$0xff]  ;;  %v2867_v6 = vld [vmem:[%s4311_s1 + $0x10] sm:$0xff]  ;;  %304 = vst [vmem:[#allocation2 + $0x4] sm:$0xf] %v3056_v46 }
   0xd   : > { %s3108_s27 = scalar_lea.vmem %s4310_s0, %s2863_s22  ;;  %v2892_v5 = vld [vmem:[%s4312_s2 + $0x78] sm:$0xff]  ;;  %v2891_v9 = vld [vmem:[%s4312_s2 + $0x70] sm:$0xff]  ;;  %v2866_v14 = vld [vmem:[%s4311_s1 + $0x8] sm:$0xff]  ;;  %v3164_v36 = vshrl.u32 %v323_v35, 7  ;;  %303 = vst [vmem:[#allocation2] sm:$0xf] %v3056_v46  ;;  %s4277_s9 = scalar_lea.vmem %s4313_s3, %s2863_s22 }
   0xe   : > { %v3117_v7 = vld [vmem:[%s3108_s27] sm:$0xff]   ;;  %v3120_v8 = vld [vmem:[%s3108_s27 + $0x10] sm:$0xff]   ;;  %744 = vmatpush.bf16.msra.mxu1 %v2892_v5  ;;  %3031 = vmatpush.bf16.msra.mxu3 %v2892_v5  ;;  %v3144_v22 = vld [vmem:[%s3108_s27 + $0x8] sm:$0xff]   ;;  %305 = vst [vmem:[#allocation2 + $0x28] sm:$0xf] %v3056_v46 }
   0xf   : > { %v4321_v10 = vunpack.c.l.bf16 %v3117_v7  ;;  %v4320_v11 = vunpack.c.h.bf16 %v3117_v7  ;;  %v4317_v12 = vunpack.c.l.bf16 %v3120_v8  ;;  %v4316_v13 = vunpack.c.h.bf16 %v3120_v8  ;;  %v2865_v19 = vld [vmem:[%s4311_s1] sm:$0xff]  ;;  %v3147_v23 = vld [vmem:[%s3108_s27 + $0x18] sm:$0xff]   ;;  %v2890_v34 = vld [vmem:[%s4312_s2 + $0x68] sm:$0xff]  ;;  %306 = vst [vmem:[#allocation2 + $0x2c] sm:$0xf] %v3056_v46 }
  0x10   : > { %267 = vmatpush.bf16.msra.mxu0 %v2871_v1  ;;  %3024 = vmatpush.bf16.msra.mxu2 %v2871_v1  ;;  %v4319_v24 = vunpack.c.l.bf16 %v3144_v22  ;;  %v4318_v25 = vunpack.c.h.bf16 %v3144_v22  ;;  %v4315_v26 = vunpack.c.l.bf16 %v3147_v23  ;;  %v4314_v27 = vunpack.c.h.bf16 %v3147_v23  ;;  %v2884_v37 = vld [vmem:[%s4312_s2 + $0x38] sm:$0xff]  ;;  %v2889_v38 = vld [vmem:[%s4312_s2 + $0x60] sm:$0xff]  ;;  %v2883_v44 = vld [vmem:[%s4312_s2 + $0x30] sm:$0xff] }
  0x11   : > { %v190_v15 = vmax.f32 %v4321_v10, 0.0  ;;  %v191_v16 = vmax.f32 %v4320_v11, 0.0  ;;  %v194_v17 = vmax.f32 %v4317_v12, 0.0  ;;  %v195_v18 = vmax.f32 %v4316_v13, 0.0  ;;  %v2888_v45 = vld [vmem:[%s4312_s2 + $0x58] sm:$0xff]  ;;  %v2882_v49 = vld [vmem:[%s4312_s2 + $0x28] sm:$0xff] }
  0x12   : > { %745 = vmatpush.bf16.msra.mxu1 %v2891_v9  ;;  %3032 = vmatpush.bf16.msra.mxu3 %v2891_v9  ;;  %v192_v28 = vmax.f32 %v4319_v24, 0.0  ;;  %v193_v29 = vmax.f32 %v4318_v25, 0.0  ;;  %v196_v30 = vmax.f32 %v4315_v26, 0.0  ;;  %v197_v31 = vmax.f32 %v4314_v27, 0.0  ;;  %v2887_v53 = vld [vmem:[%s4312_s2 + $0x50] sm:$0xff]  ;;  %v2881_v58 = vld [vmem:[%s4312_s2 + $0x20] sm:$0xff] }
  0x13   : > { %v198_v20 = vpack.c.bf16 %v191_v16, %v190_v15  ;;  %v200_v21 = vpack.c.bf16 %v195_v18, %v194_v17  ;;  %v3173_v39 = vadd.s32 8, %v3164_v36  ;;  %v3176_v40 = vadd.s32 16, %v3164_v36  ;;  %v2886_v60 = vld [vmem:[%s4312_s2 + $0x48] sm:$0xff]  ;;  %v2912_v5 = vld [vmem:[%s4312_s2 + $0xf8] sm:$0xff]  ;;  %v922_v10 = vld [vmem:[#allocation2 + $0x4] sm:$0xf] }
  0x14   : > { %268 = vmatpush.bf16.msra.mxu0 %v2870_v2  ;;  %3025 = vmatpush.bf16.msra.mxu2 %v2870_v2  ;;  %v199_v32 = vpack.c.bf16 %v193_v29, %v192_v28  ;;  %v201_v33 = vpack.c.bf16 %v197_v31, %v196_v30  ;;  %v336_v41 = vand.u32 7, %v3164_v36  ;;  %v3209_v54 = vadd.s32 24, %v3164_v36 }
  0x15   : > { %v343_v42 = vand.u32 7, %v3173_v39  ;;  %v350_v43 = vand.u32 7, %v3176_v40  ;;  %v3224_v63 = vadd.s32 32, %v3164_v36  ;;  %vm485_vm6 = vsmask.f32 3328  ;;  %v2915_v39 = vld [vmem:[%s4312_s2 + $0x110] sm:$0xff] }
  0x16   : > { %746 = vmatpush.bf16.msra.mxu1 %v2890_v34  ;;  %3033 = vmatpush.bf16.msra.mxu3 %v2890_v34  ;;  %vm428_vm0 = vcmp.ge.s32.totalorder %v336_v41, 1  ;;  %v357_v61 = vand.u32 7, %v3209_v54  ;;  %vm486_vm7 = vsmask.f32 7440  ;;  %v3239_v9 = vadd.s32 40, %v3164_v36  ;;  %v2911_v34 = vld [vmem:[%s4312_s2 + $0xf0] sm:$0xff] }
  0x17   : > { %vm429_vm1 = vcmp.ge.s32.totalorder %v343_v42, 1  ;;  %vm469_vm2 = vmpackc.low %vm428_vm0, %vm428_vm0  ;;  %vm3194_vm3 = vcmp.ge.s32.totalorder %v350_v43, 1  ;;  %v364_v17 = vand.u32 7, %v3224_v63  ;;  %v3252_v18 = vadd.s32 48, %v3164_v36 }
  0x18   : > { %269 = vmatpush.bf16.msra.mxu0 %v2869_v3  ;;  %3026 = vmatpush.bf16.msra.mxu2 %v2869_v3  ;;  %vm470_vm4 = vmpackc.low %vm429_vm1, %vm429_vm1  ;;  %v477_v48 = vsel %vm469_vm2, 65537, %v3056_v46  ;;  %vm3246_vm9 = vcmp.ge.s32.totalorder %v357_v61, 1  ;;  %v3258_v28 = vunpack.c.h.b16 %v3056_v46  ;;  %v371_v35 = vand.u32 7, %v3239_v9 }
  0x19   : > { %v478_v50 = vsel %vm470_vm4, 65537, %v3056_v46  ;;  %v489_v51 = vshll.u32 %v477_v48, 16  ;;  %v492_v52 = vshrl.u32 %v477_v48, 16  ;;  %vm471_vm5 = vmpackc.low %vm3194_vm3, %vm3194_vm3  ;;  %vm3275_vm11 = vcmp.ge.s32.totalorder %v364_v17, 1 }
  0x1a   : > { %747 = vmatpush.bf16.msra.mxu1 %v2889_v38  ;;  %3034 = vmatpush.bf16.msra.mxu3 %v2889_v38  ;;  %v498_v57 = vshll.u32 %v478_v50, 16  ;;  %v479_v62 = vsel %vm471_vm5, 65537, %v3056_v46  ;;  %vm3226_vm8 = vmor %vm485_vm6, %vm486_vm7  ;;  %v502_v3 = vshrl.u32 %v478_v50, 16  ;;  %v2878_v50 = vld [vmem:[%s4312_s2 + $0x8] sm:$0xff]  ;;  %vm3297_vm0 = vcmp.ge.s32.totalorder %v371_v35, 1 }
  0x1b   : > { %v491_v55 = vrot.slane %v489_v51, 5  ;;  %v494_v56 = vrot.slane %v492_v52, 4  ;;  %v508_v16 = vshll.u32 %v479_v62, 16  ;;  %v512_v30 = vshrl.u32 %v479_v62, 16  ;;  %vm472_vm10 = vmpackc.low %vm3246_vm9, %vm3246_vm9  ;;  %v2910_v51 = vld [vmem:[%s4312_s2 + $0xe8] sm:$0xff] }
  0x1c   : > { %270 = vmatpush.bf16.msra.mxu0 %v2868_v4  ;;  %3027 = vmatpush.bf16.msra.mxu2 %v2868_v4  ;;  %v500_v1 = vrot.slane %v498_v57, 5  ;;  %v2880_v4 = vld [vmem:[%s4312_s2 + $0x18] sm:$0xff]  ;;  %v504_v29 = vrot.slane %v502_v3, 4  ;;  %v480_v52 = vsel %vm472_vm10, 65537, %v3056_v46  ;;  %vm473_vm1 = vmpackc.low %vm3275_vm11, %vm3275_vm11  ;;  %v4342_v57 = vmov 0 }
  0x1d   : > { %v495_v59 = vor.u32 %v494_v56, %v491_v55  ;;  %v514_v48 = vrot.slane %v512_v30, 4  ;;  %v2919_v56 = vld [vmem:[%s4312_s2 + $0x130] sm:$0xff]  ;;  %v4346_v62 = vmov 0  ;;  %v518_v3 = vshll.u32 %v480_v52, 16  ;;  %vm474_vm5 = vmpackc.low %vm3297_vm0, %vm3297_vm0 }
  0x1e   : > { %748 = vmatpush.bf16.msra.mxu1 %v2888_v45  ;;  %3035 = vmatpush.bf16.msra.mxu3 %v2888_v45  ;;  %v510_v45 = vrot.slane %v508_v16, 5  ;;  %v505_v47 = vor.u32 %v504_v29, %v500_v1  ;;  %v2918_v16 = vld [vmem:[%s4312_s2 + $0x128] sm:$0xff]  ;;  %v482_v29 = vsel %vm474_vm5, 65537, %v3056_v46  ;;  %vm436_vm10 = vcmp.le.s32.totalorder %v336_v41, 6 }
  0x1f   : > { %v496_v0 = vrot.slane %v495_v59, 4  ;;  %v444_v59 = vld [vmem:[#allocation2] sm:$0x8]  ;;  %vm947_vm11 = vmpackc.low %vm436_vm10, %vm436_vm10  ;;  %v4394_v2 = vmov 0 }
  0x20   : > { %271 = vmatpush.bf16.msra.mxu0 %v2867_v6  ;;  %3028 = vmatpush.bf16.msra.mxu2 %v2867_v6 }
  0x21   : > { %v501_v6 = vsel %vm3226_vm8, %v496_v0, %v500_v1  ;;  %v506_v0 = vrot.slane %v505_v47, 4  ;;  %v515_v1 = vor.u32 %v514_v48, %v510_v45 }
  0x22   : > { %749 = vmatpush.bf16.msra.mxu1 %v2887_v53  ;;  %3036 = vmatpush.bf16.msra.mxu3 %v2887_v53  ;;  %v574_v31 = vunpack.c.l.b16 %v501_v6  ;;  %v542_v53 = vshrl.u32 %v482_v29, 16 }
  0x24   : > { %272 = vmatpush.bf16.msra.mxu0 %v2866_v14  ;;  %3029 = vmatpush.bf16.msra.mxu2 %v2866_v14  ;;  %v2885_v14 = vld [vmem:[%s4312_s2 + $0x40] sm:$0xff] }
  0x26   : > { %750 = vmatpush.bf16.msra.mxu1 %v2886_v60  ;;  %3037 = vmatpush.bf16.msra.mxu3 %v2886_v60  ;;  %v445_v60 = vld [vmem:[#allocation2 + $0x4] sm:$0xf] }
  0x28   : > { %273 = vmatpush.bf16.msra.mxu0 %v2865_v19  ;;  %3030 = vmatpush.bf16.msra.mxu2 %v2865_v19  ;;  %v567_v19 = vunpack.c.l.b16 %v491_v55 }
  0x2a   : > { %751 = vmatpush.bf16.msra.mxu1 %v2885_v14  ;;  %3038 = vmatpush.bf16.msra.mxu3 %v2885_v14  ;;  %v522_v14 = vshrl.u32 %v480_v52, 16  ;;  %v538_v52 = vshll.u32 %v482_v29, 16  ;;  %v2906_v29 = vld [vmem:[%s4312_s2 + $0xc8] sm:$0xff] }
  0x2b   : > { %274 = vmatmul.bf16.vlgmr.msra.gmra.mxu0 %v198_v20  ;;  %284 = vmatmul.bf16.vlgmr.msra.gmra.mxu2 %v200_v21  ;;  %v568_v20 = vunpack.c.h.b16 %v491_v55  ;;  %v3255_v21 = vunpack.c.l.b16 %v3056_v46  ;;  %v3305_v55 = vadd.s32 56, %v3164_v36  ;;  %v3389_v36 = vsel %vm947_vm11, 65537, %v3056_v46 }
  0x2c   : > { %893 = vmatpush.bf16.msrb.mxu2 %v2884_v37  ;;  %1422 = vmatpush.bf16.msrb.mxu0 %v2912_v5  ;;  %v2920_v37 = vld [vmem:[%s4312_s2 + $0x138] sm:$0xff]  ;;  %v2877_v5 = vld [vmem:[%s4312_s2] sm:$0xff]  ;;  %vm963_vm11 = vsmask.f32 256 }
  0x2d   : > { %vm571_vm12 = vcmp.ne.s32.totalorder %v567_v19, %v3255_v21  ;;  %vm572_vm13 = vcmp.ne.s32.totalorder %v568_v20, %v3258_v28  ;;  %vm3283_vm14 = vcmp.ne.s32.totalorder %v574_v31, %v3255_v21  ;;  %v385_v15 = vand.u32 7, %v3305_v55 }
  0x2e   : > { %1548 = vmatpush.bf16.msrb.mxu1 %v2920_v37  ;;  %vm3310_vm2 = vmpackc.low %vm572_vm13, %vm571_vm12  ;;  %vm3401_vm12 = vcmp.le.s32.totalorder %v343_v42, 6 }
  0x2f   : > { %v4343_v57 = vsel %vm3310_vm2, 4294967295, %v4342_v57  ;;  %v630_v19 = vsel %vm3310_vm2, %v444_v59, 0  ;;  %vm3361_vm7 = vcmp.ge.s32.totalorder %v385_v15, 1  ;;  %vm948_vm0 = vmpackc.low %vm3401_vm12, %vm3401_vm12  ;;  %vm964_vm12 = vsmask.f32 4368 }
  0x30   : > { %894 = vmatpush.bf16.msrb.mxu2 %v2883_v44  ;;  %v378_v44 = vand.u32 7, %v3252_v18  ;;  %1423 = vmatpush.bf16.msrb.mxu0 %v2911_v34  ;;  %v520_v34 = vrot.slane %v518_v3, 5  ;;  %v782_v47 = vunpack.c.l.b16 %v630_v19  ;;  %vm476_vm9 = vmpackc.low %vm3361_vm7, %vm3361_vm7  ;;  %v540_v19 = vrot.slane %v538_v52, 5 }
  0x31   : > { %v3423_v42 = vsel %vm476_vm9, 65537, %v3056_v46  ;;  %v967_v52 = vshrl.u32 %v3389_v36, 16 }
  0x32   : > { %vm3316_vm3 = vcmp.ge.s32.totalorder %v378_v44, 1  ;;  %1549 = vmatpush.bf16.msrb.mxu1 %v2919_v56  ;;  %v562_v26 = vshrl.u32 %v3423_v42, 16 }
  0x33   : > { %vm475_vm6 = vmpackc.low %vm3316_vm3, %vm3316_vm3  ;;  %vm3459_vm3 = vcmp.le.s32.totalorder %v357_v61, 6  ;;  %v3476_v54 = vrot.slane %v967_v52, 7  ;;  %v970_v61 = vshll.u32 %v3389_v36, 16 }
  0x34   : > { %895 = vmatpush.bf16.msrb.mxu2 %v2882_v49  ;;  %1424 = vmatpush.bf16.msrb.mxu0 %v2910_v51  ;;  %v483_v37 = vsel %vm475_vm6, 65537, %v3056_v46  ;;  %v2908_v49 = vld [vmem:[%s4312_s2 + $0xd8] sm:$0xff]  ;;  %vm950_vm6 = vmpackc.low %vm3459_vm3, %vm3459_vm3 }
  0x35   : > { %v548_v59 = vshll.u32 %v483_v37, 16  ;;  %v973_v27 = vrot.slane %v3476_v54, 4 }
  0x36   : > { %1550 = vmatpush.bf16.msrb.mxu1 %v2918_v16  ;;  %v2916_v16 = vld [vmem:[%s4312_s2 + $0x118] sm:$0xff] }
  0x38   : > { %896 = vmatpush.bf16.msrb.mxu2 %v2881_v58 }
  0x3b   : > { %279 = vmatmul.bf16.gmra.mxu0 %v199_v32  ;;  %289 = vmatmul.bf16.gmra.mxu2 %v201_v33  ;;  %v575_v32 = vunpack.c.h.b16 %v501_v6  ;;  %v2879_v33 = vld [vmem:[%s4312_s2 + $0x10] sm:$0xff]  ;;  %v2909_v6 = vld [vmem:[%s4312_s2 + $0xe0] sm:$0xff] }
  0x3c   : > { %897 = vmatpush.bf16.msrb.mxu2 %v2880_v4  ;;  %v481_v4 = vsel %vm473_vm1, 65537, %v3056_v46  ;;  %1425 = vmatpush.bf16.msrb.mxu0 %v2909_v6 }
  0x3d   : > { %vm579_vm15 = vcmp.ne.s32.totalorder %v575_v32, %v3258_v28  ;;  %v528_v30 = vshll.u32 %v481_v4, 16  ;;  %v532_v31 = vshrl.u32 %v481_v4, 16  ;;  %v511_v32 = vsel %vm3226_vm8, %v506_v0, %v510_v45  ;;  %v2917_v45 = vld [vmem:[%s4312_s2 + $0x120] sm:$0xff] }
  0x3e   : > { %vm3322_vm4 = vmpackc.low %vm579_vm15, %vm3283_vm14  ;;  %v581_v0 = vunpack.c.l.b16 %v511_v32  ;;  %1551 = vmatpush.bf16.msrb.mxu1 %v2917_v45  ;;  %v582_v4 = vunpack.c.h.b16 %v511_v32  ;;  %vm3433_vm15 = vcmp.le.s32.totalorder %v350_v43, 6 }
  0x3f   : > { %v4347_v62 = vsel %vm3322_vm4, 4294967295, %v4346_v62  ;;  %v631_v20 = vsel %vm3322_vm4, %v445_v60, 0  ;;  %v3368_v56 = vrot.slane %v528_v30, 5  ;;  %v534_v58 = vrot.slane %v532_v31, 4  ;;  %vm949_vm5 = vmpackc.low %vm3433_vm15, %vm3433_vm15 }
  0x40   : > { %898 = vmatpush.bf16.msrb.mxu2 %v2879_v33  ;;  %v516_v33 = vrot.slane %v515_v1, 4  ;;  %v783_v48 = vunpack.c.l.b16 %v631_v20  ;;  %1426 = vmatpush.bf16.msrb.mxu0 %v2908_v49  ;;  %v552_v60 = vshrl.u32 %v483_v37, 16  ;;  %v2907_v1 = vld [vmem:[%s4312_s2 + $0xd0] sm:$0xff]  ;;  %v544_v20 = vrot.slane %v542_v53, 4 }
  0x41   : > { %v535_v30 = vor.u32 %v534_v58, %v3368_v56  ;;  %v3397_v31 = vrot.slane %v548_v59, 5  ;;  %vm3406_vm13 = vcmp.ne.s32.totalorder %v581_v0, %v3255_v21  ;;  %vm3426_vm14 = vcmp.ne.s32.totalorder %v582_v4, %v3258_v28  ;;  %v1275_v59 = vld [vmem:[#allocation2 + $0x4] sm:$0x8] }
  0x42   : > { %v3380_v3 = vsel %vm3226_vm8, %v516_v33, %v520_v34  ;;  %v554_v32 = vrot.slane %v552_v60, 4  ;;  %1552 = vmatpush.bf16.msrb.mxu1 %v2916_v16  ;;  %v545_v60 = vor.u32 %v544_v20, %v540_v19  ;;  %v2914_v16 = vld [vmem:[%s4312_s2 + $0x108] sm:$0xff]  ;;  %vm3519_vm9 = vmpackc.low %vm3426_vm14, %vm3406_vm13  ;;  %vm4322_vm14 = vsmask.f32 4352 }
  0x43   : > { %v588_v37 = vunpack.c.l.b16 %v3380_v3  ;;  %v589_v43 = vunpack.c.h.b16 %v3380_v3  ;;  %v1277_v3 = vsel %vm3310_vm2, %v1275_v59, 0 }
  0x44   : > { %899 = vmatpush.bf16.msrb.mxu2 %v2878_v50  ;;  %v524_v50 = vrot.slane %v522_v14, 4  ;;  %v2903_v14 = vld [vmem:[%s4312_s2 + $0xb8] sm:$0xff]  ;;  %1427 = vmatpush.bf16.msrb.mxu0 %v2907_v1  ;;  %v2905_v1 = vld [vmem:[%s4312_s2 + $0xc0] sm:$0xff]  ;;  %v555_v4 = vor.u32 %v554_v32, %v3397_v31  ;;  %v3512_v59 = vunpack.c.l.b16 %v1277_v3 }
  0x45   : > { %1238 = vmatpush.bf16.msrb.mxu3 %v2903_v14  ;;  %vm3447_vm1 = vcmp.ne.s32.totalorder %v588_v37, %v3255_v21  ;;  %vm3497_vm7 = vcmp.ne.s32.totalorder %v589_v43, %v3258_v28 }
  0x46   : > { %v525_v6 = vor.u32 %v524_v50, %v520_v34  ;;  %1553 = vmatpush.bf16.msrb.mxu1 %v2915_v39  ;;  %v556_v52 = vrot.slane %v555_v4, 4  ;;  %v3535_v34 = vsel %vm950_vm6, 65537, %v3056_v46  ;;  %vm3541_vm10 = vmpackc.low %vm3497_vm7, %vm3447_vm1  ;;  %v2900_v4 = vld [vmem:[%s4312_s2 + $0xa0] sm:$0xff] }
  0x48   : > { %900 = vmatpush.bf16.msrb.mxu2 %v2877_v5  ;;  %v791_v5 = vpack.c.b16 %v783_v48, %v782_v47  ;;  %v2902_v47 = vld [vmem:[%s4312_s2 + $0xb0] sm:$0xff]  ;;  %v526_v45 = vrot.slane %v525_v6, 4  ;;  %1428 = vmatpush.bf16.msrb.mxu0 %v2906_v29  ;;  %v558_v6 = vshll.u32 %v3423_v42, 16  ;;  %v3474_v29 = vsel %vm948_vm0, 65537, %v3056_v46  ;;  %vm3603_vm0 = vmor %vm963_vm11, %vm964_vm12 }
  0x49   : > { %1239 = vmatpush.bf16.msrb.mxu3 %v2902_v47  ;;  %v546_v47 = vrot.slane %v545_v60, 4  ;;  %v972_v60 = vor.u32 %v970_v61, %v3476_v54  ;;  %v996_v54 = vshll.u32 %v3535_v34, 16 }
  0x4a   : > { %v798_v50 = vshrl.u32 %v791_v5, 16  ;;  %v801_v0 = vshll.u32 %v791_v5, 16  ;;  %v2901_v5 = vld [vmem:[%s4312_s2 + $0xa8] sm:$0xff]  ;;  %v531_v37 = vsel %vm3226_vm8, %v526_v45, %v3368_v56  ;;  %v3491_v36 = vrot.slane %v558_v6, 5  ;;  %1554 = vmatpush.bf16.msrb.mxu1 %v2914_v16  ;;  %v2913_v6 = vld [vmem:[%s4312_s2 + $0x100] sm:$0xff] }
  0x4b   : > { %v978_v16 = vshll.u32 %v3474_v29, 16 }
  0x4c   : > { %v3480_v32 = vrot.slane %v798_v50, 3  ;;  %1429 = vmatpush.bf16.msrb.mxu0 %v2905_v1  ;;  %v975_v50 = vshrl.u32 %v3474_v29, 16  ;;  %v993_v29 = vshrl.u32 %v3535_v34, 16 }
  0x4d   : > { %1240 = vmatpush.bf16.msrb.mxu3 %v2901_v5 }
  0x4e   : > { %v3560_v5 = vrot.slane %v975_v50, 7  ;;  %1555 = vmatpush.bf16.msrb.mxu1 %v2913_v6  ;;  %v2899_v6 = vld [vmem:[%s4312_s2 + $0x98] sm:$0xff] }
  0x50   : > { %v982_v34 = vrot.slane %v3560_v5, 4 }
  0x51   : > { %1241 = vmatpush.bf16.msrb.mxu3 %v2900_v4 }
  0x55   : > { %1242 = vmatpush.bf16.msrb.mxu3 %v2899_v6 }
  0xa8   : > { %v275_v38 = vpop.f32.mrf.mxu0 }
  0xa9   : > { %v295_v53 = vmax.f32 %v275_v38, 0.0  ;;  %v536_v38 = vrot.slane %v535_v30, 4 }
  0xab   : > { %v3489_v33 = vsel %vm3226_vm8, %v536_v38, %v540_v19  ;;  %v3507_v19 = vsel %vm949_vm5, 65537, %v3056_v46  ;;  %v3527_v38 = vsel %vm3226_vm8, %v546_v47, %v3397_v31 }
  0xac   : > { %v602_v1 = vunpack.c.l.b16 %v3489_v33  ;;  %v984_v43 = vshrl.u32 %v3507_v19, 16  ;;  %v603_v14 = vunpack.c.h.b16 %v3489_v33  ;;  %v610_v47 = vunpack.c.h.b16 %v3527_v38 }
  0xae   : > { %v3391_v41 = vpop.f32.mrf.mxu2  ;;  %vm3581_vm15 = vcmp.ne.s32.totalorder %v602_v1, %v3255_v21  ;;  %v987_v1 = vshll.u32 %v3507_v19, 16  ;;  %v3607_v19 = vrot.slane %v993_v29, 7  ;;  %vm3643_vm6 = vcmp.ne.s32.totalorder %v603_v14, %v3258_v28 }
  0xaf   : > { %v299_v30 = vmax.f32 %v3391_v41, 0.0  ;;  %vm3653_vm11 = vcmp.ne.s32.totalorder %v610_v47, %v3258_v28 }
  0xb0   : > { %v277_v48 = vpop.f32.mrf.mxu0 }
  0xb1   : > { %v296_v58 = vmax.f32 %v277_v48, 0.0  ;;  %v3485_v48 = vrot.slane %v801_v0, 4 }
  0xb3   : > { %v2976_v40 = vpack.c.bf16 %v296_v58, %v295_v53  ;;  %v595_v53 = vunpack.c.l.b16 %v531_v37  ;;  %v596_v58 = vunpack.c.h.b16 %v531_v37  ;;  %v804_v31 = vor.u32 %v3485_v48, %v3480_v32 }
  0xb4   : > { %v609_v37 = vunpack.c.l.b16 %v3527_v38 }
  0xb5   : > { %3016 = vst [vmem:[#allocation2 + $0x8] sm:$0xff] %v2976_v40   ;;  %v3556_v40 = vsel %vm3226_vm8, %v556_v52, %v3491_v36  ;;  %vm3564_vm13 = vcmp.ne.s32.totalorder %v595_v53, %v3255_v21  ;;  %vm3569_vm8 = vcmp.ne.s32.totalorder %v596_v58, %v3258_v28  ;;  %v1038_v53 = vunpack.c.h.b16 %v972_v60 }
  0xb6   : > { %v287_v39 = vpop.f32.mrf.mxu2  ;;  %v616_v50 = vunpack.c.l.b16 %v3556_v40  ;;  %vm3648_vm7 = vcmp.ne.s32.totalorder %v609_v37, %v3255_v21  ;;  %vm3667_vm12 = vmpackc.low %vm3569_vm8, %vm3564_vm13  ;;  %v4388_v37 = vmov 0 }
  0xb7   : > { %v300_v41 = vmax.f32 %v287_v39, 0.0  ;;  %v1037_v39 = vunpack.c.l.b16 %v972_v60  ;;  %v980_v60 = vor.u32 %v978_v16, %v3560_v5  ;;  %vm3620_vm3 = vcmp.ne.s32.totalorder %v1038_v53, %v3258_v28  ;;  %v2897_v53 = vld [vmem:[%s4312_s2 + $0x88] sm:$0xff]  ;;  %vm3692_vm13 = vmpackc.low %vm3643_vm6, %vm3581_vm15 }
  0xb8   : > { %v3510_v45 = vpop.f32.mrf.mxu0  ;;  %v4389_v37 = vsel %vm3667_vm12, 4294967295, %v4388_v37  ;;  %v4395_v2 = vsel %vm3692_vm13, 4294967295, %v4394_v2  ;;  %vm3711_vm8 = vmpackc.low %vm3653_vm11, %vm3648_vm7  ;;  %vm3746_vm11 = vcmp.le.s32.totalorder %v364_v17, 6 }
  0xb9   : > { %v2986_v0 = vpack.c.bf16 %v300_v41, %v299_v30  ;;  %vm3611_vm1 = vcmp.ne.s32.totalorder %v1037_v39, %v3255_v21  ;;  %v981_v12 = vsel %vm3603_vm0, %v973_v27, %v980_v60 }
  0xba   : > { %vm3635_vm5 = vmpackc.low %vm3620_vm3, %vm3611_vm1  ;;  %v1044_v14 = vunpack.c.l.b16 %v981_v12  ;;  %vm3672_vm1 = vcmp.ne.s32.totalorder %v616_v50, %v3255_v21 }
  0xbb   : > { %3018 = vst [vmem:[#allocation2 + $0x18] sm:$0xff] %v2986_v0  }
  0xbc   : > { %v2873_v20 = vld [vmem:[#allocation2 + $0x4] sm:$0xff]  ;;  %v447_v61 = vld [vmem:[#allocation2 + $0xc] sm:$0xf]  ;;  %vm3722_vm15 = vcmp.ne.s32.totalorder %v1044_v14, %v3255_v21 }
  0xbd   : > { %v446_v3 = vld [vmem:[#allocation2 + $0x8] sm:$0xf]  ;;  %v633_v41 = vsel %vm3541_vm10, %v447_v61, 0  ;;  %752 = vmatmul.bf16.vlgmr.msra.gmra.mxu1 %v2873_v20  ;;  %v617_v61 = vunpack.c.h.b16 %v3556_v40  ;;  %v297_v40 = vmax.f32 %v3510_v45, 0.0 }
  0xbe   : > { %v632_v52 = vsel %vm3519_vm9, %v446_v3, 0  ;;  %v3586_v58 = vpop.f32.mrf.mxu2  ;;  %v785_v38 = vunpack.c.l.b16 %v633_v41  ;;  %v3588_v4 = vld [vmem:[#allocation2 + $0x8] sm:$0xf]  ;;  %v986_v3 = vrot.slane %v984_v43, 7  ;;  %v2898_v41 = vld [vmem:[%s4312_s2 + $0x90] sm:$0xff] }
  0xbf   : > { %v784_v0 = vunpack.c.l.b16 %v632_v52  ;;  %1243 = vmatpush.bf16.msrb.mxu3 %v2898_v41  ;;  %v1045_v41 = vunpack.c.h.b16 %v981_v12  ;;  %vm3677_vm3 = vcmp.ne.s32.totalorder %v617_v61, %v3258_v28  ;;  %v1100_v12 = vsel %vm3635_vm5, %v922_v10, 0  ;;  %v2896_v61 = vld [vmem:[%s4312_s2 + $0x80] sm:$0xff]  ;;  %v2951_v43 = vld [vmem:[%s4312_s2 + $0x210] sm:$0xff] }
  0xc0   : > { %v282_v20 = vpop.f32.mrf.mxu0  ;;  %v989_v39 = vor.u32 %v987_v1, %v986_v3  ;;  %v991_v45 = vrot.slane %v986_v3, 4  ;;  %vm3735_vm7 = vmpackc.low %vm3677_vm3, %vm3672_vm1 }
  0xc1   : > { %v792_v52 = vpack.c.b16 %v785_v38, %v784_v0  ;;  %v298_v16 = vmax.f32 %v282_v20, 0.0  ;;  %v1278_v0 = vsel %vm3322_vm4, %v3588_v4, 0  ;;  %v564_v20 = vrot.slane %v562_v26, 4  ;;  %v2930_v38 = vld [vmem:[%s4312_s2 + $0x170] sm:$0xff] }
  0xc2   : > { %v1313_v11 = vunpack.c.l.b16 %v1278_v0  ;;  %v301_v26 = vmax.f32 %v3586_v58, 0.0  ;;  %v990_v33 = vsel %vm3603_vm0, %v982_v34, %v989_v39  ;;  %v450_v50 = vld [vmem:[#allocation2 + $0x18] sm:$0xf]  ;;  %vm3727_vm6 = vcmp.ne.s32.totalorder %v1045_v41, %v3258_v28 }
  0xc3   : > { %v806_v29 = vshrl.u32 %v792_v52, 16  ;;  %v809_v6 = vshll.u32 %v792_v52, 16  ;;  %v2981_v13 = vpack.c.bf16 %v298_v16, %v297_v40  ;;  %v998_v52 = vor.u32 %v996_v54, %v3607_v19  ;;  %1244 = vmatpush.bf16.msrb.mxu3 %v2897_v53  ;;  %v451_v16 = vld [vmem:[#allocation2 + $0x1c] sm:$0xf]  ;;  %vm3770_vm1 = vmpackc.low %vm3727_vm6, %vm3722_vm15 }
  0xc4   : > { %v3697_v47 = vpack.c.b16 %v1313_v11, %v3512_v59  ;;  %v565_v32 = vor.u32 %v564_v20, %v3491_v36  ;;  %v4396_v11 = vmov 0  ;;  %v1051_v59 = vunpack.c.l.b16 %v990_v33  ;;  %v2931_v36 = vld [vmem:[%s4312_s2 + $0x178] sm:$0xff]  ;;  %vm951_vm15 = vmpackc.low %vm3746_vm11, %vm3746_vm11 }
  0xc5   : > { %v808_v25 = vrot.slane %v806_v29, 3  ;;  %v811_v24 = vrot.slane %v809_v6, 4  ;;  %3017 = vst [vmem:[#allocation2 + $0x10] sm:$0xff] %v2981_v13   ;;  %v3659_v13 = vld [vmem:[#allocation2 + $0xc] sm:$0xf]  ;;  %v3701_v10 = vsel %vm3603_vm0, %v991_v45, %v998_v52  ;;  %v4397_v11 = vsel %vm3711_vm8, 4294967295, %v4396_v11  ;;  %1731 = vmatpush.bf16.msra.mxu2 %v2931_v36 }
  0xc6   : > { %v292_v60 = vpop.f32.mrf.mxu2  ;;  %v1052_v56 = vunpack.c.h.b16 %v990_v33  ;;  %v4402_v0 = vmov 0  ;;  %v3742_v29 = vunpack.c.l.b16 %v1100_v12  ;;  %v1327_v52 = vshrl.u32 %v3697_v47, 16  ;;  %v2929_v36 = vld [vmem:[%s4312_s2 + $0x168] sm:$0xff] }
  0xc7   : > { %v3657_v58 = vor.u32 %v811_v24, %v808_v25  ;;  %v302_v54 = vmax.f32 %v292_v60, 0.0  ;;  %v4403_v0 = vsel %vm3735_vm7, 4294967295, %v4402_v0  ;;  %1245 = vmatpush.bf16.msrb.mxu3 %v2896_v61  ;;  %v1058_v63 = vunpack.c.l.b16 %v3701_v10  ;;  %v2940_v25 = vld [vmem:[%s4312_s2 + $0x1b8] sm:$0xff] }
  0xc8   : > { %v3758_v17 = vrot.slane %v565_v32, 4  ;;  %v636_v27 = vsel %vm3711_vm8, %v450_v50, 0  ;;  %vm3775_vm3 = vcmp.ne.s32.totalorder %v1051_v59, %v3255_v21  ;;  %vm3780_vm4 = vcmp.ne.s32.totalorder %v1052_v56, %v3258_v28  ;;  %v2948_v61 = vld [vmem:[%s4312_s2 + $0x1f8] sm:$0xff] }
  0xc9   : > { %v813_v30 = vsel %vm4322_vm14, %v804_v31, %v3657_v58  ;;  %v2991_v48 = vpack.c.bf16 %v302_v54, %v301_v26  ;;  %v1279_v31 = vsel %vm3519_vm9, %v3659_v13, 0  ;;  %vm3752_vm14 = vcmp.le.s32.totalorder %v371_v35, 6  ;;  %1732 = vmatpush.bf16.msra.mxu2 %v2930_v38  ;;  %2041 = vmatpush.bf16.msra.mxu0 %v2948_v61  ;;  %vm3839_vm11 = vmpackc.low %vm3780_vm4, %vm3775_vm3 }
  0xca   : > { %901 = vmatmul.bf16.vlgmr.msrb.gmra.mxu2 %v813_v30  ;;  %v1314_v53 = vunpack.c.l.b16 %v1279_v31  ;;  %v1330_v54 = vshll.u32 %v3697_v47, 16  ;;  %v637_v32 = vsel %vm3735_vm7, %v451_v16, 0  ;;  %v1059_v31 = vunpack.c.h.b16 %v3701_v10  ;;  %v2939_v10 = vld [vmem:[%s4312_s2 + $0x1b0] sm:$0xff]  ;;  %vm952_vm4 = vmpackc.low %vm3752_vm14, %vm3752_vm14 }
  0xcb   : > { %3019 = vst [vmem:[#allocation2 + $0x20] sm:$0xff] %v2991_v48   ;;  %v3800_v48 = vld [vmem:[#allocation2 + $0x18] sm:$0xf]  ;;  %v1329_v47 = vrot.slane %v1327_v52, 3  ;;  %v788_v59 = vunpack.c.l.b16 %v636_v27  ;;  %vm3804_vm6 = vcmp.ne.s32.totalorder %v1058_v63, %v3255_v21  ;;  %v1101_v50 = vsel %vm3770_vm1, %v3588_v4, 0 }
  0xcc   : > { %v2874_v39 = vld [vmem:[#allocation2 + $0xc] sm:$0xff]  ;;  %v2875_v45 = vld [vmem:[#allocation2 + $0x14] sm:$0xff]  ;;  %v3829_v4 = vsel %vm951_vm15, 65537, %v3056_v46  ;;  %v1332_v38 = vrot.slane %v1330_v54, 4  ;;  %vm3844_vm15 = vcmp.ne.s32.totalorder %v1059_v31, %v3258_v28  ;;  %v624_v1 = vunpack.c.h.b16 %v3758_v17 }
  0xcd   : > { %v448_v20 = vld [vmem:[#allocation2 + $0x10] sm:$0xf]  ;;  %v449_v26 = vld [vmem:[#allocation2 + $0x14] sm:$0xf]  ;;  %757 = vmatmul.bf16.gmra.mxu1 %v2874_v39  ;;  %762 = vmatmul.bf16.vlgmr.msra.gmra.mxu3 %v2875_v45  ;;  %v789_v39 = vunpack.c.l.b16 %v637_v32  ;;  %v1282_v45 = vsel %vm3692_vm13, %v3800_v48, 0  ;;  %v1002_v60 = vshrl.u32 %v3829_v4, 16  ;;  %v1136_v31 = vunpack.c.l.b16 %v1101_v50  ;;  %vm3867_vm3 = vmpackc.low %vm3844_vm15, %vm3804_vm6 }
  0xce   : > { %v634_v9 = vsel %vm3667_vm12, %v448_v20, 0  ;;  %v3762_v35 = vld [vmem:[#allocation2 + $0x10] sm:$0xf]  ;;  %v635_v33 = vsel %vm3692_vm13, %v449_v26, 0  ;;  %v3790_v24 = vld [vmem:[#allocation2 + $0x14] sm:$0xf]  ;;  %1915 = vmatpush.bf16.msra.mxu3 %v2940_v25  ;;  %v623_v20 = vunpack.c.l.b16 %v3758_v17  ;;  %1733 = vmatpush.bf16.msra.mxu2 %v2929_v36  ;;  %vm628_vm13 = vcmp.ne.s32.totalorder %v624_v1, %v3258_v28 }
  0xcf   : > { %v786_v14 = vunpack.c.l.b16 %v634_v9  ;;  %v1280_v41 = vsel %vm3541_vm10, %v3762_v35, 0  ;;  %v787_v12 = vunpack.c.l.b16 %v635_v33  ;;  %v1281_v16 = vsel %vm3667_vm12, %v3790_v24, 0  ;;  %v2928_v33 = vld [vmem:[%s4312_s2 + $0x160] sm:$0xff] }
  0xd0   : > { %v1315_v30 = vunpack.c.l.b16 %v1280_v41  ;;  %v1316_v9 = vunpack.c.l.b16 %v1281_v16  ;;  %v1102_v32 = vsel %vm3839_vm11, %v3659_v13, 0  ;;  %vm3872_vm14 = vcmp.ne.s32.totalorder %v623_v20, %v3255_v21  ;;  %v2956_v16 = vld [vmem:[%s4312_s2 + $0x238] sm:$0xff] }
  0xd1   : > { %v793_v42 = vpack.c.b16 %v787_v12, %v786_v14  ;;  %v1333_v12 = vor.u32 %v1332_v38, %v1329_v47  ;;  %v1103_v13 = vsel %vm3867_vm3, %v3762_v35, 0  ;;  %v1005_v56 = vshll.u32 %v3829_v4, 16  ;;  %v2927_v4 = vld [vmem:[%s4312_s2 + $0x158] sm:$0xff]  ;;  %2224 = vmatpush.bf16.msra.mxu1 %v2956_v16 }
  0xd2   : > { %v1322_v40 = vpack.c.b16 %v1315_v30, %v1314_v53  ;;  %1916 = vmatpush.bf16.msra.mxu3 %v2939_v10  ;;  %v1317_v30 = vunpack.c.l.b16 %v1282_v45  ;;  %v794_v10 = vpack.c.b16 %v789_v39, %v788_v59  ;;  %1734 = vmatpush.bf16.msra.mxu2 %v2928_v33  ;;  %v960_v59 = vsel %vm952_vm4, 65537, %v3056_v46  ;;  %vm3898_vm4 = vmpackc.low %vm628_vm13, %vm3872_vm14  ;;  %v3902_v45 = vld [vmem:[#allocation2 + $0x1c] sm:$0xf]  ;;  %v2926_v33 = vld [vmem:[%s4312_s2 + $0x150] sm:$0xff] }
  0xd3   : > { %v815_v53 = vshrl.u32 %v793_v42, 16  ;;  %v818_v52 = vshll.u32 %v793_v42, 16  ;;  %vm4424_vm6 = vsmask.f32 4352  ;;  %v3888_v35 = vpack.c.b16 %v1136_v31, %v3742_v29  ;;  %v2947_v29 = vld [vmem:[%s4312_s2 + $0x1f0] sm:$0xff] }
  0xd4   : > { %v1335_v63 = vshrl.u32 %v1322_v40, 16  ;;  %v1338_v26 = vshll.u32 %v1322_v40, 16  ;;  %vm4425_vm15 = vmmov %vm4424_vm6  ;;  %v1323_v42 = vpack.c.b16 %v1317_v30, %v1316_v9  ;;  %v1004_v40 = vrot.slane %v1002_v60, 7  ;;  %2042 = vmatpush.bf16.msra.mxu0 %v2947_v29  ;;  %v2945_v29 = vld [vmem:[%s4312_s2 + $0x1e0] sm:$0xff] }
  0xd5   : > { %v817_v14 = vrot.slane %v815_v53, 3  ;;  %v820_v41 = vrot.slane %v818_v52, 4  ;;  %v1138_v38 = vunpack.c.l.b16 %v1103_v13  ;;  %v4426_v39 = vmov 0  ;;  %v2876_v52 = vld [vmem:[#allocation2 + $0x1c] sm:$0xff]  ;;  %v2946_v13 = vld [vmem:[%s4312_s2 + $0x1e8] sm:$0xff] }
  0xd6   : > { %v1337_v54 = vrot.slane %v1335_v63, 3  ;;  %v1340_v25 = vrot.slane %v1338_v26, 4  ;;  %v4427_v39 = vsel %vm3898_vm4, 4294967295, %v4426_v39  ;;  %v1011_v20 = vshrl.u32 %v960_v59, 16  ;;  %v2893_v63 = vld [vmem:[#allocation2 + $0x8] sm:$0xff]  ;;  %1735 = vmatpush.bf16.msra.mxu2 %v2927_v4 }
  0xd7   : > { %v3859_v36 = vor.u32 %v820_v41, %v817_v14  ;;  %v1014_v53 = vshll.u32 %v960_v59, 16  ;;  %v824_v26 = vshrl.u32 %v794_v10, 16  ;;  %v827_v9 = vshll.u32 %v794_v10, 16  ;;  %v3911_v41 = vld [vmem:[#allocation2 + $0x20] sm:$0xf] }
  0xd8   : > { %v3861_v17 = vor.u32 %v1340_v25, %v1337_v54  ;;  %v1137_v27 = vunpack.c.l.b16 %v1102_v32  ;;  %v1000_v1 = vrot.slane %v3607_v19, 4  ;;  %v1344_v60 = vshrl.u32 %v1323_v42, 16  ;;  %v2938_v32 = vld [vmem:[%s4312_s2 + $0x1a8] sm:$0xff]  ;;  %v2955_v19 = vld [vmem:[%s4312_s2 + $0x230] sm:$0xff]  ;;  %2043 = vmatpush.bf16.msra.mxu0 %v2946_v13 }
  0xd9   : > { %v822_v50 = vsel %vm4424_vm6, %v3657_v58, %v3859_v36  ;;  %v452_v58 = vld [vmem:[#allocation2 + $0x20] sm:$0xf]  ;;  %v1347_v14 = vshll.u32 %v1323_v42, 16  ;;  %v1007_v54 = vor.u32 %v1005_v56, %v1004_v40  ;;  %v3913_v25 = vrot.slane %v1011_v20, 7  ;;  %1917 = vmatpush.bf16.msra.mxu3 %v2938_v32  ;;  %v2925_v42 = vld [vmem:[%s4312_s2 + $0x148] sm:$0xff]  ;;  %2225 = vmatpush.bf16.msra.mxu1 %v2955_v19 }
  0xda   : > { %v1342_v61 = vsel %vm4425_vm15, %v1333_v12, %v3861_v17  ;;  %906 = vmatmul.bf16.gmra.mxu2 %v822_v50  ;;  %v1153_v12 = vshll.u32 %v3888_v35, 16  ;;  %v638_v30 = vsel %vm3898_vm4, %v452_v58, 0  ;;  %v3924_v31 = vpack.c.b16 %v1138_v38, %v1137_v27  ;;  %v2954_v20 = vld [vmem:[%s4312_s2 + $0x228] sm:$0xff] }
  0xdb   : > { %1430 = vmatmul.bf16.vlgmr.msrb.gmra.mxu0 %v1342_v61  ;;  %v1009_v10 = vrot.slane %v1004_v40, 4  ;;  %v1016_v47 = vor.u32 %v1014_v53, %v3913_v25  ;;  %v826_v59 = vrot.slane %v824_v26, 3  ;;  %v829_v56 = vrot.slane %v827_v9, 4  ;;  %1736 = vmatpush.bf16.msra.mxu2 %v2926_v33  ;;  %v2937_v40 = vld [vmem:[%s4312_s2 + $0x1a0] sm:$0xff] }
  0xdc   : > { %v1283_v50 = vsel %vm3711_vm8, %v3902_v45, 0  ;;  %v1284_v61 = vsel %vm3735_vm7, %v3911_v41, 0  ;;  %v1346_v16 = vrot.slane %v1344_v60, 3  ;;  %v1349_v4 = vrot.slane %v1347_v14, 4  ;;  %v2924_v60 = vld [vmem:[%s4312_s2 + $0x140] sm:$0xff]  ;;  %2044 = vmatpush.bf16.msra.mxu0 %v2945_v29 }
  0xdd   : > { %767 = vmatmul.bf16.gmra.mxu3 %v2876_v52  ;;  %1556 = vmatmul.bf16.vlgmr.msrb.gmra.mxu1 %v2893_v63  ;;  %v790_v38 = vunpack.c.l.b16 %v638_v30  ;;  %v1008_v58 = vsel %vm3603_vm0, %v1000_v1, %v1007_v54  ;;  %v1155_v53 = vrot.slane %v1153_v12, 1  ;;  %v1158_v52 = vshll.u32 %v3924_v31, 16  ;;  %v1276_v29 = vld [vmem:[#allocation2 + $0x24] sm:$0xf] }
  0xde   : > { %v1319_v63 = vunpack.c.l.b16 %v1284_v61  ;;  %v1017_v26 = vsel %vm3603_vm0, %v1009_v10, %v1016_v47  ;;  %v1151_v9 = vshrl.u32 %v3888_v35, 16  ;;  %v1318_v27 = vunpack.c.l.b16 %v1283_v50  ;;  %1918 = vmatpush.bf16.msra.mxu3 %v2937_v40  ;;  %2226 = vmatpush.bf16.msra.mxu1 %v2954_v20  ;;  %v4050_v61 = vld [vmem:[#allocation2 + $0xc] sm:$0xf] }
  0xdf   : > { %v1065_v33 = vunpack.c.l.b16 %v1008_v58  ;;  %v1066_v1 = vunpack.c.h.b16 %v1008_v58  ;;  %1737 = vmatpush.bf16.msra.mxu2 %v2925_v42  ;;  %v3957_v14 = vor.u32 %v829_v56, %v826_v59  ;;  %v3959_v54 = vor.u32 %v1349_v4, %v1346_v16  ;;  %v1593_v58 = vld [vmem:[#allocation2 + $0x28] sm:$0x1] }
  0xe0   : > { %v795_v12 = vpack.c.b16 %v790_v38, %v790_v38  ;;  %vm442_vm14 = vcmp.le.s32.totalorder %v378_v44, 6  ;;  %v1156_v35 = vor.u32 %v1155_v53, %v1151_v9  ;;  %v1072_v30 = vunpack.c.l.b16 %v1017_v26 }
  0xe1   : > { %v1073_v32 = vunpack.c.h.b16 %v1017_v26  ;;  %vm443_vm6 = vcmp.le.s32.totalorder %v385_v15, 6  ;;  %vm953_vm15 = vmpackc.low %vm442_vm14, %vm442_vm14  ;;  %vm4428_vm13 = vsmask.f32 4352  ;;  %v3968_v10 = vrot.slane %v1158_v52, 1  ;;  %v2894_v52 = vld [vmem:[#allocation2 + $0x10] sm:$0xff] }
  0xe2   : > { %v831_v19 = vsel %vm4428_vm13, %v3859_v36, %v3957_v14  ;;  %v1324_v47 = vpack.c.b16 %v1319_v63, %v1318_v27  ;;  %vm954_vm7 = vmpackc.low %vm443_vm6, %vm443_vm6  ;;  %v961_v13 = vsel %vm953_vm15, 65537, %v3056_v46  ;;  %vm3972_vm8 = vcmp.ne.s32.totalorder %v1065_v33, %v3255_v21  ;;  %v2943_v26 = vld [vmem:[%s4312_s2 + $0x1d0] sm:$0xff] }
  0xe3   : > { %vm3977_vm12 = vcmp.ne.s32.totalorder %v1066_v1, %v3258_v28  ;;  %1738 = vmatpush.bf16.msra.mxu2 %v2924_v60  ;;  %v962_v55 = vsel %vm954_vm7, 65537, %v3056_v46  ;;  %v1020_v15 = vshrl.u32 %v961_v13, 16  ;;  %v1351_v36 = vsel %vm4428_vm13, %v3861_v17, %v3959_v54  ;;  %v2944_v46 = vld [vmem:[%s4312_s2 + $0x1d8] sm:$0xff]  ;;  %v2953_v17 = vld [vmem:[%s4312_s2 + $0x220] sm:$0xff] }
  0xe4   : > { %v833_v59 = vshrl.u32 %v795_v12, 16  ;;  %v836_v56 = vshll.u32 %v795_v12, 16  ;;  %v1023_v50 = vshll.u32 %v961_v13, 16  ;;  %vm3986_vm14 = vcmp.ne.s32.totalorder %v1072_v30, %v3255_v21  ;;  %vm4005_vm7 = vmpackc.low %vm3977_vm12, %vm3972_vm8  ;;  %2045 = vmatpush.bf16.msra.mxu0 %v2944_v46  ;;  %2227 = vmatpush.bf16.msra.mxu1 %v2953_v17  ;;  %v2952_v30 = vld [vmem:[%s4312_s2 + $0x218] sm:$0xff] }
  0xe5   : > { %vm3991_vm6 = vcmp.ne.s32.totalorder %v1073_v32, %v3258_v28  ;;  %v1022_v40 = vrot.slane %v1020_v15, 7  ;;  %v1029_v16 = vshrl.u32 %v962_v55, 16  ;;  %v1353_v4 = vshrl.u32 %v1324_v47, 16  ;;  %v2935_v15 = vld [vmem:[%s4312_s2 + $0x190] sm:$0xff] }
  0xe6   : > { %v1356_v38 = vshll.u32 %v1324_v47, 16  ;;  %v1018_v20 = vrot.slane %v3913_v25, 4  ;;  %v1032_v53 = vshll.u32 %v962_v55, 16  ;;  %v1104_v63 = vsel %vm4005_vm7, %v3790_v24, 0  ;;  %vm4024_vm8 = vmpackc.low %vm3991_vm6, %vm3986_vm14  ;;  %v2942_v55 = vld [vmem:[%s4312_s2 + $0x1c8] sm:$0xff] }
  0xe7   : > { %v1025_v9 = vor.u32 %v1023_v50, %v1022_v40  ;;  %v1027_v27 = vrot.slane %v1022_v40, 4  ;;  %v4016_v33 = vrot.slane %v1029_v16, 7  ;;  %vm4439_vm12 = vsmask.f32 7424  ;;  %v1585_v50 = vld [vmem:[#allocation2 + $0x8] sm:$0xf] }
  0xe8   : > { %v1161_v1 = vsel %vm4439_vm12, %v1156_v35, %v3968_v10  ;;  %v1105_v24 = vsel %vm4024_vm8, %v3800_v48, 0  ;;  %v1285_v60 = vsel %vm3898_vm4, %v1276_v29, 0  ;;  %v2936_v35 = vld [vmem:[%s4312_s2 + $0x198] sm:$0xff]  ;;  %v835_v32 = vrot.slane %v833_v59, 3  ;;  %2046 = vmatpush.bf16.msra.mxu0 %v2943_v26  ;;  %2228 = vmatpush.bf16.msra.mxu1 %v2952_v30  ;;  %v4057_v16 = vld [vmem:[#allocation2 + $0x10] sm:$0xf] }
  0xe9   : > { %v1034_v12 = vor.u32 %v1032_v53, %v4016_v33  ;;  %v1026_v47 = vsel %vm3603_vm0, %v1018_v20, %v1025_v9  ;;  %v838_v13 = vrot.slane %v836_v56, 4  ;;  %v1355_v48 = vrot.slane %v1353_v4, 3  ;;  %1919 = vmatpush.bf16.msra.mxu3 %v2936_v35  ;;  %v4059_v4 = vld [vmem:[#allocation2 + $0x14] sm:$0xf] }
  0xea   : > { %911 = vmatmul.bf16.gmra.mxu2 %v831_v19  ;;  %v1139_v19 = vunpack.c.l.b16 %v1104_v63  ;;  %v1358_v18 = vrot.slane %v1356_v38, 4  ;;  %v1320_v59 = vunpack.c.l.b16 %v1285_v60  ;;  %v1079_v46 = vunpack.c.l.b16 %v1026_v47 }
  0xeb   : > { %1435 = vmatmul.bf16.gmra.mxu0 %v1351_v36  ;;  %v1035_v44 = vsel %vm3603_vm0, %v1027_v27, %v1034_v12  ;;  %v1140_v36 = vunpack.c.l.b16 %v1105_v24  ;;  %v1080_v17 = vunpack.c.h.b16 %v1026_v47  ;;  %v1594_v38 = vsel %vm3635_vm5, %v1585_v50, 0 }
  0xec   : > { %v1086_v56 = vunpack.c.l.b16 %v1035_v44  ;;  %v1087_v42 = vunpack.c.h.b16 %v1035_v44  ;;  %v1595_v29 = vsel %vm3770_vm1, %v4050_v61, 0  ;;  %2047 = vmatpush.bf16.msra.mxu0 %v2942_v55  ;;  %v839_v63 = vor.u32 %v838_v13, %v835_v32  ;;  %2229 = vmatpush.bf16.msra.mxu1 %v2951_v43 }
  0xed   : > { %1246 = vmatmul.bf16.vlgmr.msrb.gmra.mxu3 %v1161_v1  ;;  %1561 = vmatmul.bf16.gmra.mxu1 %v2894_v52  ;;  %v4055_v40 = vpack.c.b16 %v1140_v36, %v1139_v19  ;;  %v2941_v52 = vld [vmem:[%s4312_s2 + $0x1c0] sm:$0xff]  ;;  %v4079_v26 = vor.u32 %v1358_v18, %v1355_v48  ;;  %v1162_v9 = vshrl.u32 %v3924_v31, 16  ;;  %v1325_v27 = vpack.c.b16 %v1320_v59, %v1320_v59  ;;  %v2950_v1 = vld [vmem:[%s4312_s2 + $0x208] sm:$0xff]  ;;  %v2895_v59 = vld [vmem:[#allocation2 + $0x18] sm:$0xff] }
  0xee   : > { %vm4067_vm0 = vcmp.ne.s32.totalorder %v1086_v56, %v3255_v21  ;;  %vm4072_vm15 = vcmp.ne.s32.totalorder %v1087_v42, %v3258_v28  ;;  %1920 = vmatpush.bf16.msra.mxu3 %v2935_v15  ;;  %v1596_v24 = vsel %vm3839_vm11, %v4057_v16, 0  ;;  %v1597_v60 = vsel %vm3867_vm3, %v4059_v4, 0 }
  0xef   : > { %vm1083_vm13 = vcmp.ne.s32.totalorder %v1079_v46, %v3255_v21  ;;  %vm1084_vm14 = vcmp.ne.s32.totalorder %v1080_v17, %v3258_v28  ;;  %v1166_v31 = vshll.u32 %v4055_v40, 16  ;;  %v1629_v12 = vunpack.c.l.b16 %v1594_v38  ;;  %vm4098_vm6 = vmpackc.low %vm4072_vm15, %vm4067_vm0  ;;  %v2934_v17 = vld [vmem:[%s4312_s2 + $0x188] sm:$0xff] }
  0xf0   : > { %v1630_v35 = vunpack.c.l.b16 %v1595_v29  ;;  %v1164_v32 = vor.u32 %v1162_v9, %v3968_v10  ;;  %2048 = vmatpush.bf16.msra.mxu0 %v2941_v52  ;;  %vm4448_vm12 = vsmask.f32 4352  ;;  %v1631_v13 = vunpack.c.l.b16 %v1596_v24  ;;  %vm4108_vm2 = vmpackc.low %vm1084_vm14, %vm1083_vm13  ;;  %2230 = vmatpush.bf16.msra.mxu1 %v2950_v1  ;;  %v4136_v9 = vld [vmem:[#allocation2 + $0x1c] sm:$0xf]  ;;  %v2079_v24 = vld [vmem:[#allocation2 + $0x10] sm:$0xf] }
  0xf1   : > { %v840_v19 = vsel %vm4448_vm12, %v3957_v14, %v839_v63  ;;  %vm4449_vm4 = vmmov %vm4448_vm12  ;;  %v1632_v48 = vunpack.c.l.b16 %v1597_v60  ;;  %v1362_v44 = vshrl.u32 %v1325_v27, 16  ;;  %v1365_v55 = vshll.u32 %v1325_v27, 16  ;;  %v2949_v14 = vld [vmem:[%s4312_s2 + $0x200] sm:$0xff]  ;;  %v4134_v63 = vld [vmem:[#allocation2 + $0x18] sm:$0xf] }
  0xf2   : > { %v1360_v47 = vsel %vm4449_vm4, %v3959_v54, %v4079_v26  ;;  %v1107_v10 = vsel %vm4098_vm6, %v3911_v41, 0  ;;  %v1168_v54 = vrot.slane %v1166_v31, 1  ;;  %v1638_v15 = vpack.c.b16 %v1630_v35, %v1629_v12  ;;  %1921 = vmatpush.bf16.msra.mxu3 %v2934_v17  ;;  %vm4455_vm14 = vmmov %vm4448_vm12 }
  0xf3   : > { %v1036_v36 = vrot.slane %v4016_v33, 4  ;;  %v1106_v50 = vsel %vm4108_vm2, %v3902_v45, 0  ;;  %vm4452_vm4 = vsmask.f32 7424  ;;  %v4123_v42 = vpack.c.b16 %v1632_v48, %v1631_v13  ;;  %v2933_v45 = vld [vmem:[%s4312_s2 + $0x180] sm:$0xff] }
  0xf4   : > { %v1169_v56 = vsel %vm4452_vm4, %v1164_v32, %v1168_v54  ;;  %v1142_v43 = vunpack.c.l.b16 %v1107_v10  ;;  %2231 = vmatpush.bf16.msra.mxu1 %v2949_v14  ;;  %v1364_v41 = vrot.slane %v1362_v44, 3  ;;  %v1367_v46 = vrot.slane %v1365_v55, 4  ;;  %vm4456_vm12 = vmmov %vm4452_vm4 }
  0xf5   : > { %v1646_v33 = vshll.u32 %v1638_v15, 16  ;;  %v1141_v38 = vunpack.c.l.b16 %v1106_v50  ;;  %v1093_v29 = vunpack.c.l.b16 %v1036_v36  ;;  %v1094_v20 = vunpack.c.h.b16 %v1036_v36  ;;  %v2080_v50 = vld [vmem:[#allocation2 + $0x14] sm:$0xf] }
  0xf6   : > { %v1651_v53 = vshll.u32 %v4123_v42, 16  ;;  %v1368_v27 = vor.u32 %v1367_v46, %v1364_v41  ;;  %v1644_v60 = vshrl.u32 %v1638_v15, 16  ;;  %1922 = vmatpush.bf16.msra.mxu3 %v2933_v45  ;;  %v1598_v35 = vsel %vm4005_vm7, %v4134_v63, 0  ;;  %v2904_v41 = vld [vmem:[#allocation2 + $0x20] sm:$0xff] }
  0xf7   : > { %v4132_v52 = vpack.c.b16 %v1142_v43, %v1141_v38  ;;  %v1648_v1 = vrot.slane %v1646_v33, 1  ;;  %vm1097_vm0 = vcmp.ne.s32.totalorder %v1093_v29, %v3255_v21  ;;  %vm1098_vm15 = vcmp.ne.s32.totalorder %v1094_v20, %v3258_v28 }
  0xf8   : > { %v1653_v31 = vrot.slane %v1651_v53, 1  ;;  %v1599_v32 = vsel %vm4024_vm8, %v4136_v9, 0  ;;  %vm4147_vm13 = vmpackc.low %vm1098_vm15, %vm1097_vm0  ;;  %v2088_v28 = vsel %vm3770_vm1, %v2079_v24, 0  ;;  %v1369_v13 = vsel %vm4455_vm14, %v4079_v26, %v1368_v27  ;;  %v2081_v26 = vld [vmem:[#allocation2 + $0x18] sm:$0xf] }
  0xf9   : > { %v1174_v12 = vshll.u32 %v4132_v52, 16  ;;  %v1649_v48 = vor.u32 %v1648_v1, %v1644_v60  ;;  %v1170_v44 = vshrl.u32 %v4055_v40, 16  ;;  %v1633_v55 = vunpack.c.l.b16 %v1598_v35  ;;  %v4170_v1 = vld [vmem:[#allocation2 + $0x20] sm:$0xf]  ;;  %v4172_v24 = vld [vmem:[#allocation2 + $0x24] sm:$0xf]  ;;  %vm4458_vm1 = vmmov %vm4452_vm4 }
  0xfa   : > { %916 = vmatmul.bf16.gmra.mxu2 %v840_v19  ;;  %v2078_v19 = vld [vmem:[#allocation2 + $0xc] sm:$0xf]  ;;  %v1634_v10 = vunpack.c.l.b16 %v1599_v32  ;;  %v2123_v3 = vunpack.c.l.b16 %v2088_v28  ;;  %v2089_v5 = vsel %vm3839_vm11, %v2080_v50, 0  ;;  %v2090_v38 = vsel %vm3867_vm3, %v2081_v26, 0  ;;  %vm4462_vm3 = vmmov %vm4458_vm1 }
  0xfb   : > { %1440 = vmatmul.bf16.gmra.mxu0 %v1360_v47  ;;  %v930_v47 = vld [vmem:[#allocation2 + $0x24] sm:$0x1]  ;;  %v2087_v14 = vsel %vm3635_vm5, %v2078_v19, 0  ;;  %v1654_v15 = vsel %vm4456_vm12, %v1649_v48, %v1653_v31  ;;  %v1176_v36 = vrot.slane %v1174_v12, 1  ;;  %vm4457_vm5 = vmmov %vm4452_vm4  ;;  %v2124_v29 = vunpack.c.l.b16 %v2089_v5  ;;  %v1768_v19 = vld [vmem:[#allocation2 + $0x8] sm:$0x8] }
  0xfc   : > { %v2122_v43 = vunpack.c.l.b16 %v2087_v14  ;;  %v4161_v40 = vpack.c.b16 %v1634_v10, %v1633_v55  ;;  %v2125_v53 = vunpack.c.l.b16 %v2090_v38  ;;  %v1600_v34 = vsel %vm4108_vm2, %v4170_v1, 0  ;;  %v2083_v10 = vld [vmem:[#allocation2 + $0x20] sm:$0xf]  ;;  %v2921_v14 = vld [vmem:[#allocation2 + $0xc] sm:$0xff]  ;;  %vm4466_vm0 = vmmov %vm4455_vm14 }
  0xfd   : > { %1251 = vmatmul.bf16.gmra.mxu3 %v1169_v56  ;;  %1566 = vmatmul.bf16.gmra.mxu1 %v2895_v59  ;;  %v1108_v59 = vsel %vm4147_vm13, %v930_v47, 0  ;;  %v1172_v56 = vor.u32 %v1170_v44, %v1168_v54  ;;  %v1655_v54 = vshrl.u32 %v4123_v42, 16  ;;  %v1601_v42 = vsel %vm4098_vm6, %v4172_v24, 0  ;;  %vm4467_vm15 = vmmov %vm4458_vm1 }
  0xfe   : > { %v1143_v46 = vunpack.c.l.b16 %v1108_v59  ;;  %v2131_v33 = vpack.c.b16 %v2123_v3, %v2122_v43  ;;  %v1659_v20 = vshll.u32 %v4161_v40, 16  ;;  %v4174_v60 = vpack.c.b16 %v2125_v53, %v2124_v29  ;;  %vm4470_vm14 = vmmov %vm4458_vm1 }
  0xff   : > { %v1177_v17 = vsel %vm4457_vm5, %v1172_v56, %v1176_v36  ;;  %v1657_v6 = vor.u32 %v1655_v54, %v1653_v31  ;;  %v1772_v31 = vsel %vm3519_vm9, %v4057_v16, 0  ;;  %v1773_v28 = vsel %vm3541_vm10, %v4059_v4, 0  ;;  %vm4461_vm10 = vmmov %vm4458_vm1 }
 0x100   : > { %v1148_v45 = vpack.c.b16 %v1143_v46, %v1143_v46  ;;  %v2139_v27 = vshll.u32 %v2131_v33, 16  ;;  %v1661_v12 = vrot.slane %v1659_v20, 1  ;;  %v2137_v48 = vshrl.u32 %v2131_v33, 16  ;;  %vm4471_vm12 = vmmov %vm4466_vm0 }
 0x101   : > { %v2144_v44 = vshll.u32 %v4174_v60, 16  ;;  %v1635_v55 = vunpack.c.l.b16 %v1600_v34  ;;  %v1636_v59 = vunpack.c.l.b16 %v1601_v42  ;;  %vm4459_vm11 = vnez %v4343_v57  ;;  %vm4472_vm5 = vmmov %vm4458_vm1 }
 0x102   : > { %v1182_v35 = vshll.u32 %v1148_v45, 16  ;;  %v2141_v32 = vrot.slane %v2139_v27, 1  ;;  %v1662_v47 = vsel %vm4458_vm1, %v1657_v6, %v1661_v12  ;;  %v1770_v50 = vsel %vm4459_vm11, %v1768_v19, 0  ;;  %vm4475_vm11 = vmmov %vm4462_vm3 }
 0x103   : > { %vm4460_vm9 = vnez %v4347_v62  ;;  %v1807_v4 = vunpack.c.l.b16 %v1772_v31  ;;  %v1808_v3 = vunpack.c.l.b16 %v1773_v28  ;;  %v2092_v56 = vsel %vm4024_vm8, %v2083_v10, 0  ;;  %v2922_v28 = vld [vmem:[#allocation2 + $0x14] sm:$0xff]  ;;  %v2084_v10 = vld [vmem:[#allocation2 + $0x24] sm:$0xf] }
 0x104   : > { %v1771_v51 = vsel %vm4460_vm9, %v4050_v61, 0  ;;  %v2142_v49 = vor.u32 %v2141_v32, %v2137_v48  ;;  %v2146_v26 = vrot.slane %v2144_v44, 1  ;;  %v1805_v43 = vunpack.c.l.b16 %v1770_v50  ;;  %vm4476_vm9 = vmmov %vm4466_vm0 }
 0x105   : > { %v1641_v46 = vpack.c.b16 %v1636_v59, %v1635_v55  ;;  %v2127_v5 = vunpack.c.l.b16 %v2092_v56  ;;  %v1663_v20 = vshrl.u32 %v4161_v40, 16  ;;  %v1602_v42 = vsel %vm4147_vm13, %v1593_v58, 0 }
 0x106   : > { %v2147_v61 = vsel %vm4462_vm3, %v2142_v49, %v2146_v26  ;;  %vm4464_vm8 = vnez %v4389_v37  ;;  %vm4465_vm4 = vnez %v4395_v2  ;;  %v2148_v44 = vshrl.u32 %v4174_v60, 16 }
 0x107   : > { %v1667_v38 = vshll.u32 %v1641_v46, 16  ;;  %v1665_v32 = vor.u32 %v1663_v20, %v1661_v12  ;;  %v1774_v40 = vsel %vm4464_vm8, %v4134_v63, 0  ;;  %v1637_v55 = vunpack.c.l.b16 %v1602_v42 }
 0x108   : > { %v2150_v59 = vor.u32 %v2148_v44, %v2146_v26  ;;  %v1809_v50 = vunpack.c.l.b16 %v1774_v40  ;;  %v2093_v37 = vsel %vm4108_vm2, %v2084_v10, 0  ;;  %vm4468_vm2 = vnez %v4397_v11 }
 0x109   : > { %v1669_v27 = vrot.slane %v1667_v38, 1  ;;  %v1642_v60 = vpack.c.b16 %v1637_v55, %v1637_v55  ;;  %v2128_v49 = vunpack.c.l.b16 %v2093_v37  ;;  %v1776_v30 = vsel %vm4468_vm2, %v4170_v1, 0 }
 0x10a   : > { %1739 = vmatmul.bf16.vlgmr.msra.gmra.mxu2 %v1654_v15  ;;  %v1184_v15 = vrot.slane %v1182_v35, 1 }
 0x10b   : > { %1445 = vmatmul.bf16.gmra.mxu0 %v1369_v13  ;;  %v1178_v13 = vshrl.u32 %v4132_v52, 16  ;;  %v2082_v52 = vld [vmem:[#allocation2 + $0x1c] sm:$0xf] }
 0x10c   : > { %v2091_v57 = vsel %vm4005_vm7, %v2082_v52, 0  ;;  %vm4463_vm7 = vmmov %vm4458_vm1  ;;  %v1675_v52 = vshll.u32 %v1642_v60, 16 }
 0x10d   : > { %1256 = vmatmul.bf16.gmra.mxu3 %v1177_v17  ;;  %1571 = vmatmul.bf16.gmra.mxu1 %v2904_v41  ;;  %v1180_v16 = vor.u32 %v1178_v13, %v1176_v36  ;;  %v1806_v41 = vunpack.c.l.b16 %v1771_v51  ;;  %v1815_v36 = vpack.c.b16 %v1808_v3, %v1807_v4  ;;  %v2126_v33 = vunpack.c.l.b16 %v2091_v57  ;;  %vm4474_vm1 = vmmov %vm4466_vm0 }
 0x10e   : > { %v1670_v31 = vsel %vm4463_vm7, %v1665_v32, %v1669_v27  ;;  %v1775_v13 = vsel %vm4465_vm4, %v4136_v9, 0  ;;  %v1671_v3 = vshrl.u32 %v1641_v46, 16  ;;  %v2923_v46 = vld [vmem:[#allocation2 + $0x1c] sm:$0xff] }
 0x10f   : > { %v1185_v62 = vsel %vm4461_vm10, %v1180_v16, %v1184_v15  ;;  %v1814_v17 = vpack.c.b16 %v1806_v41, %v1805_v43  ;;  %v1828_v25 = vshrl.u32 %v1815_v36, 16  ;;  %v1831_v29 = vshll.u32 %v1815_v36, 16 }
 0x110   : > { %v2133_v54 = vpack.c.b16 %v2127_v5, %v2126_v33  ;;  %v1810_v51 = vunpack.c.l.b16 %v1775_v13  ;;  %v1673_v18 = vor.u32 %v1671_v3, %v1669_v27  ;;  %v1677_v41 = vrot.slane %v1675_v52, 1 }
 0x111   : > { %v1820_v45 = vshrl.u32 %v1814_v17, 16  ;;  %v1823_v53 = vshll.u32 %v1814_v17, 16  ;;  %v1830_v6 = vrot.slane %v1828_v25, 3  ;;  %v1833_v35 = vrot.slane %v1831_v29, 4  ;;  %v2086_v17 = vld [vmem:[#allocation2 + $0x2c] sm:$0x1] }
 0x112   : > { %v2152_v34 = vshll.u32 %v2133_v54, 16  ;;  %v1816_v16 = vpack.c.b16 %v1810_v51, %v1809_v50  ;;  %v2156_v36 = vshrl.u32 %v2133_v54, 16  ;;  %v1678_v33 = vsel %vm4470_vm14, %v1673_v18, %v1677_v41 }
 0x113   : > { %v1822_v19 = vrot.slane %v1820_v45, 3  ;;  %v1834_v48 = vor.u32 %v1833_v35, %v1830_v6  ;;  %v1811_v25 = vunpack.c.l.b16 %v1776_v30  ;;  %v2095_v11 = vsel %vm4147_vm13, %v2086_v17, 0 }
 0x114   : > { %v2154_v12 = vrot.slane %v2152_v34, 1  ;;  %v1837_v56 = vshrl.u32 %v1816_v16, 16  ;;  %v1840_v26 = vshll.u32 %v1816_v16, 16  ;;  %v1769_v34 = vld [vmem:[#allocation2 + $0x28] sm:$0xf]  ;;  %vm4473_vm13 = vnez %v4427_v39 }
 0x116   : > { %v2155_v9 = vsel %vm4467_vm15, %v2150_v59, %v2154_v12  ;;  %v2158_v38 = vor.u32 %v2156_v36, %v2154_v12 }
 0x11a   : > { %1744 = vmatmul.bf16.gmra.mxu2 %v1662_v47  ;;  %v1825_v47 = vrot.slane %v1823_v53, 4  ;;  %v2130_v53 = vunpack.c.l.b16 %v2095_v11 }
 0x11b   : > { %2049 = vmatmul.bf16.vlgmr.msra.gmra.mxu0 %v2921_v14  ;;  %v2085_v14 = vld [vmem:[#allocation2 + $0x28] sm:$0xf] }
 0x11c   : > { %v1826_v15 = vor.u32 %v1825_v47, %v1822_v19  ;;  %v2094_v2 = vsel %vm4098_vm6, %v2085_v14, 0  ;;  %vm4469_vm6 = vnez %v4403_v0  ;;  %v2135_v6 = vpack.c.b16 %v2130_v53, %v2130_v53 }
 0x11d   : > { %1261 = vmatmul.bf16.gmra.mxu3 %v1185_v62  ;;  %2232 = vmatmul.bf16.vlgmr.msra.gmra.mxu1 %v2147_v61  ;;  %v2129_v4 = vunpack.c.l.b16 %v2094_v2  ;;  %v1777_v57 = vsel %vm4469_vm6, %v4172_v24, 0  ;;  %v1839_v62 = vrot.slane %v1837_v56, 3  ;;  %v1842_v61 = vrot.slane %v1840_v26, 4 }
 0x11e   : > { %v1835_v63 = vsel %vm4466_vm0, %v1826_v15, %v1834_v48  ;;  %v1812_v29 = vunpack.c.l.b16 %v1777_v57  ;;  %v2168_v19 = vshll.u32 %v2135_v6, 16  ;;  %v1778_v47 = vsel %vm4473_vm13, %v1769_v34, 0 }
 0x11f   : > { %v2134_v43 = vpack.c.b16 %v2129_v4, %v2128_v49  ;;  %v1843_v20 = vor.u32 %v1842_v61, %v1839_v62 }
 0x120   : > { %v1817_v45 = vpack.c.b16 %v1812_v29, %v1811_v25  ;;  %v2170_v13 = vrot.slane %v2168_v19, 1 }
 0x121   : > { %v2160_v5 = vshll.u32 %v2134_v43, 16  ;;  %v1844_v24 = vsel %vm4471_vm12, %v1834_v48, %v1843_v20  ;;  %v2164_v42 = vshrl.u32 %v2134_v43, 16  ;;  %v1813_v48 = vunpack.c.l.b16 %v1778_v47 }
 0x122   : > { %v1846_v58 = vshrl.u32 %v1817_v45, 16  ;;  %v1849_v27 = vshll.u32 %v1817_v45, 16 }
 0x123   : > { %v2162_v0 = vrot.slane %v2160_v5, 1  ;;  %v1818_v15 = vpack.c.b16 %v1813_v48, %v1813_v48 }
 0x124   : > { %v1848_v32 = vrot.slane %v1846_v58, 3  ;;  %v1851_v21 = vrot.slane %v1849_v27, 4 }
 0x125   : > { %v2163_v54 = vsel %vm4472_vm5, %v2158_v38, %v2162_v0  ;;  %v2166_v40 = vor.u32 %v2164_v42, %v2162_v0  ;;  %v1855_v50 = vshrl.u32 %v1818_v15, 16  ;;  %v1858_v39 = vshll.u32 %v1818_v15, 16 }
 0x127   : > { %v2171_v14 = vsel %vm4475_vm11, %v2166_v40, %v2170_v13  ;;  %v1857_v2 = vrot.slane %v1855_v50, 3 }
 0x12a   : > { %1749 = vmatmul.bf16.gmra.mxu2 %v1670_v31  ;;  %v2932_v31 = vld [vmem:[#allocation2 + $0x24] sm:$0xff] }
 0x12b   : > { %2054 = vmatmul.bf16.gmra.mxu0 %v2922_v28  ;;  %v1852_v28 = vor.u32 %v1851_v21, %v1848_v32 }
 0x12d   : > { %1923 = vmatmul.bf16.vlgmr.msra.gmra.mxu3 %v1835_v63  ;;  %2237 = vmatmul.bf16.gmra.mxu1 %v2155_v9  ;;  %v1853_v10 = vsel %vm4474_vm1, %v1843_v20, %v1852_v28  ;;  %v1860_v63 = vrot.slane %v1858_v39, 4 }
 0x12f   : > { %v1861_v16 = vor.u32 %v1860_v63, %v1857_v2 }
 0x131   : > { %v1862_v3 = vsel %vm4476_vm9, %v1852_v28, %v1861_v16 }
 0x13a   : > { %1754 = vmatmul.bf16.gmra.mxu2 %v1678_v33  ;;  %v753_v1 = vpop.f32.mrf.mxu1 }
 0x13b   : > { %2059 = vmatmul.bf16.gmra.mxu0 %v2923_v46 }
 0x13d   : > { %1928 = vmatmul.bf16.gmra.mxu3 %v1844_v24  ;;  %2242 = vmatmul.bf16.gmra.mxu1 %v2163_v54 }
 0x142   : > { %v4230_v35 = vpop.f32.mrf.mxu1 }
 0x14a   : > { %v758_v44 = vpop.f32.mrf.mxu1 }
 0x14b   : > { %2064 = vmatmul.bf16.gmra.mxu0 %v2932_v31 }
 0x14d   : > { %v902_v12 = vpop.f32.mrf.mxu2  ;;  %1933 = vmatmul.bf16.gmra.mxu3 %v1853_v10  ;;  %2247 = vmatmul.bf16.gmra.mxu1 %v2171_v14 }
 0x14e   : > { %v903_v55 = vadd.f32 %v902_v12, %v753_v1 }
 0x150   : > { %v763_v59 = vpop.f32.mrf.mxu3 }
 0x152   : > { %v4236_v51 = vpop.f32.mrf.mxu1 }
 0x155   : > { %v904_v37 = vpop.f32.mrf.mxu2 }
 0x156   : > { %v905_v39 = vadd.f32 %v904_v37, %v4230_v35 }
 0x158   : > { %v1431_v9 = vpop.f32.mrf.mxu0  ;;  %v4238_v60 = vpop.f32.mrf.mxu3 }
 0x15a   : > { %v1557_v49 = vpop.f32.mrf.mxu1 }
 0x15d   : > { %v907_v4 = vpop.f32.mrf.mxu2  ;;  %1938 = vmatmul.bf16.gmra.mxu3 %v1862_v3 }
 0x15e   : > { %v908_v52 = vadd.f32 %v907_v4, %v758_v44 }
 0x160   : > { %v1433_v56 = vpop.f32.mrf.mxu0  ;;  %v768_v26 = vpop.f32.mrf.mxu3 }
 0x162   : > { %v1559_v43 = vpop.f32.mrf.mxu1 }
 0x165   : > { %v909_v18 = vpop.f32.mrf.mxu2 }
 0x168   : > { %v1436_v41 = vpop.f32.mrf.mxu0  ;;  %v4241_v30 = vpop.f32.mrf.mxu3 }
 0x16a   : > { %v1562_v57 = vpop.f32.mrf.mxu1 }
 0x16d   : > { %v912_v62 = vpop.f32.mrf.mxu2 }
 0x16e   : > { %v913_v61 = vadd.f32 %v912_v62, %v763_v59 }
 0x170   : > { %v1247_v36 = vpop.f32.mrf.mxu3  ;;  %v4243_v17 = vpop.f32.mrf.mxu0 }
 0x171   : > { %v1267_v5 = vadd.f32 %v1247_v36, %v903_v55 }
 0x172   : > { %v4247_v38 = vpop.f32.mrf.mxu1 }
 0x173   : > { %v1451_v46 = vadd.f32 %v1431_v9, %v1267_v5 }
 0x175   : > { %v4245_v33 = vpop.f32.mrf.mxu2  ;;  %v1577_v25 = vadd.f32 %v1557_v49, %v1451_v46 }
 0x178   : > { %v1249_v29 = vpop.f32.mrf.mxu3  ;;  %v1441_v11 = vpop.f32.mrf.mxu0 }
 0x179   : > { %v1268_v2 = vadd.f32 %v1249_v29, %v905_v39 }
 0x17a   : > { %v1567_v0 = vpop.f32.mrf.mxu1 }
 0x17b   : > { %v1452_v4 = vadd.f32 %v1433_v56, %v1268_v2 }
 0x17d   : > { %v917_v1 = vpop.f32.mrf.mxu2 }
 0x17e   : > { %v918_v20 = vadd.f32 %v917_v1, %v768_v26 }
 0x180   : > { %v1252_v24 = vpop.f32.mrf.mxu3  ;;  %v4249_v58 = vpop.f32.mrf.mxu0 }
 0x181   : > { %v1269_v54 = vadd.f32 %v1252_v24, %v908_v52 }
 0x182   : > { %v4251_v27 = vpop.f32.mrf.mxu1 }
 0x183   : > { %v1453_v45 = vadd.f32 %v1436_v41, %v1269_v54  ;;  %v1578_v41 = vadd.f32 %v1559_v43, %v1452_v4 }
 0x185   : > { %v1579_v53 = vadd.f32 %v1562_v57, %v1453_v45  ;;  %v4253_v47 = vpop.f32.mrf.mxu2 }
 0x188   : > { %v1254_v6 = vpop.f32.mrf.mxu3  ;;  %v1446_v34 = vpop.f32.mrf.mxu0 }
 0x18a   : > { %v1572_v42 = vpop.f32.mrf.mxu1 }
 0x18d   : > { %v1740_v48 = vpop.f32.mrf.mxu2 }
 0x18e   : > { %v1760_v9 = vadd.f32 %v1740_v48, %v1577_v25 }
 0x190   : > { %v1257_v32 = vpop.f32.mrf.mxu3  ;;  %v4257_v40 = vpop.f32.mrf.mxu0 }
 0x191   : > { %v1271_v21 = vadd.f32 %v1257_v32, %v913_v61  ;;  %v4477_v32 = vunpack.c.l.bf16 %v3117_v7 }
 0x192   : > { %v4259_v13 = vpop.f32.mrf.mxu1 }
 0x193   : > { %v1455_v19 = vadd.f32 %v1441_v11, %v1271_v21  ;;  %v910_v11 = vadd.f32 %v909_v18, %v4236_v51  ;;  %v4478_v51 = vunpack.c.h.bf16 %v3117_v7  ;;  %v915_v7 = vadd.f32 %v4245_v33, %v4238_v60 }
 0x194   : > { %v4480_v33 = vunpack.c.h.bf16 %v3144_v22 }
 0x195   : > { %v4255_v31 = vadd.f32 %v1567_v0, %v1455_v19  ;;  %v1742_v59 = vpop.f32.mrf.mxu2  ;;  %v1270_v25 = vadd.f32 %v1254_v6, %v910_v11 }
 0x196   : > { %v1761_v57 = vadd.f32 %v1742_v59, %v1578_v41  ;;  %v4479_v41 = vunpack.c.l.bf16 %v3144_v22 }
 0x197   : > { %v1454_v43 = vadd.f32 %v4243_v17, %v1270_v25 }
 0x198   : > { %v1259_v28 = vpop.f32.mrf.mxu3  ;;  %v2050_v10 = vpop.f32.mrf.mxu0 }
 0x199   : > { %v1580_v17 = vadd.f32 %v4247_v38, %v1454_v43  ;;  %v1272_v39 = vadd.f32 %v1259_v28, %v915_v7 }
 0x19a   : > { %v2233_v14 = vpop.f32.mrf.mxu1 }
 0x19d   : > { %v1745_v52 = vpop.f32.mrf.mxu2 }
 0x1a0   : > { %v1262_v44 = vpop.f32.mrf.mxu3  ;;  %v2052_v63 = vpop.f32.mrf.mxu0 }
 0x1a1   : > { %v1273_v12 = vadd.f32 %v1262_v44, %v918_v20  ;;  %v1762_v20 = vadd.f32 %v1745_v52, %v1579_v53 }
 0x1a2   : > { %v2235_v16 = vpop.f32.mrf.mxu1 }
 0x1a3   : > { %v1457_v55 = vadd.f32 %v1446_v34, %v1273_v12 }
 0x1a5   : > { %v4261_v15 = vadd.f32 %v1572_v42, %v1457_v55  ;;  %v1747_v37 = vpop.f32.mrf.mxu2 }
 0x1a6   : > { %v1763_v48 = vadd.f32 %v1747_v37, %v1580_v17 }
 0x1a8   : > { %v4263_v50 = vpop.f32.mrf.mxu3  ;;  %v2055_v61 = vpop.f32.mrf.mxu0 }
 0x1aa   : > { %v2238_v46 = vpop.f32.mrf.mxu1 }
 0x1ad   : > { %v1750_v19 = vpop.f32.mrf.mxu2 }
 0x1b0   : > { %v1924_v49 = vpop.f32.mrf.mxu3  ;;  %v2057_v34 = vpop.f32.mrf.mxu0 }
 0x1b1   : > { %v1944_v3 = vadd.f32 %v1924_v49, %v1760_v9  ;;  %v1764_v9 = vadd.f32 %v1750_v19, %v4255_v31 }
 0x1b2   : > { %v2240_v53 = vpop.f32.mrf.mxu1 }
 0x1b3   : > { %v2070_v26 = vadd.f32 %v2050_v10, %v1944_v3  ;;  %v1456_v3 = vadd.f32 %v4249_v58, %v1272_v39 }
 0x1b5   : > { %v2253_v62 = vadd.f32 %v2233_v14, %v2070_v26  ;;  %v1752_v49 = vpop.f32.mrf.mxu2 }
 0x1b7   : > { %v2261_v1 = vpack.c.bf16 %v2253_v62, %v2253_v62  ;;  %v1582_v62 = vadd.f32 %v4251_v27, %v1456_v3 }
 0x1b8   : > { %v1926_v36 = vpop.f32.mrf.mxu3  ;;  %v2060_v59 = vpop.f32.mrf.mxu0 }
 0x1b9   : > { %v1945_v5 = vadd.f32 %v1926_v36, %v1761_v57  ;;  %v2269_v56 = vunpack.c.l.bf16 %v2261_v1  ;;  %v1765_v31 = vadd.f32 %v1752_v49, %v1582_v62 }
 0x1bb   : > { %v2071_v35 = vadd.f32 %v2052_v63, %v1945_v5  ;;  %v2277_v21 = vadd.f32 %v4477_v32, %v2269_v56  ;;  %v2243_v63 = vpop.f32.mrf.mxu1  ;;  %v4481_v32 = vunpack.c.l.bf16 %v3120_v8 }
 0x1bd   : > { %v2254_v29 = vadd.f32 %v2235_v16, %v2071_v35  ;;  %v1755_v58 = vpop.f32.mrf.mxu2  ;;  %v920_v35 = vadd.f32 %v4253_v47, %v4241_v30  ;;  %v4482_v47 = vunpack.c.h.bf16 %v3120_v8 }
 0x1bf   : > { %v2262_v0 = vpack.c.bf16 %v2254_v29, %v2254_v29  ;;  %v1274_v22 = vadd.f32 %v4263_v50, %v920_v35 }
 0x1c0   : > { %v1929_v24 = vpop.f32.mrf.mxu3  ;;  %v2062_v36 = vpop.f32.mrf.mxu0 }
 0x1c1   : > { %v2270_v54 = vunpack.c.l.bf16 %v2262_v0  ;;  %v1946_v45 = vadd.f32 %v1929_v24, %v1762_v20  ;;  %v1766_v20 = vadd.f32 %v1755_v58, %v4261_v15  ;;  %v1458_v43 = vadd.f32 %v4257_v40, %v1274_v22 }
 0x1c3   : > { %v2278_v18 = vadd.f32 %v4478_v51, %v2270_v54  ;;  %v2072_v42 = vadd.f32 %v2055_v61, %v1946_v45  ;;  %v1584_v15 = vadd.f32 %v4259_v13, %v1458_v43  ;;  %v4484_v13 = vunpack.c.h.bf16 %v3147_v23 }
 0x1c5   : > { %v2996_v6 = vpack.c.bf16 %v2278_v18, %v2277_v21  ;;  %v2255_v44 = vadd.f32 %v2238_v46, %v2072_v42  ;;  %v2245_v46 = vpop.f32.mrf.mxu1  ;;  %v1757_v51 = vpop.f32.mrf.mxu2 }
 0x1c6   : > { %v1767_v42 = vadd.f32 %v1757_v51, %v1584_v15 }
 0x1c7   : > { %2997 = vst [vmem:[%s4277_s9] sm:$0xff] %v2996_v6   ;;  %v2263_v10 = vpack.c.bf16 %v2255_v44, %v2255_v44 }
 0x1c8   : > { %v1931_v12 = vpop.f32.mrf.mxu3  ;;  %v2065_v0 = vpop.f32.mrf.mxu0 }
 0x1c9   : > { %v1947_v55 = vadd.f32 %v1931_v12, %v1763_v48  ;;  %v2271_v38 = vunpack.c.l.bf16 %v2263_v10  ;;  %v4483_v10 = vunpack.c.l.bf16 %v3147_v23 }
 0x1cb   : > { %v2073_v14 = vadd.f32 %v2057_v34, %v1947_v55  ;;  %v2279_v60 = vadd.f32 %v4479_v41, %v2271_v38 }
 0x1cd   : > { %v2256_v2 = vadd.f32 %v2240_v53, %v2073_v14  ;;  %v2248_v34 = vpop.f32.mrf.mxu1 }
 0x1cf   : > { %v2264_v16 = vpack.c.bf16 %v2256_v2, %v2256_v2 }
 0x1d0   : > { %v1934_v4 = vpop.f32.mrf.mxu3  ;;  %v2067_v6 = vpop.f32.mrf.mxu0 }
 0x1d1   : > { %v2272_v52 = vunpack.c.l.bf16 %v2264_v16  ;;  %v1948_v26 = vadd.f32 %v1934_v4, %v1764_v9 }
 0x1d3   : > { %v2280_v57 = vadd.f32 %v4480_v33, %v2272_v52  ;;  %v2074_v28 = vadd.f32 %v2060_v59, %v1948_v26 }
 0x1d5   : > { %v3001_v61 = vpack.c.bf16 %v2280_v57, %v2279_v60  ;;  %v2257_v5 = vadd.f32 %v2243_v63, %v2074_v28  ;;  %v2250_v44 = vpop.f32.mrf.mxu1 }
 0x1d7   : > { %3020 = vst [vmem:[%s4277_s9 + $0x8] sm:$0xff] %v3001_v61   ;;  %v2265_v37 = vpack.c.bf16 %v2257_v5, %v2257_v5 }
 0x1d8   : > { %v1936_v11 = vpop.f32.mrf.mxu3 }
 0x1d9   : > { %v1949_v1 = vadd.f32 %v1936_v11, %v1765_v31  ;;  %v2273_v27 = vunpack.c.l.bf16 %v2265_v37 }
 0x1db   : > { %v2075_v25 = vadd.f32 %v2062_v36, %v1949_v1  ;;  %v2281_v30 = vadd.f32 %v4481_v32, %v2273_v27 }
 0x1dd   : > { %v2258_v29 = vadd.f32 %v2245_v46, %v2075_v25 }
 0x1df   : > { %v2266_v56 = vpack.c.bf16 %v2258_v29, %v2258_v29 }
 0x1e0   : > { %v1939_v24 = vpop.f32.mrf.mxu3 }
 0x1e1   : > { %v2274_v54 = vunpack.c.l.bf16 %v2266_v56  ;;  %v1950_v45 = vadd.f32 %v1939_v24, %v1766_v20 }
 0x1e3   : > { %v2282_v21 = vadd.f32 %v4482_v47, %v2274_v54  ;;  %v2076_v50 = vadd.f32 %v2065_v0, %v1950_v45 }
 0x1e5   : > { %v3006_v18 = vpack.c.bf16 %v2282_v21, %v2281_v30  ;;  %v2259_v53 = vadd.f32 %v2248_v34, %v2076_v50 }
 0x1e7   : > { %3021 = vst [vmem:[%s4277_s9 + $0x10] sm:$0xff] %v3006_v18   ;;  %v2267_v19 = vpack.c.bf16 %v2259_v53, %v2259_v53 }
 0x1e8   : > { %v1941_v17 = vpop.f32.mrf.mxu3 }
 0x1e9   : > { %v1951_v40 = vadd.f32 %v1941_v17, %v1767_v42  ;;  %v2275_v55 = vunpack.c.l.bf16 %v2267_v19 }
 0x1eb   : > { %v2077_v48 = vadd.f32 %v2067_v6, %v1951_v40  ;;  %v2283_v14 = vadd.f32 %v4483_v10, %v2275_v55 }
 0x1ed   : > { %v2260_v12 = vadd.f32 %v2250_v44, %v2077_v48 }
 0x1ef   : > { %v2268_v7 = vpack.c.bf16 %v2260_v12, %v2260_v12 }
 0x1f1   : > { %v2276_v8 = vunpack.c.l.bf16 %v2268_v7 }
 0x1f3   : > { %v2284_v59 = vadd.f32 %v4484_v13, %v2276_v8 }
 0x1f5   : > { %v3011_v39 = vpack.c.bf16 %v2284_v59, %v2283_v14 }
 0x1f7   : > { %3022 = vst [vmem:[%s4277_s9 + $0x18] sm:$0xff] %v3011_v39  }
 0x1f8 PF: > { %s13_s12 = sadd.s32 1, %s3054_s12  }
 0x1f9   : > { %p10_p4 = scmp.ge.s32.totalorder %s13_s12, 4  }
 0x1fb   :  { %12 = sbr.rel (!%p10_p4) target bundleno = 1 (0x1), region = 70 }

// kernel: _lambda_.11
= control target key start
LH: loop header
LB: loop body
LE: loop exit
PB: predicated region body
PF: predicated region fallthrough
CT: control target
= control target key end

     0   :  { %s2070_s12 = smov 0   ;;  %s2735_s0 = inlined_call_operand.vmem [shape: bf16[2,16,128], index: 0, kind: input, shape index: {}, may-alias: {0,3}]   ;;  %s2736_s1 = inlined_call_operand.vmem [shape: bf16[128,128], index: 1, kind: input, shape index: {}]   ;;  %s2737_s2 = inlined_call_operand.vmem [shape: bf16[9,128,128], index: 2, kind: input, shape index: {}]   ;;  %s2738_s3 = inlined_call_operand.vmem [shape: bf16[2,16,128], index: 3, kind: output, shape index: {}, may-alias: {0,3}]  }
   0x1 LB: > { %s1471_s13 = sadd.s32 4294967295, %s2047_s12   ;;  %p1475_p0 = scmp.ge.s32.totalorder %s2047_s12, 1  ;;  %s2047_s12 = sphi %s2070_s12, %s13_s12  }
   0x2   : > { %p137_p1 = scmp.lt.s32.totalorder %s2047_s12, 3 }
   0x4   : > { %p138_p2 = pnand %p1475_p0, %p137_p1 }
   0x5   : > { %p161_p3 = scmp.lt.s32.totalorder (!%p138_p2), %s1471_s13, 1 }
   0x6   : > { %141 = sbr.rel (%p138_p2) target bundleno = 375 (0x177), region = 32 }
   0xb   : > { %v1943_v0 = vld [vmem:[%s2736_s1 + $0x38] sm:$0xff]  ;;  %v1942_v1 = vld [vmem:[%s2736_s1 + $0x30] sm:$0xff]  ;;  %v1941_v6 = vld [vmem:[%s2736_s1 + $0x28] sm:$0xff]  ;;  %s2814_s13 = smov (!%p161_p3, %s1471_s13), 1  ;;  %v269_v32 = vlaneseq  ;;  %v2049_v50 = vmov 0  }
   0xc   : > { %245 = vmatpush.bf16.msra.mxu0 %v1943_v0  ;;  %v1959_v2 = vld [vmem:[%s2737_s2 + $0x78] sm:$0xff]  ;;  %v1958_v3 = vld [vmem:[%s2737_s2 + $0x70] sm:$0xff]  ;;  %v1957_v9 = vld [vmem:[%s2737_s2 + $0x68] sm:$0xff]  ;;  %s1934_s15 = sshll.u32 %s2814_s13, 3  ;;  %262 = vst [vmem:[#allocation2 + $0x4] sm:$0xf] %v2049_v50 }
   0xd   : > { %452 = vmatpush.bf16.msra.mxu1 %v1959_v2  ;;  %v1951_v4 = vld [vmem:[%s2737_s2 + $0x38] sm:$0xff]  ;;  %v1950_v7 = vld [vmem:[%s2737_s2 + $0x30] sm:$0xff]  ;;  %v1940_v10 = vld [vmem:[%s2736_s1 + $0x20] sm:$0xff]  ;;  %s165_s22 = scalar_lea.vmem %s2735_s0, %s1934_s15  ;;  %v270_v36 = vshrl.u32 %v269_v32, 7  ;;  %263 = vst [vmem:[#allocation2 + $0x10] sm:$0xf] %v2049_v50  ;;  %s170_s8 = scalar_lea.vmem %s2738_s3, %s1934_s15 }
   0xe   : > { %v1967_v5 = vld [vmem:[%s2737_s2 + $0xb8] sm:$0xff]  ;;  %541 = vmatpush.bf16.msra.mxu2 %v1951_v4  ;;  %v1966_v8 = vld [vmem:[%s2737_s2 + $0xb0] sm:$0xff]  ;;  %v1949_v11 = vld [vmem:[%s2737_s2 + $0x28] sm:$0xff]  ;;  %vm311_vm8 = vsmask.f32 1280 }
   0xf   : > { %702 = vmatpush.bf16.msra.mxu3 %v1967_v5  ;;  %v1965_v12 = vld [vmem:[%s2737_s2 + $0xa8] sm:$0xff]  ;;  %v1956_v13 = vld [vmem:[%s2737_s2 + $0x60] sm:$0xff]  ;;  %v1939_v14 = vld [vmem:[%s2736_s1 + $0x18] sm:$0xff]  ;;  %v271_v41 = vadd.s32 8, %v270_v36  ;;  %v276_v42 = vand.u32 3, %v270_v36 }
  0x10   : > { %246 = vmatpush.bf16.msra.mxu0 %v1942_v1  ;;  %v1955_v15 = vld [vmem:[%s2737_s2 + $0x58] sm:$0xff]  ;;  %v1938_v16 = vld [vmem:[%s2736_s1 + $0x10] sm:$0xff]  ;;  %v2137_v17 = vld [vmem:[%s165_s22] sm:$0xff]   ;;  %vm312_vm9 = vsmask.f32 5392 }
  0x11   : > { %453 = vmatpush.bf16.msra.mxu1 %v1958_v3  ;;  %v1954_v18 = vld [vmem:[%s2737_s2 + $0x50] sm:$0xff]  ;;  %v2019_v19 = vunpack.c.l.bf16 %v2137_v17  ;;  %v2020_v20 = vunpack.c.h.bf16 %v2137_v17  ;;  %v1937_v21 = vld [vmem:[%s2736_s1 + $0x8] sm:$0xff]  ;;  %v1936_v25 = vld [vmem:[%s2736_s1] sm:$0xff]  ;;  %v283_v43 = vand.u32 3, %v271_v41  ;;  %vm2209_vm1 = vcmp.le.s32.totalorder %v276_v42, 2 }
  0x12   : > { %542 = vmatpush.bf16.msra.mxu2 %v1950_v7  ;;  %v1953_v22 = vld [vmem:[%s2737_s2 + $0x48] sm:$0xff]  ;;  %v1975_v26 = vld [vmem:[%s2737_s2 + $0xf8] sm:$0xff]  ;;  %v1952_v27 = vld [vmem:[%s2737_s2 + $0x40] sm:$0xff]  ;;  %vm2218_vm3 = vcmp.ge.s32.totalorder %v276_v42, 1  ;;  %v2346_v41 = vunpack.c.h.b16 %v2049_v50  ;;  %vm564_vm10 = vsmask.f32 2304 }
  0x13   : > { %703 = vmatpush.bf16.msra.mxu3 %v1966_v8  ;;  %v178_v23 = vmax.f32 %v2019_v19, 0.0  ;;  %v179_v24 = vmax.f32 %v2020_v20, 0.0  ;;  %v1974_v29 = vld [vmem:[%s2737_s2 + $0xf0] sm:$0xff]  ;;  %v1973_v30 = vld [vmem:[%s2737_s2 + $0xe8] sm:$0xff]  ;;  %v1983_v31 = vld [vmem:[%s2737_s2 + $0x138] sm:$0xff]  ;;  %vm2196_vm0 = vcmp.ge.s32.totalorder %v283_v43, 1 }
  0x14   : > { %247 = vmatpush.bf16.msra.mxu0 %v1941_v6  ;;  %v1948_v33 = vld [vmem:[%s2737_s2 + $0x20] sm:$0xff]  ;;  %v1982_v37 = vld [vmem:[%s2737_s2 + $0x130] sm:$0xff]  ;;  %v1947_v38 = vld [vmem:[%s2737_s2 + $0x18] sm:$0xff]  ;;  %vm2240_vm5 = vcmp.le.s32.totalorder %v283_v43, 2  ;;  %vm565_vm11 = vsmask.f32 6416 }
  0x15   : > { %454 = vmatpush.bf16.msra.mxu1 %v1957_v9  ;;  %v180_v28 = vpack.c.bf16 %v179_v24, %v178_v23  ;;  %v1964_v34 = vld [vmem:[%s2737_s2 + $0xa0] sm:$0xff]  ;;  %v1963_v39 = vld [vmem:[%s2737_s2 + $0x98] sm:$0xff]  ;;  %v1981_v44 = vld [vmem:[%s2737_s2 + $0x128] sm:$0xff] }
  0x16   : > { %543 = vmatpush.bf16.msra.mxu2 %v1949_v11  ;;  %v1972_v35 = vld [vmem:[%s2737_s2 + $0xe0] sm:$0xff]  ;;  %v1971_v40 = vld [vmem:[%s2737_s2 + $0xd8] sm:$0xff]  ;;  %v1946_v46 = vld [vmem:[%s2737_s2 + $0x10] sm:$0xff] }
  0x17   : > { %704 = vmatpush.bf16.msra.mxu3 %v1965_v12  ;;  %v1962_v47 = vld [vmem:[%s2737_s2 + $0x90] sm:$0xff]  ;;  %vm308_vm2 = vmpackc.low %vm2196_vm0, %vm2196_vm0  ;;  %v1980_v52 = vld [vmem:[%s2737_s2 + $0x120] sm:$0xff] }
  0x18   : > { %248 = vmatpush.bf16.msra.mxu0 %v1940_v10  ;;  %v1970_v48 = vld [vmem:[%s2737_s2 + $0xd0] sm:$0xff]  ;;  %v2226_v53 = vsel %vm308_vm2, 65537, %v2049_v50  ;;  %vm560_vm4 = vmpackc.low %vm2209_vm1, %vm2209_vm1  ;;  %v1945_v54 = vld [vmem:[%s2737_s2 + $0x8] sm:$0xff] }
  0x19   : > { %455 = vmatpush.bf16.msra.mxu1 %v1956_v13  ;;  %v1961_v55 = vld [vmem:[%s2737_s2 + $0x88] sm:$0xff]  ;;  %vm307_vm6 = vmpackc.low %vm2218_vm3, %vm2218_vm3  ;;  %v1979_v58 = vld [vmem:[%s2737_s2 + $0x118] sm:$0xff]  ;;  %v324_v61 = vshrl.u32 %v2226_v53, 16  ;;  %v327_v62 = vshll.u32 %v2226_v53, 16  ;;  %v2292_v7 = vsel %vm560_vm4, 65537, %v2049_v50 }
  0x1a   : > { %544 = vmatpush.bf16.msra.mxu2 %v1948_v33  ;;  %v1969_v56 = vld [vmem:[%s2737_s2 + $0xc8] sm:$0xff]  ;;  %v1944_v59 = vld [vmem:[%s2737_s2] sm:$0xff]  ;;  %v1992_v0 = vld [vmem:[%s2737_s2 + $0x178] sm:$0xff]  ;;  %v309_v4 = vsel %vm307_vm6, 65537, %v2049_v50  ;;  %vm720_vm4 = vsmask.f32 3328 }
  0x1b   : > { %705 = vmatpush.bf16.msra.mxu3 %v1964_v34  ;;  %v1960_v60 = vld [vmem:[%s2737_s2 + $0x80] sm:$0xff]  ;;  %vm561_vm7 = vmpackc.low %vm2240_vm5, %vm2240_vm5  ;;  %v2000_v1 = vld [vmem:[%s2737_s2 + $0x1b8] sm:$0xff]  ;;  %v326_v5 = vrot.slane %v324_v61, 6  ;;  %v329_v6 = vrot.slane %v327_v62, 7  ;;  %v315_v12 = vshrl.u32 %v309_v4, 16  ;;  %v318_v13 = vshll.u32 %v309_v4, 16 }
  0x1c   : > { %249 = vmatpush.bf16.msra.mxu0 %v1939_v14  ;;  %v1968_v63 = vld [vmem:[%s2737_s2 + $0xc0] sm:$0xff]  ;;  %v2008_v2 = vld [vmem:[%s2737_s2 + $0x1f8] sm:$0xff]  ;;  %v1978_v3 = vld [vmem:[%s2737_s2 + $0x110] sm:$0xff]  ;;  %v2295_v8 = vsel %vm561_vm7, 65537, %v2049_v50  ;;  %vm721_vm5 = vsmask.f32 7440 }
  0x1d   : > { %456 = vmatpush.bf16.msra.mxu1 %v1955_v15  ;;  %v1991_v9 = vld [vmem:[%s2737_s2 + $0x170] sm:$0xff]  ;;  %v1977_v14 = vld [vmem:[%s2737_s2 + $0x108] sm:$0xff]  ;;  %v568_v15 = vshrl.u32 %v2292_v7, 16  ;;  %v1976_v33 = vld [vmem:[%s2737_s2 + $0x100] sm:$0xff]  ;;  %v2759_v4 = vmov 0 }
  0x1e   : > { %545 = vmatpush.bf16.msra.mxu2 %v1947_v38  ;;  %v1999_v10 = vld [vmem:[%s2737_s2 + $0x1b0] sm:$0xff]  ;;  %v1990_v23 = vld [vmem:[%s2737_s2 + $0x168] sm:$0xff]  ;;  %v1989_v36 = vld [vmem:[%s2737_s2 + $0x160] sm:$0xff] }
  0x1f   : > { %706 = vmatpush.bf16.msra.mxu3 %v1963_v39  ;;  %v2007_v11 = vld [vmem:[%s2737_s2 + $0x1f0] sm:$0xff]  ;;  %v1998_v24 = vld [vmem:[%s2737_s2 + $0x1a8] sm:$0xff]  ;;  %v2005_v38 = vld [vmem:[%s2737_s2 + $0x1e0] sm:$0xff]  ;;  %v955_v53 = vrot.slane %v568_v15, 7 }
  0x20   : > { %250 = vmatpush.bf16.msra.mxu0 %v1938_v16  ;;  %v571_v16 = vshll.u32 %v2292_v7, 16  ;;  %vm313_vm12 = vmor %vm311_vm8, %vm312_vm9  ;;  %vm952_vm8 = vsmask.f32 256  ;;  %vm953_vm9 = vsmask.f32 4368  ;;  %v1987_v7 = vld [vmem:[%s2737_s2 + $0x150] sm:$0xff] }
  0x21   : > { %457 = vmatpush.bf16.msra.mxu1 %v1954_v18  ;;  %v577_v18 = vshrl.u32 %v2295_v8, 16  ;;  %vm566_vm1 = vmor %vm564_vm10, %vm565_vm11 }
  0x22   : > { %546 = vmatpush.bf16.msra.mxu2 %v1946_v46  ;;  %v2348_v46 = vrot.slane %v318_v13, 5  ;;  %vm2402_vm10 = vmor %vm720_vm4, %vm721_vm5 }
  0x23   : > { %707 = vmatpush.bf16.msra.mxu3 %v1962_v47  ;;  %v724_v47 = vrot.slane %v315_v12, 4 }
  0x24   : > { %251 = vmatpush.bf16.msra.mxu0 %v1937_v21  ;;  %v580_v21 = vshll.u32 %v2295_v8, 16  ;;  %v2004_v8 = vld [vmem:[%s2737_s2 + $0x1d8] sm:$0xff] }
  0x25   : > { %458 = vmatpush.bf16.msra.mxu1 %v1953_v22  ;;  %v330_v22 = vor.u32 %v329_v6, %v326_v5  ;;  %v725_v57 = vor.u32 %v724_v47, %v2348_v46  ;;  %v732_v6 = vunpack.c.l.b16 %v2348_v46 }
  0x26   : > { %547 = vmatpush.bf16.msra.mxu2 %v1945_v54 }
  0x27   : > { %708 = vmatpush.bf16.msra.mxu3 %v1961_v55  ;;  %v332_v32 = vrot.slane %v330_v22, 4 }
  0x28   : > { %252 = vmatpush.bf16.msra.mxu0 %v1936_v25  ;;  %v2006_v25 = vld [vmem:[%s2737_s2 + $0x1e8] sm:$0xff] }
  0x29   : > { %459 = vmatpush.bf16.msra.mxu1 %v1952_v27  ;;  %v320_v27 = vrot.slane %v318_v13, 7  ;;  %v347_v42 = vunpack.c.l.b16 %v332_v32  ;;  %v348_v43 = vunpack.c.h.b16 %v332_v32  ;;  %v1988_v32 = vld [vmem:[%s2737_s2 + $0x158] sm:$0xff] }
  0x2a   : > { %548 = vmatpush.bf16.msra.mxu2 %v1944_v59  ;;  %v2755_v59 = vmov 0 }
  0x2b   : > { %253 = vmatmul.bf16.vlgmr.msra.gmra.mxu0 %v180_v28  ;;  %709 = vmatpush.bf16.msra.mxu3 %v1960_v60  ;;  %v570_v28 = vrot.slane %v568_v15, 5  ;;  %vm352_vm14 = vcmp.ne.s32.totalorder %v348_v43, %v2346_v41  ;;  %v727_v60 = vrot.slane %v327_v62, 5  ;;  %v726_v62 = vrot.slane %v725_v57, 4 }
  0x2c   : > { %848 = vmatpush.bf16.msrb.mxu0 %v1975_v26  ;;  %v317_v26 = vrot.slane %v315_v12, 6 }
  0x2d   : > { %933 = vmatpush.bf16.msrb.mxu1 %v1983_v31  ;;  %v582_v31 = vrot.slane %v580_v21, 6 }
  0x2e   : > { %1073 = vmatpush.bf16.msrb.mxu2 %v1992_v0  ;;  %v321_v34 = vor.u32 %v320_v27, %v317_v26  ;;  %v957_v27 = vrot.slane %v955_v53, 4  ;;  %v1985_v26 = vld [vmem:[%s2737_s2 + $0x140] sm:$0xff] }
  0x2f   : > { %1185 = vmatpush.bf16.msrb.mxu3 %v2000_v1 }
  0x30   : > { %849 = vmatpush.bf16.msrb.mxu0 %v1974_v29  ;;  %v573_v29 = vrot.slane %v571_v16, 6  ;;  %v333_v49 = vunpack.c.l.b16 %v321_v34 }
  0x31   : > { %934 = vmatpush.bf16.msrb.mxu1 %v1982_v37  ;;  %v1997_v37 = vld [vmem:[%s2737_s2 + $0x1a0] sm:$0xff] }
  0x32   : > { %1074 = vmatpush.bf16.msrb.mxu2 %v1991_v9  ;;  %v2396_v9 = vld [vmem:[#allocation2 + $0x4] sm:$0xc] }
  0x33   : > { %1186 = vmatpush.bf16.msrb.mxu3 %v1999_v10 }
  0x34   : > { %850 = vmatpush.bf16.msrb.mxu0 %v1973_v30  ;;  %v579_v30 = vrot.slane %v577_v18, 5 }
  0x35   : > { %935 = vmatpush.bf16.msrb.mxu1 %v1981_v44 }
  0x36   : > { %1075 = vmatpush.bf16.msrb.mxu2 %v1990_v23  ;;  %v583_v39 = vor.u32 %v582_v31, %v579_v30  ;;  %v728_v30 = vsel %vm2402_vm10, %v726_v62, %v727_v60 }
  0x37   : > { %1187 = vmatpush.bf16.msrb.mxu3 %v1998_v24 }
  0x38   : > { %851 = vmatpush.bf16.msrb.mxu0 %v1972_v35  ;;  %v574_v35 = vor.u32 %v573_v29, %v570_v28  ;;  %v394_v29 = vunpack.c.l.b16 %v2396_v9 }
  0x39   : > { %936 = vmatpush.bf16.msrb.mxu1 %v1980_v52  ;;  %v334_v52 = vunpack.c.h.b16 %v321_v34 }
  0x3a   : > { %v586_v44 = vunpack.c.l.b16 %v574_v35  ;;  %v587_v45 = vunpack.c.h.b16 %v574_v35  ;;  %1076 = vmatpush.bf16.msrb.mxu2 %v1989_v36  ;;  %v575_v54 = vrot.slane %v574_v35, 4  ;;  %v1295_v36 = vld [vmem:[#allocation2 + $0x10] sm:$0x7] }
  0x3b   : > { %1188 = vmatpush.bf16.msrb.mxu3 %v1997_v37  ;;  %vm2381_vm6 = vcmp.ne.s32.totalorder %v334_v52, %v2346_v41  ;;  %v718_v52 = vld [vmem:[#allocation2 + $0x4] sm:$0x8] }
  0x3c   : > { %852 = vmatpush.bf16.msrb.mxu0 %v1971_v40  ;;  %v2343_v40 = vunpack.c.l.b16 %v2049_v50  ;;  %v585_v50 = vrot.slane %v583_v39, 4  ;;  %vm2360_vm0 = vcmp.ne.s32.totalorder %v587_v45, %v2346_v41  ;;  %v2760_v4 = vsel %vm2381_vm6, 4294967295, %v2759_v4 }
  0x3d   : > { %937 = vmatpush.bf16.msrb.mxu1 %v1979_v58  ;;  %v2385_v5 = vsel %vm566_vm1, %v575_v54, %v583_v39  ;;  %v956_v39 = vor.u32 %v955_v53, %v571_v16  ;;  %v1995_v16 = vld [vmem:[%s2737_s2 + $0x190] sm:$0xff]  ;;  %v739_v54 = vunpack.c.l.b16 %v728_v30  ;;  %v1986_v53 = vld [vmem:[%s2737_s2 + $0x148] sm:$0xff] }
  0x3e   : > { %vm351_vm13 = vcmp.ne.s32.totalorder %v347_v42, %v2343_v40  ;;  %vm2355_vm15 = vcmp.ne.s32.totalorder %v586_v44, %v2343_v40  ;;  %vm2366_vm2 = vcmp.ne.s32.totalorder %v333_v49, %v2343_v40  ;;  %v600_v1 = vunpack.c.l.b16 %v585_v50  ;;  %1077 = vmatpush.bf16.msrb.mxu2 %v1988_v32  ;;  %v2003_v49 = vld [vmem:[%s2737_s2 + $0x1d0] sm:$0xff] }
  0x3f   : > { %v2756_v59 = vsel %vm2366_vm2, 4294967295, %v2755_v59  ;;  %vm2374_vm3 = vmpackc.low %vm352_vm14, %vm351_vm13  ;;  %vm2426_vm1 = vcmp.ne.s32.totalorder %v732_v6, %v2343_v40  ;;  %v594_v45 = vunpack.c.h.b16 %v2385_v5  ;;  %v963_v62 = vunpack.c.h.b16 %v956_v39 }
  0x40   : > { %853 = vmatpush.bf16.msrb.mxu0 %v1970_v48  ;;  %v322_v48 = vrot.slane %v321_v34, 4  ;;  %vm2740_vm7 = vmpackc.low %vm2360_vm0, %vm2355_vm15 }
  0x41   : > { %938 = vmatpush.bf16.msrb.mxu1 %v1978_v3  ;;  %v2378_v3 = vld [vmem:[#allocation2 + $0x10] sm:$0x3]  ;;  %vm2739_vm11 = vmpackc.low %vm2381_vm6, %vm2366_vm2  ;;  %v2460_v42 = vsel %vm2740_vm7, %v2396_v9, 0  ;;  %vm2534_vm7 = vcmp.ne.s32.totalorder %v739_v54, %v2343_v40 }
  0x42   : > { %v331_v58 = vsel %vm313_vm12, %v322_v48, %v330_v22  ;;  %v1093_v10 = vsel %vm2374_vm3, %v2378_v3, 0  ;;  %v593_v22 = vunpack.c.l.b16 %v2385_v5  ;;  %vm604_vm12 = vcmp.ne.s32.totalorder %v600_v1, %v2343_v40  ;;  %vm2416_vm14 = vmor %vm952_vm8, %vm953_vm9  ;;  %1078 = vmatpush.bf16.msrb.mxu2 %v1987_v7  ;;  %v2013_v48 = vld [vmem:[%s2737_s2 + $0x220] sm:$0xff] }
  0x43   : > { %v1116_v43 = vunpack.c.l.b16 %v1093_v10 }
  0x44   : > { %854 = vmatpush.bf16.msrb.mxu0 %v1969_v56  ;;  %vm2487_vm10 = vcmp.ne.s32.totalorder %v593_v22, %v2343_v40 }
  0x45   : > { %939 = vmatpush.bf16.msrb.mxu1 %v1977_v14  ;;  %v733_v14 = vunpack.c.h.b16 %v2348_v46 }
  0x46   : > { %1079 = vmatpush.bf16.msrb.mxu2 %v1986_v53 }
  0x47   : > { %vm2448_vm5 = vcmp.ne.s32.totalorder %v733_v14, %v2346_v41  ;;  %v2002_v14 = vld [vmem:[%s2737_s2 + $0x1c8] sm:$0xff] }
  0x48   : > { %855 = vmatpush.bf16.msrb.mxu0 %v1968_v63  ;;  %v729_v63 = vrot.slane %v324_v61, 4  ;;  %v958_v61 = vrot.slane %v577_v18, 7  ;;  %v341_v18 = vunpack.c.h.b16 %v331_v58 }
  0x49   : > { %940 = vmatpush.bf16.msrb.mxu1 %v1976_v33  ;;  %v1996_v33 = vld [vmem:[%s2737_s2 + $0x198] sm:$0xff] }
  0x4a   : > { %v730_v13 = vor.u32 %v729_v63, %v727_v60  ;;  %v959_v28 = vor.u32 %v958_v61, %v580_v21  ;;  %v961_v21 = vrot.slane %v958_v61, 4  ;;  %1189 = vmatpush.bf16.msrb.mxu3 %v1996_v33  ;;  %vm2475_vm9 = vcmp.ne.s32.totalorder %v341_v18, %v2346_v41  ;;  %v1994_v61 = vld [vmem:[%s2737_s2 + $0x188] sm:$0xff]  ;;  %v1993_v33 = vld [vmem:[%s2737_s2 + $0x180] sm:$0xff]  ;;  %1080 = vmatpush.bf16.msrb.mxu2 %v1985_v26 }
  0x4b   : > { %v740_v60 = vunpack.c.h.b16 %v728_v30 }
  0x4c   : > { %1279 = vmatpush.bf16.msra.mxu0 %v2008_v2  ;;  %v601_v2 = vunpack.c.h.b16 %v585_v50  ;;  %v731_v37 = vrot.slane %v730_v13, 4  ;;  %v976_v57 = vunpack.c.l.b16 %v961_v21 }
  0x4e   : > { %vm605_vm13 = vcmp.ne.s32.totalorder %v601_v2, %v2346_v41  ;;  %v746_v63 = vunpack.c.l.b16 %v731_v37  ;;  %v747_v1 = vunpack.c.h.b16 %v731_v37  ;;  %v962_v2 = vunpack.c.l.b16 %v956_v39  ;;  %1190 = vmatpush.bf16.msrb.mxu3 %v1995_v16 }
  0x4f   : > { %vm2443_vm4 = vmpackc.low %vm605_vm13, %vm604_vm12  ;;  %vm2503_vm13 = vcmp.ne.s32.totalorder %v594_v45, %v2346_v41 }
  0x50   : > { %1280 = vmatpush.bf16.msra.mxu0 %v2007_v11  ;;  %v340_v11 = vunpack.c.l.b16 %v331_v58  ;;  %v1298_v50 = vsel %vm2443_vm4, %v1295_v36, 0  ;;  %vm738_vm12 = vmpackc.low %vm2448_vm5, %vm2426_vm1  ;;  %v977_v58 = vunpack.c.h.b16 %v961_v21  ;;  %vm2555_vm2 = vcmp.ne.s32.totalorder %v747_v1, %v2346_v41 }
  0x51   : > { %v2520_v13 = vsel %vm738_vm12, %v718_v52, 0  ;;  %v2531_v18 = vunpack.c.l.b16 %v1298_v50  ;;  %vm2565_vm12 = vcmp.ne.s32.totalorder %v962_v2, %v2343_v40  ;;  %vm2576_vm5 = vcmp.ne.s32.totalorder %v963_v62, %v2346_v41 }
  0x52   : > { %vm2463_vm8 = vcmp.ne.s32.totalorder %v340_v11, %v2343_v40  ;;  %v630_v11 = vunpack.c.l.b16 %v2460_v42  ;;  %v776_v32 = vunpack.c.l.b16 %v2520_v13  ;;  %1191 = vmatpush.bf16.msrb.mxu3 %v1994_v61  ;;  %v2791_v21 = vmov 0  ;;  %v2001_v42 = vld [vmem:[%s2737_s2 + $0x1c0] sm:$0xff] }
  0x54   : > { %1281 = vmatpush.bf16.msra.mxu0 %v2006_v25  ;;  %v300_v25 = vld [vmem:[#allocation2 + $0x4] sm:$0xe] }
  0x55   : > { %v2484_v47 = vsel %vm2739_vm11, %v300_v25, 0  ;;  %vm2550_vm11 = vcmp.ne.s32.totalorder %v746_v63, %v2343_v40 }
  0x56   : > { %v469_v12 = vunpack.c.l.b16 %v2484_v47  ;;  %1192 = vmatpush.bf16.msrb.mxu3 %v1993_v33 }
  0x58   : > { %1282 = vmatpush.bf16.msra.mxu0 %v2005_v38 }
  0x5c   : > { %1283 = vmatpush.bf16.msra.mxu0 %v2004_v8  ;;  %v2789_v8 = vmov 0 }
  0x5d   : > { %v2790_v8 = vsel %vm2576_vm5, 4294967295, %v2789_v8  ;;  %vm2795_vm5 = vcmp.ne.s32.totalorder %v976_v57, %v2343_v40 }
  0x60   : > { %1284 = vmatpush.bf16.msra.mxu0 %v2003_v49 }
  0x64   : > { %1285 = vmatpush.bf16.msra.mxu0 %v2002_v14 }
  0x68   : > { %1286 = vmatpush.bf16.msra.mxu0 %v2001_v42 }
  0xa8   : > { %v254_v51 = vpop.f32.mrf.mxu0 }
  0xa9   : > { %v259_v23 = vmax.f32 %v254_v51, 0.0  ;;  %v960_v51 = vsel %vm2416_vm14, %v957_v27, %v959_v28  ;;  %vm2545_vm14 = vcmp.ne.s32.totalorder %v740_v60, %v2346_v41  ;;  %v2562_v27 = vld [vmem:[#allocation2 + $0x10] sm:$0x1]  ;;  %v2787_v28 = vmov 0  ;;  %v2016_v60 = vld [vmem:[%s2737_s2 + $0x238] sm:$0xff] }
  0xaa   : > { %v969_v6 = vunpack.c.l.b16 %v960_v51  ;;  %v970_v10 = vunpack.c.h.b16 %v960_v51  ;;  %v2788_v28 = vsel %vm2565_vm12, 4294967295, %v2787_v28 }
  0xac   : > { %vm2581_vm1 = vcmp.ne.s32.totalorder %v969_v6, %v2343_v40  ;;  %vm2586_vm6 = vcmp.ne.s32.totalorder %v970_v10, %v2346_v41 }
  0xad   : > { %v2792_v21 = vsel %vm2581_vm1, 4294967295, %v2791_v21  ;;  %vm2796_vm1 = vcmp.ne.s32.totalorder %v977_v58, %v2346_v41 }
  0xae   : > { %vm2600_vm12 = vmpackc.low %vm2796_vm1, %vm2795_vm5  ;;  %vm635_vm5 = vsmask.f32 5376 }
  0xaf   : > { %vm2800_vm1 = vmpackc.low %vm2503_vm13, %vm2487_vm10  ;;  %v985_v9 = vsel %vm2600_vm12, %v2562_v27, 0  ;;  %vm2802_vm12 = vcmask 1045504   ;;  %v2015_v27 = vld [vmem:[%s2737_s2 + $0x230] sm:$0xff] }
  0xb0   : > { %v256_v15 = vpop.f32.mrf.mxu0 }
  0xb1   : > { %v260_v24 = vmax.f32 %v256_v15, 0.0  ;;  %v2525_v15 = vpack.c.b16 %v1116_v43, %v1116_v43 }
  0xb3   : > { %v2024_v34 = vpack.c.bf16 %v260_v24, %v259_v23  ;;  %v1128_v0 = vshrl.u32 %v2525_v15, 16  ;;  %v1131_v41 = vshll.u32 %v2525_v15, 16 }
  0xb5   : > { %2031 = vst [vmem:[#allocation2 + $0x8] sm:$0xff] %v2024_v34   ;;  %v2793_v34 = vmov 0 }
  0xb6   : > { %v2794_v34 = vsel %vm2586_vm6, 4294967295, %v2793_v34  ;;  %vm474_vm6 = vsmask.f32 6400 }
  0xbc   : > { %v2569_v30 = vld [vmem:[#allocation2 + $0x8] sm:$0xf]  ;;  %v302_v31 = vld [vmem:[#allocation2 + $0xc] sm:$0x3] }
  0xbd   : > { %v356_v36 = vsel %vm2374_vm3, %v302_v31, 0  ;;  %v395_v37 = vunpack.c.l.b16 %v2569_v30  ;;  %v396_v38 = vunpack.c.l.b16 %v302_v31  ;;  %v555_v39 = vld [vmem:[#allocation2 + $0xc] sm:$0x7]  ;;  %v1201_v7 = vld [vmem:[#allocation2 + $0x8] sm:$0xc]  ;;  %vm2799_vm3 = vmpackc.low %vm2475_vm9, %vm2463_vm8  ;;  %v608_v40 = vsel %vm2800_vm1, %v2569_v30, 0 }
  0xbe   : > { %v471_v45 = vunpack.c.l.b16 %v356_v36  ;;  %v355_v16 = vsel %vm2799_vm3, %v2569_v30, 0  ;;  %v609_v50 = vsel %vm2443_vm4, %v555_v39, 0  ;;  %v631_v54 = vunpack.c.l.b16 %v608_v40  ;;  %vm745_vm3 = vmpackc.low %vm2545_vm14, %vm2534_vm7  ;;  %v2642_v56 = vld [vmem:[#allocation2 + $0xc] sm:$0xf]  ;;  %v949_v39 = vld [vmem:[#allocation2 + $0x8] sm:$0xf] }
  0xbf   : > { %v397_v47 = vpack.c.b16 %v395_v37, %v394_v29  ;;  %v398_v49 = vpack.c.b16 %v396_v38, %v396_v38  ;;  %v470_v51 = vunpack.c.l.b16 %v355_v16  ;;  %v632_v57 = vunpack.c.l.b16 %v609_v50  ;;  %vm2801_vm4 = vmpackc.low %vm2360_vm0, %vm2355_vm15  ;;  %v950_v43 = vld [vmem:[#allocation2 + $0xc] sm:$0xf] }
  0xc0   : > { %v473_v52 = vpack.c.b16 %v471_v45, %v471_v45  ;;  %v2636_v35 = vsel %vm2801_vm4, %v1201_v7, 0  ;;  %v633_v53 = vpack.c.b16 %v631_v54, %v630_v11  ;;  %vm752_vm15 = vmpackc.low %vm2555_vm2, %vm2550_vm11  ;;  %v754_v55 = vsel %vm745_vm3, %v2569_v30, 0  ;;  %v2011_v30 = vld [vmem:[%s2737_s2 + $0x210] sm:$0xff] }
  0xc1   : > { %v400_v29 = vrot.slane %v397_v47, 2  ;;  %v401_v58 = vrot.slane %v398_v49, 2  ;;  %v472_v63 = vpack.c.b16 %v470_v51, %v469_v12  ;;  %v634_v61 = vpack.c.b16 %v632_v57, %v632_v57  ;;  %vm2807_vm2 = vmpackc.low %vm2503_vm13, %vm2487_vm10 }
  0xc2   : > { %v484_v1 = vshrl.u32 %v473_v52, 16  ;;  %v487_v2 = vshll.u32 %v473_v52, 16  ;;  %v637_v14 = vshrl.u32 %v633_v53, 16  ;;  %v640_v26 = vshll.u32 %v633_v53, 16  ;;  %v1089_v52 = vld [vmem:[#allocation2 + $0x8] sm:$0xe]  ;;  %vm2811_vm10 = vmpackc.low %vm2475_vm9, %vm2463_vm8 }
  0xc3   : > { %v402_v62 = vsel %vm2802_vm12, %v400_v29, %v401_v58  ;;  %v476_v6 = vshrl.u32 %v472_v63, 16  ;;  %v479_v10 = vshll.u32 %v472_v63, 16  ;;  %v645_v36 = vshrl.u32 %v634_v61, 16 }
  0xc4   : > { %460 = vmatmul.bf16.vlgmr.msra.gmra.mxu1 %v402_v62  ;;  %v486_v11 = vrot.slane %v484_v1, 1  ;;  %v489_v12 = vrot.slane %v487_v2, 2  ;;  %v648_v38 = vshll.u32 %v634_v61, 16  ;;  %vm2803_vm0 = vnez %v2788_v28 }
  0xc5   : > { %1390 = vmatpush.bf16.msra.mxu1 %v2016_v60  ;;  %v478_v31 = vrot.slane %v476_v6, 1  ;;  %v481_v33 = vrot.slane %v479_v10, 2  ;;  %vm2804_vm7 = vnez %v2790_v8  ;;  %v639_v23 = vrot.slane %v637_v14, 2 }
  0xc6   : > { %vm968_vm14 = vmpackc.low %vm2804_vm7, %vm2803_vm0  ;;  %v490_v22 = vor.u32 %v489_v12, %v486_v11  ;;  %v642_v42 = vrot.slane %v640_v26, 3  ;;  %v755_v45 = vsel %vm752_vm15, %v2642_v56, 0  ;;  %vm2805_vm1 = vnez %v2792_v21  ;;  %v2014_v21 = vld [vmem:[%s2737_s2 + $0x228] sm:$0xff] }
  0xc7   : > { %vm2806_vm3 = vnez %v2794_v34  ;;  %v482_v28 = vor.u32 %v481_v33, %v478_v31  ;;  %v647_v7 = vrot.slane %v645_v36, 2  ;;  %v650_v8 = vrot.slane %v648_v38, 3 }
  0xc8   : > { %vm975_vm4 = vmpackc.low %vm2806_vm3, %vm2805_vm1  ;;  %v777_v16 = vunpack.c.l.b16 %v754_v55  ;;  %vm781_vm12 = vsmask.f32 4352  ;;  %v643_v40 = vor.u32 %v642_v42, %v639_v23  ;;  %v778_v47 = vunpack.c.l.b16 %v755_v45 }
  0xc9   : > { %v983_v49 = vsel %vm968_vm14, %v949_v39, 0  ;;  %v1008_v51 = vunpack.c.l.b16 %v985_v9  ;;  %v491_v25 = vsel %vm474_vm6, %v482_v28, %v490_v22  ;;  %v651_v50 = vor.u32 %v650_v8, %v647_v7  ;;  %1391 = vmatpush.bf16.msra.mxu1 %v2015_v27  ;;  %v2012_v27 = vld [vmem:[%s2737_s2 + $0x218] sm:$0xff] }
  0xca   : > { %v779_v24 = vpack.c.b16 %v777_v16, %v776_v32  ;;  %v984_v34 = vsel %vm975_vm4, %v950_v43, 0  ;;  %v1319_v54 = vunpack.c.l.b16 %v2636_v35  ;;  %549 = vmatmul.bf16.vlgmr.msra.gmra.mxu2 %v491_v25  ;;  %v780_v57 = vpack.c.b16 %v778_v47, %v778_v47  ;;  %v1984_v16 = vld [vmem:[#allocation2 + $0x8] sm:$0xf0] }
  0xcb   : > { %v1006_v29 = vunpack.c.l.b16 %v983_v49  ;;  %v1007_v58 = vunpack.c.l.b16 %v984_v34  ;;  %v652_v9 = vsel %vm635_vm5, %v643_v40, %v651_v50  ;;  %v1297_v13 = vsel %vm2807_vm2, %v950_v43, 0  ;;  %v1850_v40 = vld [vmem:[#allocation2 + $0x8] sm:$0xc] }
  0xcc   : > { %v783_v32 = vshrl.u32 %v779_v24, 16  ;;  %v786_v60 = vshll.u32 %v779_v24, 16  ;;  %710 = vmatmul.bf16.vlgmr.msra.gmra.mxu3 %v652_v9  ;;  %v791_v63 = vshrl.u32 %v780_v57, 16  ;;  %v794_v1 = vshll.u32 %v780_v57, 16  ;;  %v2010_v25 = vld [vmem:[%s2737_s2 + $0x208] sm:$0xff]  ;;  %v2009_v57 = vld [vmem:[%s2737_s2 + $0x200] sm:$0xff] }
  0xcd   : > { %v1009_v2 = vpack.c.b16 %v1007_v58, %v1006_v29  ;;  %vm2808_vm11 = vnez %v2760_v4  ;;  %vm2809_vm15 = vnez %v2756_v59  ;;  %1392 = vmatpush.bf16.msra.mxu1 %v2014_v21  ;;  %v1010_v5 = vpack.c.b16 %v1008_v51, %v1008_v51 }
  0xce   : > { %vm2810_vm0 = vmpackc.low %vm2808_vm11, %vm2809_vm15  ;;  %v785_v53 = vrot.slane %v783_v32, 3  ;;  %v788_v61 = vrot.slane %v786_v60, 4  ;;  %v1092_v62 = vsel %vm2811_vm10, %v950_v43, 0  ;;  %v793_v6 = vrot.slane %v791_v63, 3 }
  0xcf   : > { %v1091_v35 = vsel %vm2810_vm0, %v1089_v52, 0  ;;  %v796_v4 = vrot.slane %v794_v1, 4  ;;  %v882_v59 = vunpack.c.l.b16 %v2642_v56  ;;  %v1015_v10 = vshll.u32 %v1009_v2, 16 }
  0xd0   : > { %v1320_v55 = vunpack.c.l.b16 %v1297_v13  ;;  %v789_v11 = vor.u32 %v788_v61, %v785_v53  ;;  %v1114_v12 = vunpack.c.l.b16 %v1091_v35  ;;  %v1115_v14 = vunpack.c.l.b16 %v1092_v62 }
  0xd1   : > { %v797_v26 = vor.u32 %v796_v4, %v793_v6  ;;  %1393 = vmatpush.bf16.msra.mxu1 %v2013_v48  ;;  %v1017_v46 = vrot.slane %v1015_v10, 1  ;;  %v1020_v31 = vshll.u32 %v1010_v5, 16  ;;  %v1323_v33 = vpack.c.b16 %v2531_v18, %v2531_v18 }
  0xd2   : > { %v1117_v44 = vpack.c.b16 %v1115_v14, %v1114_v12  ;;  %v883_v56 = vpack.c.b16 %v882_v59, %v395_v37  ;;  %v1130_v38 = vrot.slane %v1128_v0, 1  ;;  %v1133_v39 = vrot.slane %v1131_v41, 2 }
  0xd3   : > { %v798_v36 = vsel %vm781_vm12, %v789_v11, %v797_v26  ;;  %v1013_v22 = vshrl.u32 %v1009_v2, 16  ;;  %v1322_v43 = vpack.c.b16 %v1320_v55, %v1319_v54  ;;  %v1022_v18 = vrot.slane %v1020_v31, 1 }
  0xd4   : > { %856 = vmatmul.bf16.vlgmr.msrb.gmra.mxu0 %v798_v36  ;;  %v1120_v23 = vshrl.u32 %v1117_v44, 16  ;;  %v1123_v42 = vshll.u32 %v1117_v44, 16  ;;  %941 = vmatmul.bf16.vlgmr.msrb.gmra.mxu1 %v883_v56  ;;  %vm1011_vm8 = vsmask.f32 7424  ;;  %v1224_v37 = vunpack.c.l.b16 %v2378_v3 }
  0xd5   : > { %1394 = vmatpush.bf16.msra.mxu1 %v2012_v27  ;;  %v1018_v45 = vor.u32 %v1017_v46, %v1013_v22  ;;  %v1333_v15 = vshrl.u32 %v1323_v33, 16  ;;  %v1336_v0 = vshll.u32 %v1323_v33, 16  ;;  %v1134_v8 = vor.u32 %v1133_v39, %v1130_v38 }
  0xd6   : > { %v1122_v28 = vrot.slane %v1120_v23, 1  ;;  %v1125_v7 = vrot.slane %v1123_v42, 2  ;;  %v1325_v47 = vshrl.u32 %v1322_v43, 16  ;;  %v1328_v49 = vshll.u32 %v1322_v43, 16 }
  0xd7   : > { %v1023_v51 = vsel %vm1011_vm8, %v1018_v45, %v1022_v18  ;;  %v1851_v50 = vor.u32 %v1984_v16, %v1850_v40  ;;  %v1226_v24 = vpack.c.b16 %v1224_v37, %v1224_v37  ;;  %v1335_v21 = vrot.slane %v1333_v15, 2 }
  0xd8   : > { %v1126_v41 = vor.u32 %v1125_v7, %v1122_v28  ;;  %v1327_v34 = vrot.slane %v1325_v47, 2  ;;  %v1330_v52 = vrot.slane %v1328_v49, 3  ;;  %v1338_v54 = vrot.slane %v1336_v0, 3 }
  0xd9   : > { %1395 = vmatpush.bf16.msra.mxu1 %v2011_v30  ;;  %v1227_v29 = vrot.slane %v1851_v50, 2  ;;  %v1228_v58 = vrot.slane %v1226_v24, 2  ;;  %vm2812_vm9 = vcmask 1045504  }
  0xda   : > { %1081 = vmatmul.bf16.vlgmr.msrb.gmra.mxu2 %v1023_v51  ;;  %v1135_v3 = vsel %vm474_vm6, %v1126_v41, %v1134_v8  ;;  %v1331_v9 = vor.u32 %v1330_v52, %v1327_v34  ;;  %v1339_v13 = vor.u32 %v1338_v54, %v1335_v21 }
  0xdb   : > { %v1229_v32 = vsel %vm2812_vm9, %v1227_v29, %v1228_v58 }
  0xdc   : > { %1193 = vmatmul.bf16.vlgmr.msrb.gmra.mxu3 %v1135_v3  ;;  %v1340_v60 = vsel %vm635_vm5, %v1331_v9, %v1339_v13 }
  0xdd   : > { %1396 = vmatpush.bf16.msra.mxu1 %v2010_v25 }
  0xe1   : > { %1397 = vmatpush.bf16.msra.mxu1 %v2009_v57 }
  0xe4   : > { %1287 = vmatmul.bf16.vlgmr.msra.gmra.mxu0 %v1229_v32  ;;  %1398 = vmatmul.bf16.vlgmr.msra.gmra.mxu1 %v1340_v60 }
 0x141   : > { %v461_v63 = vpop.f32.mrf.mxu1 }
 0x149   : > { %v463_v1 = vpop.f32.mrf.mxu1 }
 0x14d   : > { %v550_v2 = vpop.f32.mrf.mxu2 }
 0x14e   : > { %v551_v61 = vadd.f32 %v550_v2, %v461_v63 }
 0x14f   : > { %v711_v35 = vpop.f32.mrf.mxu3 }
 0x150   : > { %v716_v5 = vadd.f32 %v711_v35, %v551_v61 }
 0x151   : > { %v857_v53 = vpop.f32.mrf.mxu0  ;;  %v942_v48 = vpop.f32.mrf.mxu1 }
 0x152   : > { %v862_v59 = vadd.f32 %v857_v53, %v716_v5 }
 0x154   : > { %v947_v11 = vadd.f32 %v942_v48, %v862_v59 }
 0x155   : > { %v552_v62 = vpop.f32.mrf.mxu2 }
 0x156   : > { %v553_v10 = vadd.f32 %v552_v62, %v463_v1 }
 0x157   : > { %v713_v6 = vpop.f32.mrf.mxu3 }
 0x158   : > { %v717_v12 = vadd.f32 %v713_v6, %v553_v10 }
 0x159   : > { %v859_v4 = vpop.f32.mrf.mxu0  ;;  %v944_v55 = vpop.f32.mrf.mxu1 }
 0x15a   : > { %v863_v31 = vadd.f32 %v859_v4, %v717_v12 }
 0x15c   : > { %v948_v56 = vadd.f32 %v944_v55, %v863_v31 }
 0x15d   : > { %v1082_v14 = vpop.f32.mrf.mxu2 }
 0x15e   : > { %v1087_v26 = vadd.f32 %v1082_v14, %v947_v11 }
 0x15f   : > { %v1194_v27 = vpop.f32.mrf.mxu3 }
 0x160   : > { %v1199_v44 = vadd.f32 %v1194_v27, %v1087_v26 }
 0x161   : > { %v1288_v46 = vpop.f32.mrf.mxu0  ;;  %v1399_v33 = vpop.f32.mrf.mxu1 }
 0x162   : > { %v1293_v36 = vadd.f32 %v1288_v46, %v1199_v44 }
 0x164   : > { %v1404_v39 = vadd.f32 %v1399_v33, %v1293_v36 }
 0x165   : > { %v1084_v38 = vpop.f32.mrf.mxu2 }
 0x166   : > { %v1088_v22 = vadd.f32 %v1084_v38, %v948_v56  ;;  %v1406_v18 = vpack.c.bf16 %v1404_v39, %v1404_v39 }
 0x167   : > { %v1196_v23 = vpop.f32.mrf.mxu3 }
 0x168   : > { %v1200_v42 = vadd.f32 %v1196_v23, %v1088_v22  ;;  %v1408_v30 = vunpack.c.l.bf16 %v1406_v18 }
 0x169   : > { %v1290_v43 = vpop.f32.mrf.mxu0  ;;  %v1401_v45 = vpop.f32.mrf.mxu1 }
 0x16a   : > { %v1294_v28 = vadd.f32 %v1290_v43, %v1200_v42  ;;  %v1410_v0 = vadd.f32 %v2019_v19, %v1408_v30 }
 0x16c   : > { %v1405_v7 = vadd.f32 %v1401_v45, %v1294_v28 }
 0x16e   : > { %v1407_v37 = vpack.c.bf16 %v1405_v7, %v1405_v7 }
 0x170   : > { %v1409_v15 = vunpack.c.l.bf16 %v1407_v37 }
 0x172   : > { %v1411_v41 = vadd.f32 %v2020_v20, %v1409_v15 }
 0x174   : > { %v2029_v8 = vpack.c.bf16 %v1411_v41, %v1410_v0 }
 0x176   : > { %2030 = vst [vmem:[%s170_s8] sm:$0xff] %v2029_v8  }
 0x177 PF: > { %s13_s12 = sadd.s32 1, %s2047_s12  }
 0x178   : > { %p10_p4 = scmp.ge.s32.totalorder %s13_s12, 4  }
 0x17a   :  { %12 = sbr.rel (!%p10_p4) target bundleno = 1 (0x1), region = 70 }

</bundles_post_ra>
